<compile_context>
chip_gen: v7x
topology: tpu7x:2x2x1
jax: 0.10.0
libtpu: 0.0.40
codegen_flags: <defaults>
</compile_context>

<pallas_src>
import numpy as np

import jax
import jax.numpy as jnp
from jax.experimental import pallas as pl
from jax.experimental.pallas import tpu as pltpu

_LN_EPS = 1e-5  # PyTorch LayerNorm default eps


# ----------------------------------------------------------------------------
# In-kernel math helpers.
# ----------------------------------------------------------------------------
def _erf(x):
    # Abramowitz & Stegun 7.1.26 (max abs err ~1.5e-7 -> fp32-exact in practice).
    a1, a2, a3, a4, a5 = 0.254829592, -0.284496736, 1.421413741, -1.453152027, 1.061405429
    p = 0.3275911
    ax = jnp.abs(x)
    t = 1.0 / (1.0 + p * ax)
    poly = ((((a5 * t + a4) * t + a3) * t + a2) * t + a1) * t
    y = 1.0 - poly * jnp.exp(-ax * ax)
    return jnp.where(x >= 0, y, -y)


def _gelu(x):
    return 0.5 * x * (1.0 + _erf(x * 0.7071067811865476))


def _dot(a, b):
    return jnp.dot(a, b, precision=jax.lax.Precision.HIGHEST,
                   preferred_element_type=jnp.float32)


def _layernorm(x, gamma, beta):
    # Full-block LayerNorm: valid because each grid step holds one whole sample.
    mu = jnp.mean(x, keepdims=True)
    var = jnp.mean((x - mu) ** 2, keepdims=True)
    return (x - mu) * jax.lax.rsqrt(var + _LN_EPS) * gamma + beta


# ----------------------------------------------------------------------------
# Fused kernel: one grid step = one batch sample.  Activation layout is
# 2-D (row = height, lane = width*channels, w-major / c-minor).
# ----------------------------------------------------------------------------
def _fused_encoder_kernel(x_ref,                        # (1, 4, 16, 16)  NCHW sample
                          p_ref,                        # (4, 16, 64)     layout matrices
                          r1_ref, m1_ref, b1_ref, g1_ref, be1_ref,   # conv1 constants
                          r2_ref, m2_ref, b2_ref, g2_ref, be2_ref,   # conv2 constants
                          wfc_ref, bfc_ref, gfc_ref, befc_ref,       # fc constants
                          o_ref):                       # (1, 1, 32)
    x = x_ref[0]                                        # (4, 16, 16)

    # ---- NCHW -> lane-dense (H, W*Cin) layout via constant placement matmuls
    x2d = _dot(x[0], p_ref[0])
    for c in range(1, 4):
        x2d = x2d + _dot(x[c], p_ref[c])                # (16, 64)

    # ---- conv1 (3x3, stride 2) + bias + LayerNorm([8,7,7]) + GELU -> (7, 56)
    a1 = _dot(_dot(r1_ref[0], x2d), m1_ref[0])
    for kh in range(1, 3):
        a1 = a1 + _dot(_dot(r1_ref[kh], x2d), m1_ref[kh])
    a1 = a1 + b1_ref[...]
    a1 = _gelu(_layernorm(a1, g1_ref[...], be1_ref[...]))

    # ---- conv2 (3x3, stride 1) + bias + LayerNorm([8,5,5]) + GELU -> (5, 40)
    a2 = _dot(_dot(r2_ref[0], a1), m2_ref[0])
    for kh in range(1, 3):
        a2 = a2 + _dot(_dot(r2_ref[kh], a1), m2_ref[kh])
    a2 = a2 + b2_ref[...]
    a2 = _gelu(_layernorm(a2, g2_ref[...], be2_ref[...]))

    # ---- flatten (folded into Wfc) + Linear(200->32) + LayerNorm([32]) + GELU
    y = bfc_ref[...]                                    # (1, 32)
    for h in range(5):
        y = y + _dot(a2[h:h + 1, :], wfc_ref[h])        # (1,40) @ (40,32)
    y = _gelu(_layernorm(y, gfc_ref[...], befc_ref[...]))
    o_ref[0] = y


def _const_spec(arr):
    zeros = (0,) * arr.ndim
    return pl.BlockSpec(arr.shape, lambda b, _z=zeros: _z)


def conv_encoder_forward(packed, x_nchw):
    """packed: dict of precomputed kernel constants.  x_nchw: (B, 4, 16, 16)."""
    B = x_nchw.shape[0]
    out_sz = packed["bfc"].shape[-1]
    consts = (packed["P"],
              packed["R1"], packed["M1"], packed["b1"], packed["g1"], packed["be1"],
              packed["R2"], packed["M2"], packed["b2"], packed["g2"], packed["be2"],
              packed["Wfc"], packed["bfc"], packed["gfc"], packed["befc"])

    in_specs = [pl.BlockSpec((1,) + tuple(x_nchw.shape[1:]), lambda b: (b, 0, 0, 0))]
    in_specs += [_const_spec(c) for c in consts]

    out = pl.pallas_call(
        _fused_encoder_kernel,
        out_shape=jax.ShapeDtypeStruct((B, 1, out_sz), jnp.float32),
        grid=(B,),
        in_specs=in_specs,
        out_specs=pl.BlockSpec((1, 1, out_sz), lambda b: (b, 0, 0)),
        compiler_params=pltpu.CompilerParams(dimension_semantics=("parallel",)),
    )(x_nchw, *consts)
    return out.reshape(B, out_sz)


conv_encoder_forward_jit = jax.jit(conv_encoder_forward)


# ----------------------------------------------------------------------------
# Parameter init (PyTorch-layout weights) + one-time packing into kernel
# constants.  All relayouts / selection matrices are built HERE, never at
# forward time.
# ----------------------------------------------------------------------------
def init_raw_params(key, conv_channels, in_sz, out_sz):
    sz = list(in_sz)
    strides = [2] + [1] * (len(conv_channels) - 2)
    convs = []
    for i in range(len(conv_channels) - 1):
        cin, cout = conv_channels[i], conv_channels[i + 1]
        key, k1, k2, k3, k4 = jax.random.split(key, 5)
        w = jax.random.normal(k1, (cout, cin, 3, 3), jnp.float32) * 0.1   # PyTorch OIHW
        b = jax.random.normal(k2, (cout,), jnp.float32) * 0.05
        sz = [(sz[0] - 3) // strides[i] + 1, (sz[1] - 3) // strides[i] + 1]
        # non-trivial LN affine so the layout packing is actually exercised
        gamma = 1.0 + 0.1 * jax.random.normal(k3, (cout, sz[0], sz[1]), jnp.float32)
        beta = 0.05 * jax.random.normal(k4, (cout, sz[0], sz[1]), jnp.float32)
        convs.append(dict(w=w, b=b, gamma=gamma, beta=beta,
                          stride=strides[i], hw=tuple(sz)))
    feat = conv_channels[-1] * sz[0] * sz[1]
    key, k1, k2, k3, k4 = jax.random.split(key, 5)
    return dict(
        convs=convs,
        fc_w=jax.random.normal(k1, (out_sz, feat), jnp.float32) * 0.05,   # (out, in)
        fc_b=jax.random.normal(k2, (out_sz,), jnp.float32) * 0.05,
        fc_ln_g=1.0 + 0.1 * jax.random.normal(k3, (out_sz,), jnp.float32),
        fc_ln_b=0.05 * jax.random.normal(k4, (out_sz,), jnp.float32),
    )


def _pack_input_layout(cin, W):
    """P[c]: (W, W*cin) placement so that sum_c x[c] @ P[c] has layout [h, w*cin+c]."""
    P = np.zeros((cin, W, W * cin), np.float32)
    for c in range(cin):
        for w in range(W):
            P[c, w, w * cin + c] = 1.0
    return P


def _pack_conv_layer(w, b, gamma, beta, stride, in_hw):
    """Conv as  out = sum_kh (R[kh] @ X) @ M[kh]  with X in (H, W*cin) layout,
    out in (Ho, Wo*cout) layout."""
    cout, cin, _, _ = w.shape
    H, W = in_hw
    Ho = (H - 3) // stride + 1
    Wo = (W - 3) // stride + 1
    R = np.zeros((3, Ho, H), np.float32)
    M = np.zeros((3, W * cin, Wo * cout), np.float32)
    for kh in range(3):
        for ho in range(Ho):
            R[kh, ho, stride * ho + kh] = 1.0
        for wo in range(Wo):
            for kw in range(3):
                wcol = stride * wo + kw
                for ci in range(cin):
                    for co in range(cout):
                        M[kh, wcol * cin + ci, wo * cout + co] = w[co, ci, kh, kw]
    bias2d = np.tile(np.asarray(b, np.float32), Wo).reshape(1, Wo * cout)
    g2d = np.transpose(np.asarray(gamma, np.float32), (1, 2, 0)).reshape(Ho, Wo * cout)
    be2d = np.transpose(np.asarray(beta, np.float32), (1, 2, 0)).reshape(Ho, Wo * cout)
    return R, M, bias2d, g2d, be2d, (Ho, Wo)


def _pack_fc(fcw, fcb, g, be, cout, Ho, Wo):
    """Fold the PyTorch NCHW flatten permutation into the FC weight so the FC
    directly consumes the kernel's (ho, wo*cout+co) activation layout."""
    out_sz = fcw.shape[0]
    Wfc = np.zeros((Ho, Wo * cout, out_sz), np.float32)
    for ho in range(Ho):
        for wo in range(Wo):
            for co in range(cout):
                f = (co * Ho + ho) * Wo + wo            # flatten index in (C,H,W) order
                Wfc[ho, wo * cout + co, :] = fcw[:, f]
    return (Wfc,
            np.asarray(fcb, np.float32).reshape(1, -1),
            np.asarray(g, np.float32).reshape(1, -1),
            np.asarray(be, np.float32).reshape(1, -1))


def pack_params(raw, conv_channels, in_sz):
    c1, c2 = raw["convs"]
    H, W = in_sz
    P = _pack_input_layout(conv_channels[0], W)
    R1, M1, b1, g1, be1, hw1 = _pack_conv_layer(
        np.asarray(c1["w"]), np.asarray(c1["b"]),
        np.asarray(c1["gamma"]), np.asarray(c1["beta"]), c1["stride"], (H, W))
    R2, M2, b2, g2, be2, hw2 = _pack_conv_layer(
        np.asarray(c2["w"]), np.asarray(c2["b"]),
        np.asarray(c2["gamma"]), np.asarray(c2["beta"]), c2["stride"], hw1)
    Wfc, bfc, gfc, befc = _pack_fc(
        np.asarray(raw["fc_w"]), np.asarray(raw["fc_b"]),
        np.asarray(raw["fc_ln_g"]), np.asarray(raw["fc_ln_b"]),
        conv_channels[-1], hw2[0], hw2[1])
    packed = dict(P=P, R1=R1, M1=M1, b1=b1, g1=g1, be1=be1,
                  R2=R2, M2=M2, b2=b2, g2=g2, be2=be2,
                  Wfc=Wfc, bfc=bfc, gfc=gfc, befc=befc)
    return {k: jnp.asarray(v) for k, v in packed.items()}


# ----------------------------------------------------------------------------
# Pure-JAX reference (exactly the PyTorch forward) for validation.
# ----------------------------------------------------------------------------
def reference_forward(raw, x):
    h = x
    for layer in raw["convs"]:
        h = jax.lax.conv_general_dilated(
            h, layer["w"], window_strides=(layer["stride"],) * 2, padding="VALID",
            dimension_numbers=("NCHW", "OIHW", "NCHW"),
            precision=jax.lax.Precision.HIGHEST)
        h = h + layer["b"].reshape(1, -1, 1, 1)
        mu = jnp.mean(h, axis=(1, 2, 3), keepdims=True)
        var = jnp.mean((h - mu) ** 2, axis=(1, 2, 3), keepdims=True)
        h = (h - mu) * jax.lax.rsqrt(var + _LN_EPS)
        h = h * layer["gamma"][None] + layer["beta"][None]
        h = jax.nn.gelu(h, approximate=False)
    flat = h.reshape(h.shape[0], -1)                    # NCHW flatten
    y = jnp.dot(flat, raw["fc_w"].T, precision=jax.lax.Precision.HIGHEST) + raw["fc_b"]
    mu = jnp.mean(y, axis=-1, keepdims=True)
    var = jnp.mean((y - mu) ** 2, axis=-1, keepdims=True)
    y = (y - mu) * jax.lax.rsqrt(var + _LN_EPS) * raw["fc_ln_g"] + raw["fc_ln_b"]
    return jax.nn.gelu(y, approximate=False)


if __name__ == "__main__":
    conv_channels = [4, 8, 8]
    in_sz = [16, 16]
    out_sz = 32
    batch = 2

    key = jax.random.PRNGKey(0)
    key, kp, kx = jax.random.split(key, 3)
    raw = init_raw_params(kp, conv_channels, in_sz, out_sz)
    packed = pack_params(raw, conv_channels, in_sz)
    x = jax.random.normal(kx, (batch, conv_channels[0], in_sz[0], in_sz[1]), jnp.float32)

    out = jax.block_until_ready(conv_encoder_forward_jit(packed, x))
    assert out.shape == (batch, out_sz), out.shape
    assert bool(jnp.all(jnp.isfinite(out)))

    ref = jax.block_until_ready(reference_forward(raw, x))
    max_err = float(jnp.max(jnp.abs(out - ref)))
    assert max_err < 1e-3, f"fused kernel mismatch vs reference: max abs err {max_err}"

    print("KERNEL_OK")
</pallas_src>

<mosaic_0001>
module attributes {stable_mosaic.version = 11 : i64} {
  func.func @_fused_encoder_kernel(%arg0: i32, %arg1: memref<1x4x16x16xf32, #tpu.memory_space<vmem>>, %arg2: memref<4x16x64xf32, #tpu.memory_space<vmem>>, %arg3: memref<3x7x16xf32, #tpu.memory_space<vmem>>, %arg4: memref<3x64x56xf32, #tpu.memory_space<vmem>>, %arg5: memref<1x56xf32, #tpu.memory_space<vmem>>, %arg6: memref<7x56xf32, #tpu.memory_space<vmem>>, %arg7: memref<7x56xf32, #tpu.memory_space<vmem>>, %arg8: memref<3x5x7xf32, #tpu.memory_space<vmem>>, %arg9: memref<3x56x40xf32, #tpu.memory_space<vmem>>, %arg10: memref<1x40xf32, #tpu.memory_space<vmem>>, %arg11: memref<5x40xf32, #tpu.memory_space<vmem>>, %arg12: memref<5x40xf32, #tpu.memory_space<vmem>>, %arg13: memref<5x40x32xf32, #tpu.memory_space<vmem>>, %arg14: memref<1x32xf32, #tpu.memory_space<vmem>>, %arg15: memref<1x32xf32, #tpu.memory_space<vmem>>, %arg16: memref<1x32xf32, #tpu.memory_space<vmem>>, %arg17: memref<1x1x32xf32, #tpu.memory_space<vmem>>) attributes {dimension_semantics = [#tpu.dimension_semantics<parallel>], iteration_bounds = array<i64: 2>, scalar_prefetch = 0 : i64, scratch_operands = 0 : i64, tpu.core_type = #tpu.core_type<tc>, window_params = [{transform_indices = @transform_0, window_bounds = array<i64: 1, 4, 16, 16>}, {pipeline_mode = #tpu.pipeline_mode<synchronous>, transform_indices = @transform_1, window_bounds = array<i64: 4, 16, 64>}, {pipeline_mode = #tpu.pipeline_mode<synchronous>, transform_indices = @transform_2, window_bounds = array<i64: 3, 7, 16>}, {pipeline_mode = #tpu.pipeline_mode<synchronous>, transform_indices = @transform_3, window_bounds = array<i64: 3, 64, 56>}, {pipeline_mode = #tpu.pipeline_mode<synchronous>, transform_indices = @transform_4, window_bounds = array<i64: 1, 56>}, {pipeline_mode = #tpu.pipeline_mode<synchronous>, transform_indices = @transform_5, window_bounds = array<i64: 7, 56>}, {pipeline_mode = #tpu.pipeline_mode<synchronous>, transform_indices = @transform_6, window_bounds = array<i64: 7, 56>}, {pipeline_mode = #tpu.pipeline_mode<synchronous>, transform_indices = @transform_7, window_bounds = array<i64: 3, 5, 7>}, {pipeline_mode = #tpu.pipeline_mode<synchronous>, transform_indices = @transform_8, window_bounds = array<i64: 3, 56, 40>}, {pipeline_mode = #tpu.pipeline_mode<synchronous>, transform_indices = @transform_9, window_bounds = array<i64: 1, 40>}, {pipeline_mode = #tpu.pipeline_mode<synchronous>, transform_indices = @transform_10, window_bounds = array<i64: 5, 40>}, {pipeline_mode = #tpu.pipeline_mode<synchronous>, transform_indices = @transform_11, window_bounds = array<i64: 5, 40>}, {pipeline_mode = #tpu.pipeline_mode<synchronous>, transform_indices = @transform_12, window_bounds = array<i64: 5, 40, 32>}, {pipeline_mode = #tpu.pipeline_mode<synchronous>, transform_indices = @transform_13, window_bounds = array<i64: 1, 32>}, {pipeline_mode = #tpu.pipeline_mode<synchronous>, transform_indices = @transform_14, window_bounds = array<i64: 1, 32>}, {pipeline_mode = #tpu.pipeline_mode<synchronous>, transform_indices = @transform_15, window_bounds = array<i64: 1, 32>}, {transform_indices = @transform_16, window_bounds = array<i64: 1, 1, 32>}]} {
    %c0 = arith.constant 0 : index
    %c0_0 = arith.constant 0 : index
    %c0_1 = arith.constant 0 : index
    %c0_2 = arith.constant 0 : index
    %0 = vector.load %arg1[%c0, %c0_0, %c0_1, %c0_2] : memref<1x4x16x16xf32, #tpu.memory_space<vmem>>, vector<1x4x16x16xf32>
    %1 = vector.shape_cast %0 : vector<1x4x16x16xf32> to vector<4x16x16xf32>
    %2 = vector.extract_strided_slice %1 {offsets = [0, 0, 0], sizes = [1, 16, 16], strides = [1, 1, 1]} : vector<4x16x16xf32> to vector<1x16x16xf32>
    %3 = vector.shape_cast %2 : vector<1x16x16xf32> to vector<16x16xf32>
    %c0_3 = arith.constant 0 : index
    %c0_4 = arith.constant 0 : index
    %c0_5 = arith.constant 0 : index
    %4 = vector.load %arg2[%c0_3, %c0_4, %c0_5] : memref<4x16x64xf32, #tpu.memory_space<vmem>>, vector<1x16x64xf32>
    %5 = vector.shape_cast %4 : vector<1x16x64xf32> to vector<16x64xf32>
    %cst = arith.constant dense<0.000000e+00> : vector<16x64xf32>
    %6 = tpu.matmul %3, %5, %cst {dimension_numbers = #tpu.dot_dimension_numbers<[1], [0], [0], [1], [0, 0, 1, 1], [], []>, precision = #tpu.contract_precision<fp32>} : vector<16x16xf32>, vector<16x64xf32>, vector<16x64xf32> -> vector<16x64xf32>
    %7 = vector.extract_strided_slice %1 {offsets = [1, 0, 0], sizes = [1, 16, 16], strides = [1, 1, 1]} : vector<4x16x16xf32> to vector<1x16x16xf32>
    %8 = vector.shape_cast %7 : vector<1x16x16xf32> to vector<16x16xf32>
    %c1 = arith.constant 1 : index
    %c0_6 = arith.constant 0 : index
    %c0_7 = arith.constant 0 : index
    %9 = vector.load %arg2[%c1, %c0_6, %c0_7] : memref<4x16x64xf32, #tpu.memory_space<vmem>>, vector<1x16x64xf32>
    %10 = vector.shape_cast %9 : vector<1x16x64xf32> to vector<16x64xf32>
    %cst_8 = arith.constant dense<0.000000e+00> : vector<16x64xf32>
    %11 = tpu.matmul %8, %10, %cst_8 {dimension_numbers = #tpu.dot_dimension_numbers<[1], [0], [0], [1], [0, 0, 1, 1], [], []>, precision = #tpu.contract_precision<fp32>} : vector<16x16xf32>, vector<16x64xf32>, vector<16x64xf32> -> vector<16x64xf32>
    %12 = arith.addf %6, %11 : vector<16x64xf32>
    %13 = vector.extract_strided_slice %1 {offsets = [2, 0, 0], sizes = [1, 16, 16], strides = [1, 1, 1]} : vector<4x16x16xf32> to vector<1x16x16xf32>
    %14 = vector.shape_cast %13 : vector<1x16x16xf32> to vector<16x16xf32>
    %c2 = arith.constant 2 : index
    %c0_9 = arith.constant 0 : index
    %c0_10 = arith.constant 0 : index
    %15 = vector.load %arg2[%c2, %c0_9, %c0_10] : memref<4x16x64xf32, #tpu.memory_space<vmem>>, vector<1x16x64xf32>
    %16 = vector.shape_cast %15 : vector<1x16x64xf32> to vector<16x64xf32>
    %cst_11 = arith.constant dense<0.000000e+00> : vector<16x64xf32>
    %17 = tpu.matmul %14, %16, %cst_11 {dimension_numbers = #tpu.dot_dimension_numbers<[1], [0], [0], [1], [0, 0, 1, 1], [], []>, precision = #tpu.contract_precision<fp32>} : vector<16x16xf32>, vector<16x64xf32>, vector<16x64xf32> -> vector<16x64xf32>
    %18 = arith.addf %12, %17 : vector<16x64xf32>
    %19 = vector.extract_strided_slice %1 {offsets = [3, 0, 0], sizes = [1, 16, 16], strides = [1, 1, 1]} : vector<4x16x16xf32> to vector<1x16x16xf32>
    %20 = vector.shape_cast %19 : vector<1x16x16xf32> to vector<16x16xf32>
    %c3 = arith.constant 3 : index
    %c0_12 = arith.constant 0 : index
    %c0_13 = arith.constant 0 : index
    %21 = vector.load %arg2[%c3, %c0_12, %c0_13] : memref<4x16x64xf32, #tpu.memory_space<vmem>>, vector<1x16x64xf32>
    %22 = vector.shape_cast %21 : vector<1x16x64xf32> to vector<16x64xf32>
    %cst_14 = arith.constant dense<0.000000e+00> : vector<16x64xf32>
    %23 = tpu.matmul %20, %22, %cst_14 {dimension_numbers = #tpu.dot_dimension_numbers<[1], [0], [0], [1], [0, 0, 1, 1], [], []>, precision = #tpu.contract_precision<fp32>} : vector<16x16xf32>, vector<16x64xf32>, vector<16x64xf32> -> vector<16x64xf32>
    %24 = arith.addf %18, %23 : vector<16x64xf32>
    %c0_15 = arith.constant 0 : index
    %c0_16 = arith.constant 0 : index
    %c0_17 = arith.constant 0 : index
    %25 = vector.load %arg3[%c0_15, %c0_16, %c0_17] : memref<3x7x16xf32, #tpu.memory_space<vmem>>, vector<1x7x16xf32>
    %26 = vector.shape_cast %25 : vector<1x7x16xf32> to vector<7x16xf32>
    %cst_18 = arith.constant dense<0.000000e+00> : vector<7x64xf32>
    %27 = tpu.matmul %26, %24, %cst_18 {dimension_numbers = #tpu.dot_dimension_numbers<[1], [0], [0], [1], [0, 0, 1, 1], [], []>, precision = #tpu.contract_precision<fp32>} : vector<7x16xf32>, vector<16x64xf32>, vector<7x64xf32> -> vector<7x64xf32>
    %c0_19 = arith.constant 0 : index
    %c0_20 = arith.constant 0 : index
    %c0_21 = arith.constant 0 : index
    %28 = vector.load %arg4[%c0_19, %c0_20, %c0_21] : memref<3x64x56xf32, #tpu.memory_space<vmem>>, vector<1x64x56xf32>
    %29 = vector.shape_cast %28 : vector<1x64x56xf32> to vector<64x56xf32>
    %cst_22 = arith.constant dense<0.000000e+00> : vector<7x56xf32>
    %30 = tpu.matmul %27, %29, %cst_22 {dimension_numbers = #tpu.dot_dimension_numbers<[1], [0], [0], [1], [0, 0, 1, 1], [], []>, precision = #tpu.contract_precision<fp32>} : vector<7x64xf32>, vector<64x56xf32>, vector<7x56xf32> -> vector<7x56xf32>
    %c1_23 = arith.constant 1 : index
    %c0_24 = arith.constant 0 : index
    %c0_25 = arith.constant 0 : index
    %31 = vector.load %arg3[%c1_23, %c0_24, %c0_25] : memref<3x7x16xf32, #tpu.memory_space<vmem>>, vector<1x7x16xf32>
    %32 = vector.shape_cast %31 : vector<1x7x16xf32> to vector<7x16xf32>
    %cst_26 = arith.constant dense<0.000000e+00> : vector<7x64xf32>
    %33 = tpu.matmul %32, %24, %cst_26 {dimension_numbers = #tpu.dot_dimension_numbers<[1], [0], [0], [1], [0, 0, 1, 1], [], []>, precision = #tpu.contract_precision<fp32>} : vector<7x16xf32>, vector<16x64xf32>, vector<7x64xf32> -> vector<7x64xf32>
    %c1_27 = arith.constant 1 : index
    %c0_28 = arith.constant 0 : index
    %c0_29 = arith.constant 0 : index
    %34 = vector.load %arg4[%c1_27, %c0_28, %c0_29] : memref<3x64x56xf32, #tpu.memory_space<vmem>>, vector<1x64x56xf32>
    %35 = vector.shape_cast %34 : vector<1x64x56xf32> to vector<64x56xf32>
    %cst_30 = arith.constant dense<0.000000e+00> : vector<7x56xf32>
    %36 = tpu.matmul %33, %35, %cst_30 {dimension_numbers = #tpu.dot_dimension_numbers<[1], [0], [0], [1], [0, 0, 1, 1], [], []>, precision = #tpu.contract_precision<fp32>} : vector<7x64xf32>, vector<64x56xf32>, vector<7x56xf32> -> vector<7x56xf32>
    %37 = arith.addf %30, %36 : vector<7x56xf32>
    %c2_31 = arith.constant 2 : index
    %c0_32 = arith.constant 0 : index
    %c0_33 = arith.constant 0 : index
    %38 = vector.load %arg3[%c2_31, %c0_32, %c0_33] : memref<3x7x16xf32, #tpu.memory_space<vmem>>, vector<1x7x16xf32>
    %39 = vector.shape_cast %38 : vector<1x7x16xf32> to vector<7x16xf32>
    %cst_34 = arith.constant dense<0.000000e+00> : vector<7x64xf32>
    %40 = tpu.matmul %39, %24, %cst_34 {dimension_numbers = #tpu.dot_dimension_numbers<[1], [0], [0], [1], [0, 0, 1, 1], [], []>, precision = #tpu.contract_precision<fp32>} : vector<7x16xf32>, vector<16x64xf32>, vector<7x64xf32> -> vector<7x64xf32>
    %c2_35 = arith.constant 2 : index
    %c0_36 = arith.constant 0 : index
    %c0_37 = arith.constant 0 : index
    %41 = vector.load %arg4[%c2_35, %c0_36, %c0_37] : memref<3x64x56xf32, #tpu.memory_space<vmem>>, vector<1x64x56xf32>
    %42 = vector.shape_cast %41 : vector<1x64x56xf32> to vector<64x56xf32>
    %cst_38 = arith.constant dense<0.000000e+00> : vector<7x56xf32>
    %43 = tpu.matmul %40, %42, %cst_38 {dimension_numbers = #tpu.dot_dimension_numbers<[1], [0], [0], [1], [0, 0, 1, 1], [], []>, precision = #tpu.contract_precision<fp32>} : vector<7x64xf32>, vector<64x56xf32>, vector<7x56xf32> -> vector<7x56xf32>
    %44 = arith.addf %37, %43 : vector<7x56xf32>
    %c0_39 = arith.constant 0 : index
    %c0_40 = arith.constant 0 : index
    %45 = vector.load %arg5[%c0_39, %c0_40] : memref<1x56xf32, #tpu.memory_space<vmem>>, vector<1x56xf32>
    %46 = vector.broadcast %45 : vector<1x56xf32> to vector<7x56xf32>
    %47 = arith.addf %44, %46 : vector<7x56xf32>
    %c0_41 = arith.constant 0 : index
    %c0_42 = arith.constant 0 : index
    %48 = vector.load %arg6[%c0_41, %c0_42] : memref<7x56xf32, #tpu.memory_space<vmem>>, vector<7x56xf32>
    %c0_43 = arith.constant 0 : index
    %c0_44 = arith.constant 0 : index
    %49 = vector.load %arg7[%c0_43, %c0_44] : memref<7x56xf32, #tpu.memory_space<vmem>>, vector<7x56xf32>
    %50 = vector.shape_cast %47 : vector<7x56xf32> to vector<1x7x56xf32>
    %cst_45 = arith.constant dense<0.000000e+00> : vector<1xf32>
    %51 = vector.multi_reduction <add>, %50, %cst_45 [1, 2] : vector<1x7x56xf32> to vector<1xf32>
    %52 = vector.shape_cast %51 : vector<1xf32> to vector<1x1x1xf32>
    %53 = vector.extract %52[0, 0, 0] : f32 from vector<1x1x1xf32>
    %54 = vector.broadcast %53 : f32 to vector<1x1xf32>
    %cst_46 = arith.constant 3.920000e+02 : f32
    %55 = vector.broadcast %cst_46 : f32 to vector<1x1xf32>
    %56 = arith.divf %54, %55 : vector<1x1xf32>
    %57 = vector.broadcast %56 : vector<1x1xf32> to vector<7x56xf32>
    %58 = arith.subf %47, %57 : vector<7x56xf32>
    %59 = arith.mulf %58, %58 : vector<7x56xf32>
    %60 = vector.shape_cast %59 : vector<7x56xf32> to vector<1x7x56xf32>
    %cst_47 = arith.constant dense<0.000000e+00> : vector<1xf32>
    %61 = vector.multi_reduction <add>, %60, %cst_47 [1, 2] : vector<1x7x56xf32> to vector<1xf32>
    %62 = vector.shape_cast %61 : vector<1xf32> to vector<1x1x1xf32>
    %63 = vector.extract %62[0, 0, 0] : f32 from vector<1x1x1xf32>
    %64 = vector.broadcast %63 : f32 to vector<1x1xf32>
    %cst_48 = arith.constant 3.920000e+02 : f32
    %65 = vector.broadcast %cst_48 : f32 to vector<1x1xf32>
    %66 = arith.divf %64, %65 : vector<1x1xf32>
    %67 = vector.broadcast %56 : vector<1x1xf32> to vector<7x56xf32>
    %68 = arith.subf %47, %67 : vector<7x56xf32>
    %cst_49 = arith.constant 9.99999974E-6 : f32
    %69 = vector.broadcast %cst_49 : f32 to vector<1x1xf32>
    %70 = arith.addf %66, %69 : vector<1x1xf32>
    %71 = math.rsqrt %70 : vector<1x1xf32>
    %72 = vector.broadcast %71 : vector<1x1xf32> to vector<7x56xf32>
    %73 = arith.mulf %68, %72 : vector<7x56xf32>
    %74 = arith.mulf %73, %48 : vector<7x56xf32>
    %75 = arith.addf %74, %49 : vector<7x56xf32>
    %cst_50 = arith.constant 5.000000e-01 : f32
    %76 = vector.broadcast %cst_50 : f32 to vector<7x56xf32>
    %77 = arith.mulf %76, %75 : vector<7x56xf32>
    %cst_51 = arith.constant 0.707106769 : f32
    %78 = vector.broadcast %cst_51 : f32 to vector<7x56xf32>
    %79 = arith.mulf %75, %78 : vector<7x56xf32>
    %80 = math.absf %79 : vector<7x56xf32>
    %cst_52 = arith.constant 0.327591091 : f32
    %81 = vector.broadcast %cst_52 : f32 to vector<7x56xf32>
    %82 = arith.mulf %81, %80 : vector<7x56xf32>
    %cst_53 = arith.constant 1.000000e+00 : f32
    %83 = vector.broadcast %cst_53 : f32 to vector<7x56xf32>
    %84 = arith.addf %83, %82 : vector<7x56xf32>
    %cst_54 = arith.constant 1.000000e+00 : f32
    %85 = vector.broadcast %cst_54 : f32 to vector<7x56xf32>
    %86 = arith.divf %85, %84 : vector<7x56xf32>
    %cst_55 = arith.constant 1.06140542 : f32
    %87 = vector.broadcast %cst_55 : f32 to vector<7x56xf32>
    %88 = arith.mulf %87, %86 : vector<7x56xf32>
    %cst_56 = arith.constant -1.45315206 : f32
    %89 = vector.broadcast %cst_56 : f32 to vector<7x56xf32>
    %90 = arith.addf %88, %89 : vector<7x56xf32>
    %91 = arith.mulf %90, %86 : vector<7x56xf32>
    %cst_57 = arith.constant 1.42141378 : f32
    %92 = vector.broadcast %cst_57 : f32 to vector<7x56xf32>
    %93 = arith.addf %91, %92 : vector<7x56xf32>
    %94 = arith.mulf %93, %86 : vector<7x56xf32>
    %cst_58 = arith.constant -0.284496725 : f32
    %95 = vector.broadcast %cst_58 : f32 to vector<7x56xf32>
    %96 = arith.addf %94, %95 : vector<7x56xf32>
    %97 = arith.mulf %96, %86 : vector<7x56xf32>
    %cst_59 = arith.constant 0.254829586 : f32
    %98 = vector.broadcast %cst_59 : f32 to vector<7x56xf32>
    %99 = arith.addf %97, %98 : vector<7x56xf32>
    %100 = arith.mulf %99, %86 : vector<7x56xf32>
    %cst_60 = arith.constant 0.000000e+00 : f32
    %101 = vector.broadcast %cst_60 : f32 to vector<7x56xf32>
    %102 = arith.subf %101, %80 : vector<7x56xf32>
    %103 = arith.mulf %102, %80 : vector<7x56xf32>
    %104 = math.exp %103 : vector<7x56xf32>
    %105 = arith.mulf %100, %104 : vector<7x56xf32>
    %cst_61 = arith.constant 1.000000e+00 : f32
    %106 = vector.broadcast %cst_61 : f32 to vector<7x56xf32>
    %107 = arith.subf %106, %105 : vector<7x56xf32>
    %cst_62 = arith.constant 0.000000e+00 : f32
    %108 = vector.broadcast %cst_62 : f32 to vector<7x56xf32>
    %109 = arith.cmpf oge, %79, %108 : vector<7x56xf32>
    %cst_63 = arith.constant 0.000000e+00 : f32
    %110 = vector.broadcast %cst_63 : f32 to vector<7x56xf32>
    %111 = arith.subf %110, %107 : vector<7x56xf32>
    %112 = arith.select %109, %107, %111 : vector<7x56xi1>, vector<7x56xf32>
    %cst_64 = arith.constant 1.000000e+00 : f32
    %113 = vector.broadcast %cst_64 : f32 to vector<7x56xf32>
    %114 = arith.addf %113, %112 : vector<7x56xf32>
    %115 = arith.mulf %77, %114 : vector<7x56xf32>
    %c0_65 = arith.constant 0 : index
    %c0_66 = arith.constant 0 : index
    %c0_67 = arith.constant 0 : index
    %116 = vector.load %arg8[%c0_65, %c0_66, %c0_67] : memref<3x5x7xf32, #tpu.memory_space<vmem>>, vector<1x5x7xf32>
    %117 = vector.shape_cast %116 : vector<1x5x7xf32> to vector<5x7xf32>
    %cst_68 = arith.constant dense<0.000000e+00> : vector<5x56xf32>
    %118 = tpu.matmul %117, %115, %cst_68 {dimension_numbers = #tpu.dot_dimension_numbers<[1], [0], [0], [1], [0, 0, 1, 1], [], []>, precision = #tpu.contract_precision<fp32>} : vector<5x7xf32>, vector<7x56xf32>, vector<5x56xf32> -> vector<5x56xf32>
    %c0_69 = arith.constant 0 : index
    %c0_70 = arith.constant 0 : index
    %c0_71 = arith.constant 0 : index
    %119 = vector.load %arg9[%c0_69, %c0_70, %c0_71] : memref<3x56x40xf32, #tpu.memory_space<vmem>>, vector<1x56x40xf32>
    %120 = vector.shape_cast %119 : vector<1x56x40xf32> to vector<56x40xf32>
    %cst_72 = arith.constant dense<0.000000e+00> : vector<5x40xf32>
    %121 = tpu.matmul %118, %120, %cst_72 {dimension_numbers = #tpu.dot_dimension_numbers<[1], [0], [0], [1], [0, 0, 1, 1], [], []>, precision = #tpu.contract_precision<fp32>} : vector<5x56xf32>, vector<56x40xf32>, vector<5x40xf32> -> vector<5x40xf32>
    %c1_73 = arith.constant 1 : index
    %c0_74 = arith.constant 0 : index
    %c0_75 = arith.constant 0 : index
    %122 = vector.load %arg8[%c1_73, %c0_74, %c0_75] : memref<3x5x7xf32, #tpu.memory_space<vmem>>, vector<1x5x7xf32>
    %123 = vector.shape_cast %122 : vector<1x5x7xf32> to vector<5x7xf32>
    %cst_76 = arith.constant dense<0.000000e+00> : vector<5x56xf32>
    %124 = tpu.matmul %123, %115, %cst_76 {dimension_numbers = #tpu.dot_dimension_numbers<[1], [0], [0], [1], [0, 0, 1, 1], [], []>, precision = #tpu.contract_precision<fp32>} : vector<5x7xf32>, vector<7x56xf32>, vector<5x56xf32> -> vector<5x56xf32>
    %c1_77 = arith.constant 1 : index
    %c0_78 = arith.constant 0 : index
    %c0_79 = arith.constant 0 : index
    %125 = vector.load %arg9[%c1_77, %c0_78, %c0_79] : memref<3x56x40xf32, #tpu.memory_space<vmem>>, vector<1x56x40xf32>
    %126 = vector.shape_cast %125 : vector<1x56x40xf32> to vector<56x40xf32>
    %cst_80 = arith.constant dense<0.000000e+00> : vector<5x40xf32>
    %127 = tpu.matmul %124, %126, %cst_80 {dimension_numbers = #tpu.dot_dimension_numbers<[1], [0], [0], [1], [0, 0, 1, 1], [], []>, precision = #tpu.contract_precision<fp32>} : vector<5x56xf32>, vector<56x40xf32>, vector<5x40xf32> -> vector<5x40xf32>
    %128 = arith.addf %121, %127 : vector<5x40xf32>
    %c2_81 = arith.constant 2 : index
    %c0_82 = arith.constant 0 : index
    %c0_83 = arith.constant 0 : index
    %129 = vector.load %arg8[%c2_81, %c0_82, %c0_83] : memref<3x5x7xf32, #tpu.memory_space<vmem>>, vector<1x5x7xf32>
    %130 = vector.shape_cast %129 : vector<1x5x7xf32> to vector<5x7xf32>
    %cst_84 = arith.constant dense<0.000000e+00> : vector<5x56xf32>
    %131 = tpu.matmul %130, %115, %cst_84 {dimension_numbers = #tpu.dot_dimension_numbers<[1], [0], [0], [1], [0, 0, 1, 1], [], []>, precision = #tpu.contract_precision<fp32>} : vector<5x7xf32>, vector<7x56xf32>, vector<5x56xf32> -> vector<5x56xf32>
    %c2_85 = arith.constant 2 : index
    %c0_86 = arith.constant 0 : index
    %c0_87 = arith.constant 0 : index
    %132 = vector.load %arg9[%c2_85, %c0_86, %c0_87] : memref<3x56x40xf32, #tpu.memory_space<vmem>>, vector<1x56x40xf32>
    %133 = vector.shape_cast %132 : vector<1x56x40xf32> to vector<56x40xf32>
    %cst_88 = arith.constant dense<0.000000e+00> : vector<5x40xf32>
    %134 = tpu.matmul %131, %133, %cst_88 {dimension_numbers = #tpu.dot_dimension_numbers<[1], [0], [0], [1], [0, 0, 1, 1], [], []>, precision = #tpu.contract_precision<fp32>} : vector<5x56xf32>, vector<56x40xf32>, vector<5x40xf32> -> vector<5x40xf32>
    %135 = arith.addf %128, %134 : vector<5x40xf32>
    %c0_89 = arith.constant 0 : index
    %c0_90 = arith.constant 0 : index
    %136 = vector.load %arg10[%c0_89, %c0_90] : memref<1x40xf32, #tpu.memory_space<vmem>>, vector<1x40xf32>
    %137 = vector.broadcast %136 : vector<1x40xf32> to vector<5x40xf32>
    %138 = arith.addf %135, %137 : vector<5x40xf32>
    %c0_91 = arith.constant 0 : index
    %c0_92 = arith.constant 0 : index
    %139 = vector.load %arg11[%c0_91, %c0_92] : memref<5x40xf32, #tpu.memory_space<vmem>>, vector<5x40xf32>
    %c0_93 = arith.constant 0 : index
    %c0_94 = arith.constant 0 : index
    %140 = vector.load %arg12[%c0_93, %c0_94] : memref<5x40xf32, #tpu.memory_space<vmem>>, vector<5x40xf32>
    %141 = vector.shape_cast %138 : vector<5x40xf32> to vector<1x5x40xf32>
    %cst_95 = arith.constant dense<0.000000e+00> : vector<1xf32>
    %142 = vector.multi_reduction <add>, %141, %cst_95 [1, 2] : vector<1x5x40xf32> to vector<1xf32>
    %143 = vector.shape_cast %142 : vector<1xf32> to vector<1x1x1xf32>
    %144 = vector.extract %143[0, 0, 0] : f32 from vector<1x1x1xf32>
    %145 = vector.broadcast %144 : f32 to vector<1x1xf32>
    %cst_96 = arith.constant 2.000000e+02 : f32
    %146 = vector.broadcast %cst_96 : f32 to vector<1x1xf32>
    %147 = arith.divf %145, %146 : vector<1x1xf32>
    %148 = vector.broadcast %147 : vector<1x1xf32> to vector<5x40xf32>
    %149 = arith.subf %138, %148 : vector<5x40xf32>
    %150 = arith.mulf %149, %149 : vector<5x40xf32>
    %151 = vector.shape_cast %150 : vector<5x40xf32> to vector<1x5x40xf32>
    %cst_97 = arith.constant dense<0.000000e+00> : vector<1xf32>
    %152 = vector.multi_reduction <add>, %151, %cst_97 [1, 2] : vector<1x5x40xf32> to vector<1xf32>
    %153 = vector.shape_cast %152 : vector<1xf32> to vector<1x1x1xf32>
    %154 = vector.extract %153[0, 0, 0] : f32 from vector<1x1x1xf32>
    %155 = vector.broadcast %154 : f32 to vector<1x1xf32>
    %cst_98 = arith.constant 2.000000e+02 : f32
    %156 = vector.broadcast %cst_98 : f32 to vector<1x1xf32>
    %157 = arith.divf %155, %156 : vector<1x1xf32>
    %158 = vector.broadcast %147 : vector<1x1xf32> to vector<5x40xf32>
    %159 = arith.subf %138, %158 : vector<5x40xf32>
    %cst_99 = arith.constant 9.99999974E-6 : f32
    %160 = vector.broadcast %cst_99 : f32 to vector<1x1xf32>
    %161 = arith.addf %157, %160 : vector<1x1xf32>
    %162 = math.rsqrt %161 : vector<1x1xf32>
    %163 = vector.broadcast %162 : vector<1x1xf32> to vector<5x40xf32>
    %164 = arith.mulf %159, %163 : vector<5x40xf32>
    %165 = arith.mulf %164, %139 : vector<5x40xf32>
    %166 = arith.addf %165, %140 : vector<5x40xf32>
    %cst_100 = arith.constant 5.000000e-01 : f32
    %167 = vector.broadcast %cst_100 : f32 to vector<5x40xf32>
    %168 = arith.mulf %167, %166 : vector<5x40xf32>
    %cst_101 = arith.constant 0.707106769 : f32
    %169 = vector.broadcast %cst_101 : f32 to vector<5x40xf32>
    %170 = arith.mulf %166, %169 : vector<5x40xf32>
    %171 = math.absf %170 : vector<5x40xf32>
    %cst_102 = arith.constant 0.327591091 : f32
    %172 = vector.broadcast %cst_102 : f32 to vector<5x40xf32>
    %173 = arith.mulf %172, %171 : vector<5x40xf32>
    %cst_103 = arith.constant 1.000000e+00 : f32
    %174 = vector.broadcast %cst_103 : f32 to vector<5x40xf32>
    %175 = arith.addf %174, %173 : vector<5x40xf32>
    %cst_104 = arith.constant 1.000000e+00 : f32
    %176 = vector.broadcast %cst_104 : f32 to vector<5x40xf32>
    %177 = arith.divf %176, %175 : vector<5x40xf32>
    %cst_105 = arith.constant 1.06140542 : f32
    %178 = vector.broadcast %cst_105 : f32 to vector<5x40xf32>
    %179 = arith.mulf %178, %177 : vector<5x40xf32>
    %cst_106 = arith.constant -1.45315206 : f32
    %180 = vector.broadcast %cst_106 : f32 to vector<5x40xf32>
    %181 = arith.addf %179, %180 : vector<5x40xf32>
    %182 = arith.mulf %181, %177 : vector<5x40xf32>
    %cst_107 = arith.constant 1.42141378 : f32
    %183 = vector.broadcast %cst_107 : f32 to vector<5x40xf32>
    %184 = arith.addf %182, %183 : vector<5x40xf32>
    %185 = arith.mulf %184, %177 : vector<5x40xf32>
    %cst_108 = arith.constant -0.284496725 : f32
    %186 = vector.broadcast %cst_108 : f32 to vector<5x40xf32>
    %187 = arith.addf %185, %186 : vector<5x40xf32>
    %188 = arith.mulf %187, %177 : vector<5x40xf32>
    %cst_109 = arith.constant 0.254829586 : f32
    %189 = vector.broadcast %cst_109 : f32 to vector<5x40xf32>
    %190 = arith.addf %188, %189 : vector<5x40xf32>
    %191 = arith.mulf %190, %177 : vector<5x40xf32>
    %cst_110 = arith.constant 0.000000e+00 : f32
    %192 = vector.broadcast %cst_110 : f32 to vector<5x40xf32>
    %193 = arith.subf %192, %171 : vector<5x40xf32>
    %194 = arith.mulf %193, %171 : vector<5x40xf32>
    %195 = math.exp %194 : vector<5x40xf32>
    %196 = arith.mulf %191, %195 : vector<5x40xf32>
    %cst_111 = arith.constant 1.000000e+00 : f32
    %197 = vector.broadcast %cst_111 : f32 to vector<5x40xf32>
    %198 = arith.subf %197, %196 : vector<5x40xf32>
    %cst_112 = arith.constant 0.000000e+00 : f32
    %199 = vector.broadcast %cst_112 : f32 to vector<5x40xf32>
    %200 = arith.cmpf oge, %170, %199 : vector<5x40xf32>
    %cst_113 = arith.constant 0.000000e+00 : f32
    %201 = vector.broadcast %cst_113 : f32 to vector<5x40xf32>
    %202 = arith.subf %201, %198 : vector<5x40xf32>
    %203 = arith.select %200, %198, %202 : vector<5x40xi1>, vector<5x40xf32>
    %cst_114 = arith.constant 1.000000e+00 : f32
    %204 = vector.broadcast %cst_114 : f32 to vector<5x40xf32>
    %205 = arith.addf %204, %203 : vector<5x40xf32>
    %206 = arith.mulf %168, %205 : vector<5x40xf32>
    %c0_115 = arith.constant 0 : index
    %c0_116 = arith.constant 0 : index
    %207 = vector.load %arg14[%c0_115, %c0_116] : memref<1x32xf32, #tpu.memory_space<vmem>>, vector<1x32xf32>
    %208 = vector.extract_strided_slice %206 {offsets = [0, 0], sizes = [1, 40], strides = [1, 1]} : vector<5x40xf32> to vector<1x40xf32>
    %c0_117 = arith.constant 0 : index
    %c0_118 = arith.constant 0 : index
    %c0_119 = arith.constant 0 : index
    %209 = vector.load %arg13[%c0_117, %c0_118, %c0_119] : memref<5x40x32xf32, #tpu.memory_space<vmem>>, vector<1x40x32xf32>
    %210 = vector.shape_cast %209 : vector<1x40x32xf32> to vector<40x32xf32>
    %cst_120 = arith.constant dense<0.000000e+00> : vector<1x32xf32>
    %211 = tpu.matmul %208, %210, %cst_120 {dimension_numbers = #tpu.dot_dimension_numbers<[1], [0], [0], [1], [0, 0, 1, 1], [], []>, precision = #tpu.contract_precision<fp32>} : vector<1x40xf32>, vector<40x32xf32>, vector<1x32xf32> -> vector<1x32xf32>
    %212 = arith.addf %207, %211 : vector<1x32xf32>
    %213 = vector.extract_strided_slice %206 {offsets = [1, 0], sizes = [1, 40], strides = [1, 1]} : vector<5x40xf32> to vector<1x40xf32>
    %c1_121 = arith.constant 1 : index
    %c0_122 = arith.constant 0 : index
    %c0_123 = arith.constant 0 : index
    %214 = vector.load %arg13[%c1_121, %c0_122, %c0_123] : memref<5x40x32xf32, #tpu.memory_space<vmem>>, vector<1x40x32xf32>
    %215 = vector.shape_cast %214 : vector<1x40x32xf32> to vector<40x32xf32>
    %cst_124 = arith.constant dense<0.000000e+00> : vector<1x32xf32>
    %216 = tpu.matmul %213, %215, %cst_124 {dimension_numbers = #tpu.dot_dimension_numbers<[1], [0], [0], [1], [0, 0, 1, 1], [], []>, precision = #tpu.contract_precision<fp32>} : vector<1x40xf32>, vector<40x32xf32>, vector<1x32xf32> -> vector<1x32xf32>
    %217 = arith.addf %212, %216 : vector<1x32xf32>
    %218 = vector.extract_strided_slice %206 {offsets = [2, 0], sizes = [1, 40], strides = [1, 1]} : vector<5x40xf32> to vector<1x40xf32>
    %c2_125 = arith.constant 2 : index
    %c0_126 = arith.constant 0 : index
    %c0_127 = arith.constant 0 : index
    %219 = vector.load %arg13[%c2_125, %c0_126, %c0_127] : memref<5x40x32xf32, #tpu.memory_space<vmem>>, vector<1x40x32xf32>
    %220 = vector.shape_cast %219 : vector<1x40x32xf32> to vector<40x32xf32>
    %cst_128 = arith.constant dense<0.000000e+00> : vector<1x32xf32>
    %221 = tpu.matmul %218, %220, %cst_128 {dimension_numbers = #tpu.dot_dimension_numbers<[1], [0], [0], [1], [0, 0, 1, 1], [], []>, precision = #tpu.contract_precision<fp32>} : vector<1x40xf32>, vector<40x32xf32>, vector<1x32xf32> -> vector<1x32xf32>
    %222 = arith.addf %217, %221 : vector<1x32xf32>
    %223 = vector.extract_strided_slice %206 {offsets = [3, 0], sizes = [1, 40], strides = [1, 1]} : vector<5x40xf32> to vector<1x40xf32>
    %c3_129 = arith.constant 3 : index
    %c0_130 = arith.constant 0 : index
    %c0_131 = arith.constant 0 : index
    %224 = vector.load %arg13[%c3_129, %c0_130, %c0_131] : memref<5x40x32xf32, #tpu.memory_space<vmem>>, vector<1x40x32xf32>
    %225 = vector.shape_cast %224 : vector<1x40x32xf32> to vector<40x32xf32>
    %cst_132 = arith.constant dense<0.000000e+00> : vector<1x32xf32>
    %226 = tpu.matmul %223, %225, %cst_132 {dimension_numbers = #tpu.dot_dimension_numbers<[1], [0], [0], [1], [0, 0, 1, 1], [], []>, precision = #tpu.contract_precision<fp32>} : vector<1x40xf32>, vector<40x32xf32>, vector<1x32xf32> -> vector<1x32xf32>
    %227 = arith.addf %222, %226 : vector<1x32xf32>
    %228 = vector.extract_strided_slice %206 {offsets = [4, 0], sizes = [1, 40], strides = [1, 1]} : vector<5x40xf32> to vector<1x40xf32>
    %c4 = arith.constant 4 : index
    %c0_133 = arith.constant 0 : index
    %c0_134 = arith.constant 0 : index
    %229 = vector.load %arg13[%c4, %c0_133, %c0_134] : memref<5x40x32xf32, #tpu.memory_space<vmem>>, vector<1x40x32xf32>
    %230 = vector.shape_cast %229 : vector<1x40x32xf32> to vector<40x32xf32>
    %cst_135 = arith.constant dense<0.000000e+00> : vector<1x32xf32>
    %231 = tpu.matmul %228, %230, %cst_135 {dimension_numbers = #tpu.dot_dimension_numbers<[1], [0], [0], [1], [0, 0, 1, 1], [], []>, precision = #tpu.contract_precision<fp32>} : vector<1x40xf32>, vector<40x32xf32>, vector<1x32xf32> -> vector<1x32xf32>
    %232 = arith.addf %227, %231 : vector<1x32xf32>
    %c0_136 = arith.constant 0 : index
    %c0_137 = arith.constant 0 : index
    %233 = vector.load %arg15[%c0_136, %c0_137] : memref<1x32xf32, #tpu.memory_space<vmem>>, vector<1x32xf32>
    %c0_138 = arith.constant 0 : index
    %c0_139 = arith.constant 0 : index
    %234 = vector.load %arg16[%c0_138, %c0_139] : memref<1x32xf32, #tpu.memory_space<vmem>>, vector<1x32xf32>
    %235 = vector.shape_cast %232 : vector<1x32xf32> to vector<1x1x32xf32>
    %cst_140 = arith.constant dense<0.000000e+00> : vector<1xf32>
    %236 = vector.multi_reduction <add>, %235, %cst_140 [1, 2] : vector<1x1x32xf32> to vector<1xf32>
    %237 = vector.shape_cast %236 : vector<1xf32> to vector<1x1x1xf32>
    %238 = vector.extract %237[0, 0, 0] : f32 from vector<1x1x1xf32>
    %239 = vector.broadcast %238 : f32 to vector<1x1xf32>
    %cst_141 = arith.constant 3.200000e+01 : f32
    %240 = vector.broadcast %cst_141 : f32 to vector<1x1xf32>
    %241 = arith.divf %239, %240 : vector<1x1xf32>
    %242 = vector.broadcast %241 : vector<1x1xf32> to vector<1x32xf32>
    %243 = arith.subf %232, %242 : vector<1x32xf32>
    %244 = arith.mulf %243, %243 : vector<1x32xf32>
    %245 = vector.shape_cast %244 : vector<1x32xf32> to vector<1x1x32xf32>
    %cst_142 = arith.constant dense<0.000000e+00> : vector<1xf32>
    %246 = vector.multi_reduction <add>, %245, %cst_142 [1, 2] : vector<1x1x32xf32> to vector<1xf32>
    %247 = vector.shape_cast %246 : vector<1xf32> to vector<1x1x1xf32>
    %248 = vector.extract %247[0, 0, 0] : f32 from vector<1x1x1xf32>
    %249 = vector.broadcast %248 : f32 to vector<1x1xf32>
    %cst_143 = arith.constant 3.200000e+01 : f32
    %250 = vector.broadcast %cst_143 : f32 to vector<1x1xf32>
    %251 = arith.divf %249, %250 : vector<1x1xf32>
    %252 = vector.broadcast %241 : vector<1x1xf32> to vector<1x32xf32>
    %253 = arith.subf %232, %252 : vector<1x32xf32>
    %cst_144 = arith.constant 9.99999974E-6 : f32
    %254 = vector.broadcast %cst_144 : f32 to vector<1x1xf32>
    %255 = arith.addf %251, %254 : vector<1x1xf32>
    %256 = math.rsqrt %255 : vector<1x1xf32>
    %257 = vector.broadcast %256 : vector<1x1xf32> to vector<1x32xf32>
    %258 = arith.mulf %253, %257 : vector<1x32xf32>
    %259 = arith.mulf %258, %233 : vector<1x32xf32>
    %260 = arith.addf %259, %234 : vector<1x32xf32>
    %cst_145 = arith.constant 5.000000e-01 : f32
    %261 = vector.broadcast %cst_145 : f32 to vector<1x32xf32>
    %262 = arith.mulf %261, %260 : vector<1x32xf32>
    %cst_146 = arith.constant 0.707106769 : f32
    %263 = vector.broadcast %cst_146 : f32 to vector<1x32xf32>
    %264 = arith.mulf %260, %263 : vector<1x32xf32>
    %265 = math.absf %264 : vector<1x32xf32>
    %cst_147 = arith.constant 0.327591091 : f32
    %266 = vector.broadcast %cst_147 : f32 to vector<1x32xf32>
    %267 = arith.mulf %266, %265 : vector<1x32xf32>
    %cst_148 = arith.constant 1.000000e+00 : f32
    %268 = vector.broadcast %cst_148 : f32 to vector<1x32xf32>
    %269 = arith.addf %268, %267 : vector<1x32xf32>
    %cst_149 = arith.constant 1.000000e+00 : f32
    %270 = vector.broadcast %cst_149 : f32 to vector<1x32xf32>
    %271 = arith.divf %270, %269 : vector<1x32xf32>
    %cst_150 = arith.constant 1.06140542 : f32
    %272 = vector.broadcast %cst_150 : f32 to vector<1x32xf32>
    %273 = arith.mulf %272, %271 : vector<1x32xf32>
    %cst_151 = arith.constant -1.45315206 : f32
    %274 = vector.broadcast %cst_151 : f32 to vector<1x32xf32>
    %275 = arith.addf %273, %274 : vector<1x32xf32>
    %276 = arith.mulf %275, %271 : vector<1x32xf32>
    %cst_152 = arith.constant 1.42141378 : f32
    %277 = vector.broadcast %cst_152 : f32 to vector<1x32xf32>
    %278 = arith.addf %276, %277 : vector<1x32xf32>
    %279 = arith.mulf %278, %271 : vector<1x32xf32>
    %cst_153 = arith.constant -0.284496725 : f32
    %280 = vector.broadcast %cst_153 : f32 to vector<1x32xf32>
    %281 = arith.addf %279, %280 : vector<1x32xf32>
    %282 = arith.mulf %281, %271 : vector<1x32xf32>
    %cst_154 = arith.constant 0.254829586 : f32
    %283 = vector.broadcast %cst_154 : f32 to vector<1x32xf32>
    %284 = arith.addf %282, %283 : vector<1x32xf32>
    %285 = arith.mulf %284, %271 : vector<1x32xf32>
    %cst_155 = arith.constant 0.000000e+00 : f32
    %286 = vector.broadcast %cst_155 : f32 to vector<1x32xf32>
    %287 = arith.subf %286, %265 : vector<1x32xf32>
    %288 = arith.mulf %287, %265 : vector<1x32xf32>
    %289 = math.exp %288 : vector<1x32xf32>
    %290 = arith.mulf %285, %289 : vector<1x32xf32>
    %cst_156 = arith.constant 1.000000e+00 : f32
    %291 = vector.broadcast %cst_156 : f32 to vector<1x32xf32>
    %292 = arith.subf %291, %290 : vector<1x32xf32>
    %cst_157 = arith.constant 0.000000e+00 : f32
    %293 = vector.broadcast %cst_157 : f32 to vector<1x32xf32>
    %294 = arith.cmpf oge, %264, %293 : vector<1x32xf32>
    %cst_158 = arith.constant 0.000000e+00 : f32
    %295 = vector.broadcast %cst_158 : f32 to vector<1x32xf32>
    %296 = arith.subf %295, %292 : vector<1x32xf32>
    %297 = arith.select %294, %292, %296 : vector<1x32xi1>, vector<1x32xf32>
    %cst_159 = arith.constant 1.000000e+00 : f32
    %298 = vector.broadcast %cst_159 : f32 to vector<1x32xf32>
    %299 = arith.addf %298, %297 : vector<1x32xf32>
    %300 = arith.mulf %262, %299 : vector<1x32xf32>
    %c0_160 = arith.constant 0 : index
    %c0_161 = arith.constant 0 : index
    %c0_162 = arith.constant 0 : index
    %301 = vector.load %arg17[%c0_160, %c0_161, %c0_162] : memref<1x1x32xf32, #tpu.memory_space<vmem>>, vector<1x1x32xf32>
    %302 = vector.shape_cast %301 : vector<1x1x32xf32> to vector<1x32xf32>
    %303 = vector.shape_cast %300 : vector<1x32xf32> to vector<1x1x32xf32>
    tpu.vector_store %arg17[%c0_160, %c0_161, %c0_162], %303 {strides = array<i32>} : memref<1x1x32xf32, #tpu.memory_space<vmem>>, vector<1x1x32xf32>,
    return
  }
  func.func @transform_0(%arg0: i32) -> (i32, i32, i32, i32) {
    %c0_i32 = arith.constant 0 : i32
    %c0_i32_0 = arith.constant 0 : i32
    %c0_i32_1 = arith.constant 0 : i32
    %c0_i32_2 = arith.constant 0 : i32
    return %arg0, %c0_i32, %c0_i32_0, %c0_i32_1 : i32, i32, i32, i32
  }
  func.func @transform_1(%arg0: i32) -> (i32, i32, i32) {
    %c0_i32 = arith.constant 0 : i32
    %c0_i32_0 = arith.constant 0 : i32
    %c0_i32_1 = arith.constant 0 : i32
    %c0_i32_2 = arith.constant 0 : i32
    return %c0_i32, %c0_i32_0, %c0_i32_1 : i32, i32, i32
  }
  func.func @transform_2(%arg0: i32) -> (i32, i32, i32) {
    %c0_i32 = arith.constant 0 : i32
    %c0_i32_0 = arith.constant 0 : i32
    %c0_i32_1 = arith.constant 0 : i32
    %c0_i32_2 = arith.constant 0 : i32
    return %c0_i32, %c0_i32_0, %c0_i32_1 : i32, i32, i32
  }
  func.func @transform_3(%arg0: i32) -> (i32, i32, i32) {
    %c0_i32 = arith.constant 0 : i32
    %c0_i32_0 = arith.constant 0 : i32
    %c0_i32_1 = arith.constant 0 : i32
    %c0_i32_2 = arith.constant 0 : i32
    return %c0_i32, %c0_i32_0, %c0_i32_1 : i32, i32, i32
  }
  func.func @transform_4(%arg0: i32) -> (i32, i32) {
    %c0_i32 = arith.constant 0 : i32
    %c0_i32_0 = arith.constant 0 : i32
    %c0_i32_1 = arith.constant 0 : i32
    return %c0_i32, %c0_i32_0 : i32, i32
  }
  func.func @transform_5(%arg0: i32) -> (i32, i32) {
    %c0_i32 = arith.constant 0 : i32
    %c0_i32_0 = arith.constant 0 : i32
    %c0_i32_1 = arith.constant 0 : i32
    return %c0_i32, %c0_i32_0 : i32, i32
  }
  func.func @transform_6(%arg0: i32) -> (i32, i32) {
    %c0_i32 = arith.constant 0 : i32
    %c0_i32_0 = arith.constant 0 : i32
    %c0_i32_1 = arith.constant 0 : i32
    return %c0_i32, %c0_i32_0 : i32, i32
  }
  func.func @transform_7(%arg0: i32) -> (i32, i32, i32) {
    %c0_i32 = arith.constant 0 : i32
    %c0_i32_0 = arith.constant 0 : i32
    %c0_i32_1 = arith.constant 0 : i32
    %c0_i32_2 = arith.constant 0 : i32
    return %c0_i32, %c0_i32_0, %c0_i32_1 : i32, i32, i32
  }
  func.func @transform_8(%arg0: i32) -> (i32, i32, i32) {
    %c0_i32 = arith.constant 0 : i32
    %c0_i32_0 = arith.constant 0 : i32
    %c0_i32_1 = arith.constant 0 : i32
    %c0_i32_2 = arith.constant 0 : i32
    return %c0_i32, %c0_i32_0, %c0_i32_1 : i32, i32, i32
  }
  func.func @transform_9(%arg0: i32) -> (i32, i32) {
    %c0_i32 = arith.constant 0 : i32
    %c0_i32_0 = arith.constant 0 : i32
    %c0_i32_1 = arith.constant 0 : i32
    return %c0_i32, %c0_i32_0 : i32, i32
  }
  func.func @transform_10(%arg0: i32) -> (i32, i32) {
    %c0_i32 = arith.constant 0 : i32
    %c0_i32_0 = arith.constant 0 : i32
    %c0_i32_1 = arith.constant 0 : i32
    return %c0_i32, %c0_i32_0 : i32, i32
  }
  func.func @transform_11(%arg0: i32) -> (i32, i32) {
    %c0_i32 = arith.constant 0 : i32
    %c0_i32_0 = arith.constant 0 : i32
    %c0_i32_1 = arith.constant 0 : i32
    return %c0_i32, %c0_i32_0 : i32, i32
  }
  func.func @transform_12(%arg0: i32) -> (i32, i32, i32) {
    %c0_i32 = arith.constant 0 : i32
    %c0_i32_0 = arith.constant 0 : i32
    %c0_i32_1 = arith.constant 0 : i32
    %c0_i32_2 = arith.constant 0 : i32
    return %c0_i32, %c0_i32_0, %c0_i32_1 : i32, i32, i32
  }
  func.func @transform_13(%arg0: i32) -> (i32, i32) {
    %c0_i32 = arith.constant 0 : i32
    %c0_i32_0 = arith.constant 0 : i32
    %c0_i32_1 = arith.constant 0 : i32
    return %c0_i32, %c0_i32_0 : i32, i32
  }
  func.func @transform_14(%arg0: i32) -> (i32, i32) {
    %c0_i32 = arith.constant 0 : i32
    %c0_i32_0 = arith.constant 0 : i32
    %c0_i32_1 = arith.constant 0 : i32
    return %c0_i32, %c0_i32_0 : i32, i32
  }
  func.func @transform_15(%arg0: i32) -> (i32, i32) {
    %c0_i32 = arith.constant 0 : i32
    %c0_i32_0 = arith.constant 0 : i32
    %c0_i32_1 = arith.constant 0 : i32
    return %c0_i32, %c0_i32_0 : i32, i32
  }
  func.func @transform_16(%arg0: i32) -> (i32, i32, i32) {
    %c0_i32 = arith.constant 0 : i32
    %c0_i32_0 = arith.constant 0 : i32
    %c0_i32_1 = arith.constant 0 : i32
    return %arg0, %c0_i32, %c0_i32_0 : i32, i32, i32
  }
}

</mosaic_0001>

<bundles_post_ra>
// kernel: conv_encoder_forward.1
= control target key start
LH: loop header
LB: loop body
LE: loop exit
PB: predicated region body
PF: predicated region fallthrough
CT: control target
= control target key end

     0   :  { %s16252_s0 = inlined_call_operand.vmem [shape: f32[2,4,16,16], index: 0, kind: input, shape index: {}]   ;;  %s16253_s1 = inlined_call_operand.vmem [shape: f32[4,16,64], index: 1, kind: input, shape index: {}]   ;;  %s16254_s2 = inlined_call_operand.vmem [shape: f32[3,7,16], index: 2, kind: input, shape index: {}]   ;;  %s16255_s3 = inlined_call_operand.vmem [shape: f32[3,64,56], index: 3, kind: input, shape index: {}]   ;;  %s16256_s4 = inlined_call_operand.vmem [shape: f32[1,56], index: 4, kind: input, shape index: {}]   ;;  %s16257_s5 = inlined_call_operand.vmem [shape: f32[7,56], index: 5, kind: input, shape index: {}]   ;;  %s16258_s6 = inlined_call_operand.vmem [shape: f32[7,56], index: 6, kind: input, shape index: {}]   ;;  %s16259_s7 = inlined_call_operand.vmem [shape: f32[3,5,7], index: 7, kind: input, shape index: {}]   ;;  %s16260_s8 = inlined_call_operand.vmem [shape: f32[3,56,40], index: 8, kind: input, shape index: {}]   ;;  %s16261_s9 = inlined_call_operand.vmem [shape: f32[1,40], index: 9, kind: input, shape index: {}]   ;;  %s16262_s10 = inlined_call_operand.vmem [shape: f32[5,40], index: 10, kind: input, shape index: {}]   ;;  %s16263_s11 = inlined_call_operand.vmem [shape: f32[5,40], index: 11, kind: input, shape index: {}]   ;;  %s16264_s12 = inlined_call_operand.vmem [shape: f32[5,40,32], index: 12, kind: input, shape index: {}]   ;;  %s16265_s13 = inlined_call_operand.vmem [shape: f32[1,32], index: 13, kind: input, shape index: {}]   ;;  %s16266_s14 = inlined_call_operand.vmem [shape: f32[1,32], index: 14, kind: input, shape index: {}]   ;;  %s16267_s15 = inlined_call_operand.vmem [shape: f32[1,32], index: 15, kind: input, shape index: {}]   ;;  %s16268_s16 = inlined_call_operand.hbm [shape: f32[2,1,32], index: 16, kind: output, shape index: {}]  }
   0x1   :  { %16270 = sst [smem:[#allocation7_spill]] %s16252_s0 }
   0x2   :  { %16271 = sst [smem:[#allocation8_spill]] %s16253_s1 }
   0x3   :  { %16272 = sst [smem:[#allocation9_spill]] %s16254_s2 }
   0x4   :  { %16273 = sst [smem:[#allocation10_spill]] %s16255_s3 }
   0x5   :  { %21 = vsyncpa [#allocation3], 0 }
   0x6   :  { %23 = vsyncpa [#allocation3 + $0x1], 0  ;;  %s14653_s21 = smov 0   ;;  %s14655_s22 = smov 0  }
   0x7   :  { %s14657_s23 = smov 0   ;;  %s14659_s24 = smov 0  }
   0x8 LB: > { %16274 = sst [smem:[#allocation5_spill]] %s14558_s23  ;;  %s14674_s25 = sadd.s32 4294967295, %s14562_s24   ;;  %s14562_s24 = sphi %s14659_s24, %s16286_s24   ;;  %s14558_s23 = sphi %s14657_s23, %s16283_s23   ;;  %s14554_s22 = sphi %s14655_s22, %s16285_s22   ;;  %s14550_s21 = sphi %s14653_s21, %s16284_s21  }
   0x9   : > { %s11389_s26 = sadd.s32 4294967294, %s14562_s24   ;;  %s14678_s27 = sadd.s32 1, %s14562_s24  }
   0xa   : > { %s377_s28 = sadd.s32 1, %s14558_s23  ;;  %s374_s29 = ssub.s32 %s14562_s24, %s14678_s27 }
   0xb   : > { %p387_p0 = scmp.ne.s32.totalorder %s14558_s23, %s14554_s22  ;;  %p375_p1 = scmp.eq.s32.totalorder %s374_s29, 0 }
   0xc   : > { %p388_p2 = scmp.eq.s32.totalorder %s14674_s25, 1  ;;  %p393_p3 = scmp.ne.s32.totalorder %s14554_s22, %s14550_s21 }
   0xd   : > { %p394_p4 = scmp.eq.s32.totalorder %s11389_s26, 1  ;;  %p11392_p7 = scmp.ge.s32.totalorder %s14562_s24, 1 }
   0xe   : > { %s14689_s30 = scalar_select %p375_p1, %s14558_s23, %s377_s28  }
   0xf   : > { %p14691_p5 = por %p388_p2, %p387_p0  ;;  %p14695_p6 = por %p394_p4, %p393_p3 }
  0x10   : > { %16275 = sst [smem:[#allocation6_spill]] %s14689_s30  ;;  %p465_p8 = scmp.lt.s32.totalorder %s14562_s24, 3 }
  0x12   : > { %p466_p9 = pnand %p11392_p7, %p465_p8 }
  0x13   : > { %s16278_s1 = sld [smem:[#allocation8_spill]] (!%p466_p9)  ;;  %p514_p10 = scmp.lt.s32.totalorder (!%p466_p9), %s14674_s25, 1  ;;  %vm532_vm0 = vcmask (!%p466_p9), 130048   ;;  %vm14565_vm1 = vmmov (!%p466_p9), 0   ;;  %vm3519_vm2 = vcmask (!%p466_p9), 523264   ;;  %vm5624_vm3 = vcmask (!%p466_p9), 456704  }
  0x14   : > { %469 = sbr.rel (%p466_p9) target bundleno = 4332 (0x10ec), region = 84  ;;  %s16279_s30 = sld [smem:[#allocation7_spill]] (!%p466_p9)  ;;  %vm5685_vm4 = vcmask (!%p466_p9), 56320   ;;  %vm5689_vm6 = vcmask (!%p466_p9), 1046528   ;;  %vm6605_vm7 = vcmask (!%p466_p9), 457728   ;;  %vm8657_vm8 = vcmask (!%p466_p9), 323584  }
  0x15   : > { %s16280_s2 = sld [smem:[#allocation9_spill]] (!%p466_p9)  ;;  %s16281_s3 = sld [smem:[#allocation10_spill]] (!%p466_p9)  ;;  %vm8723_vm10 = vcmask (!%p466_p9), 326656   ;;  %vm11260_vm11 = vcmask (!%p466_p9), 253952  }
  0x19   : > { %v11395_v0 = vld [vmem:[%s16278_s1 + $0x10] sm:$0xff] (!%p466_p9)  ;;  %v11396_v1 = vld [vmem:[%s16278_s1 + $0x18] sm:$0xff] (!%p466_p9)  ;;  %v527_v30 = vld [vmem:[%s16278_s1] sm:$0xff] (!%p466_p9) }
  0x1a   : > { %v540_v2 = vand.u32 (!%p466_p9), 4294901760, %v11395_v0  ;;  %v543_v3 = vand.u32 (!%p466_p9), 4294901760, %v11396_v1  ;;  %v528_v31 = vld [vmem:[%s16278_s1 + $0x8] sm:$0xff] (!%p466_p9)  ;;  %v1048_v33 = vand.u32 (!%p466_p9), 4294901760, %v527_v30  ;;  %v11397_v60 = vld [vmem:[%s16278_s1 + $0x20] sm:$0xff] (!%p466_p9) }
  0x1b   : > { %s515_s28 = scalar_select %p514_p10, %s14674_s25, 1  ;;  %v1051_v34 = vand.u32 4294901760, %v528_v31  ;;  %v11398_v61 = vld [vmem:[%s16278_s1 + $0x28] sm:$0xff]  ;;  %v1559_v63 = vand.u32 4294901760, %v11397_v60 }
  0x1c   : > { %v14709_v4 = vpack.c.bf16 %v543_v3, %v540_v2  ;;  %v628_v5 = vsub.f32 %v11395_v0, %v540_v2  ;;  %v635_v6 = vsub.f32 %v11396_v1, %v543_v3  ;;  %v1136_v38 = vsub.f32 %v527_v30, %v1048_v33 }
  0x1d   : > { %s11460_s29 = sshll.u32 %s515_s28, 6  ;;  %v1143_v39 = vsub.f32 %v528_v31, %v1051_v34  ;;  %v13579_v46 = vpack.c.bf16 %v1051_v34, %v1048_v33  ;;  %v1562_v0 = vand.u32 4294901760, %v11398_v61 }
  0x1e   : > { %13556 = vmatprep.subr.bf16.mxu0 %v14709_v4  ;;  %s14715_s23 = scalar_lea.vmem %s16279_s30, %s11460_s29  ;;  %v629_v7 = vand.u32 4294901760, %v628_v5  ;;  %v636_v8 = vand.u32 4294901760, %v635_v6  ;;  %v13563_v28 = vpack.c.bf16 %v635_v6, %v628_v5  ;;  %v1137_v42 = vand.u32 4294901760, %v1136_v38 }
  0x1f   : > { %13558 = vmatpush3.bf16.msra.mxu0 %v14709_v4  ;;  %v521_v9 = vld [vmem:[%s14715_s23 + $0x10] sm:$0xff]  ;;  %v522_v10 = vld [vmem:[%s14715_s23 + $0x18] sm:$0xff]  ;;  %v519_v32 = vld [vmem:[%s14715_s23] sm:$0xff]  ;;  %v1144_v43 = vand.u32 4294901760, %v1143_v39  ;;  %v13587_v58 = vpack.c.bf16 %v1143_v39, %v1136_v38 }
  0x20   : > { %v534_v11 = vsel %vm532_vm0, %v521_v9, 0  ;;  %v537_v12 = vsel %vm532_vm0, %v522_v10, 0  ;;  %v630_v13 = vsub.f32 %v628_v5, %v629_v7  ;;  %v637_v14 = vsub.f32 %v635_v6, %v636_v8  ;;  %v520_v37 = vld [vmem:[%s14715_s23 + $0x8] sm:$0xff]  ;;  %v523_v62 = vld [vmem:[%s14715_s23 + $0x20] sm:$0xff]  ;;  %v526_v33 = vld [vmem:[%s14715_s23 + $0x38] sm:$0xff] }
  0x21   : > { %v606_v15 = vand.u32 4294901760, %v534_v11  ;;  %v616_v16 = vand.u32 4294901760, %v537_v12  ;;  %v13571_v29 = vpack.c.bf16 %v636_v8, %v629_v7  ;;  %v1042_v35 = vsel %vm532_vm0, %v519_v32, 0  ;;  %v524_v3 = vld [vmem:[%s14715_s23 + $0x28] sm:$0xff] }
  0x22   : > { %v631_v17 = vand.u32 4294901760, %v630_v13  ;;  %v638_v18 = vand.u32 4294901760, %v637_v14  ;;  %v14732_v36 = vand.u32 4294901760, %v1042_v35  ;;  %v1045_v41 = vsel %vm532_vm0, %v520_v37, 0 }
  0x23   : > { %v607_v19 = vsub.f32 %v534_v11, %v606_v15  ;;  %v617_v20 = vsub.f32 %v537_v12, %v616_v16  ;;  %v14738_v44 = vand.u32 4294901760, %v1045_v41  ;;  %v1138_v47 = vsub.f32 %v1136_v38, %v1137_v42 }
  0x24   : > { %v13559_v21 = vpack.c.bf16 %v638_v18, %v631_v17  ;;  %v1115_v40 = vsub.f32 %v1042_v35, %v14732_v36  ;;  %v1145_v48 = vsub.f32 %v1143_v39, %v1144_v43  ;;  %v13595_v59 = vpack.c.bf16 %v1144_v43, %v1137_v42 }
  0x25   : > { %v608_v22 = vand.u32 4294901760, %v607_v19  ;;  %v618_v23 = vand.u32 4294901760, %v617_v20  ;;  %v1125_v49 = vsub.f32 %v1045_v41, %v14738_v44  ;;  %v1139_v51 = vand.u32 4294901760, %v1138_v47 }
  0x26   : > { %13560 = vmatprep.subr.bf16.mxu0 %v13559_v21  ;;  %v1116_v45 = vand.u32 4294901760, %v1115_v40  ;;  %v1146_v52 = vand.u32 4294901760, %v1145_v48  ;;  %v1553_v1 = vsel %vm532_vm0, %v523_v62, 0  ;;  %v1654_v5 = vsub.f32 %v11398_v61, %v1562_v0 }
  0x27   : > { %v609_v24 = vsub.f32 %v607_v19, %v608_v22  ;;  %v619_v25 = vsub.f32 %v617_v20, %v618_v23  ;;  %v1126_v53 = vand.u32 4294901760, %v1125_v49  ;;  %v14752_v2 = vand.u32 4294901760, %v1553_v1 }
  0x28   : > { %v1117_v50 = vsub.f32 %v1115_v40, %v1116_v45  ;;  %v13583_v55 = vpack.c.bf16 %v1146_v52, %v1139_v51  ;;  %v1556_v7 = vsel %vm532_vm0, %v524_v3, 0  ;;  %v1655_v9 = vand.u32 4294901760, %v1654_v5 }
  0x29   : > { %v610_v26 = vand.u32 4294901760, %v609_v24  ;;  %v620_v27 = vand.u32 4294901760, %v619_v25  ;;  %v1127_v56 = vsub.f32 %v1125_v49, %v1126_v53  ;;  %v1626_v6 = vsub.f32 %v1553_v1, %v14752_v2 }
  0x2a   : > { %v1118_v54 = vand.u32 4294901760, %v1117_v50  ;;  %v14758_v10 = vand.u32 4294901760, %v1556_v7  ;;  %v13603_v12 = vpack.c.bf16 %v1562_v0, %v1559_v63  ;;  %v1656_v14 = vsub.f32 %v1654_v5, %v1655_v9 }
  0x2b   : > { %12137 = vmatprep.mubr.f32.mxu0 %v610_v26  ;;  %v1128_v57 = vand.u32 4294901760, %v1127_v56  ;;  %v1627_v11 = vand.u32 4294901760, %v1626_v6  ;;  %v11399_v26 = vld [vmem:[%s16278_s1 + $0x30] sm:$0xff]  ;;  %v2069_v37 = vsel %vm532_vm0, %v526_v33, 0  ;;  %v14564_v56 = vmov 0.0|0.0  }
  0x2c   : > { %12138 = vmatmul.mubr.f32.vlgmr.msra.gmra.mrb[0].mxu0 %v620_v27  ;;  %v1657_v18 = vand.u32 4294901760, %v1656_v14  ;;  %v11400_v27 = vld [vmem:[%s16278_s1 + $0x38] sm:$0xff]  ;;  %13651 = vmatprep.subr.bf16.mxu1 %v14564_v56 }
  0x2d   : > { %13562 = vmatpush3.bf16.msra.mxu0 %v13559_v21  ;;  %12144 = vmatprep.mubr.f32.mxu0 %v606_v15  ;;  %v2075_v30 = vand.u32 4294901760, %v11400_v27 }
  0x2e   : > { %13564 = vmatprep.subr.bf16.mxu0 %v13563_v28 }
  0x2f   : > { %v2167_v35 = vsub.f32 %v11400_v27, %v2075_v30 }
  0x31   : > { %v2168_v39 = vand.u32 4294901760, %v2167_v35 }
  0x34   : > { %12145 = vmatmul.mubr.f32.vlgmr.msra.gmra.mrb[0].mxu0 %v616_v16 }
  0x35   : > { %13566 = vmatpush3.bf16.msra.mxu0 %v13563_v28  ;;  %12151 = vmatprep.mubr.f32.mxu0 %v607_v19  ;;  %v525_v28 = vld [vmem:[%s14715_s23 + $0x30] sm:$0xff] }
  0x36   : > { %13568 = vmatprep.subr.bf16.mxu0 %v14709_v4  ;;  %v2066_v31 = vsel %vm532_vm0, %v525_v28, 0 }
  0x37   : > { %v2138_v32 = vand.u32 4294901760, %v2066_v31 }
  0x3c   : > { %12152 = vmatmul.mubr.f32.vlgmr.msra.gmra.mrb[0].mxu0 %v617_v20 }
  0x3d   : > { %13570 = vmatpush3.bf16.msra.mxu0 %v14709_v4  ;;  %12158 = vmatprep.mubr.f32.mxu0 %v608_v22 }
  0x3e   : > { %13572 = vmatprep.subr.bf16.mxu0 %v13571_v29 }
  0x44   : > { %12159 = vmatmul.mubr.f32.vlgmr.msra.gmra.mrb[0].mxu0 %v618_v23 }
  0x45   : > { %13574 = vmatpush3.bf16.msra.mxu0 %v13571_v29  ;;  %12165 = vmatprep.mubr.f32.mxu0 %v606_v15  ;;  %v2072_v29 = vand.u32 4294901760, %v11399_v26 }
  0x46   : > { %13576 = vmatprep.subr.bf16.mxu0 %v14709_v4 }
  0x47   : > { %v2160_v34 = vsub.f32 %v11399_v26, %v2072_v29  ;;  %v13627_v42 = vpack.c.bf16 %v2075_v30, %v2072_v29 }
  0x49   : > { %v2161_v38 = vand.u32 4294901760, %v2160_v34 }
  0x4b   : > { %v2162_v43 = vsub.f32 %v2160_v34, %v2161_v38 }
  0x4c   : > { %12166 = vmatmul.mubr.f32.vlgmr.msra.gmra.mrb[0].mxu0 %v616_v16 }
  0x4d   : > { %13578 = vmatpush3.bf16.msra.mxu0 %v14709_v4  ;;  %12172 = vmatprep.mubr.f32.mxu0 %v606_v15  ;;  %v1647_v4 = vsub.f32 %v11397_v60, %v1559_v63  ;;  %v1636_v15 = vsub.f32 %v1556_v7, %v14758_v10  ;;  %v2163_v47 = vand.u32 4294901760, %v2162_v43 }
  0x4e   : > { %13580 = vmatprep.subr.bf16.mxu0 %v13579_v46 }
  0x4f   : > { %v1648_v8 = vand.u32 4294901760, %v1647_v4  ;;  %v1637_v19 = vand.u32 4294901760, %v1636_v15  ;;  %v13611_v24 = vpack.c.bf16 %v1654_v5, %v1647_v4 }
  0x51   : > { %v1649_v13 = vsub.f32 %v1647_v4, %v1648_v8  ;;  %v1638_v22 = vsub.f32 %v1636_v15, %v1637_v19  ;;  %v13619_v25 = vpack.c.bf16 %v1655_v9, %v1648_v8 }
  0x53   : > { %v1650_v17 = vand.u32 4294901760, %v1649_v13  ;;  %v1639_v23 = vand.u32 4294901760, %v1638_v22 }
  0x54   : > { %12173 = vmatmul.mubr.f32.vlgmr.msra.gmra.mrb[0].mxu0 %v616_v16  ;;  %v1628_v16 = vsub.f32 %v1626_v6, %v1627_v11 }
  0x55   : > { %13582 = vmatpush3.bf16.msra.mxu0 %v13579_v46  ;;  %12179 = vmatprep.mubr.f32.mxu0 %v1118_v54  ;;  %v13607_v21 = vpack.c.bf16 %v1657_v18, %v1650_v17  ;;  %v13635_v54 = vpack.c.bf16 %v2167_v35, %v2160_v34  ;;  %v11401_v17 = vld [vmem:[%s16280_s2 + $0x8] sm:$0x7f] }
  0x56   : > { %13584 = vmatprep.subr.bf16.mxu0 %v13583_v55  ;;  %v1629_v20 = vand.u32 4294901760, %v1628_v16  ;;  %v3049_v18 = vsel %vm532_vm0, %v11401_v17, 0 }
  0x5c   : > { %12180 = vmatmul.mubr.f32.vlgmr.msra.gmra.mrb[0].mxu0 %v1128_v57  ;;  %v14566_v57 = vmov 0.0  }
  0x5d   : > { %13586 = vmatpush3.bf16.msra.mxu0 %v13583_v55  ;;  %12186 = vmatprep.mubr.f32.mxu0 %v14732_v36  ;;  %v13643_v55 = vpack.c.bf16 %v2168_v39, %v2161_v38 }
  0x5e   : > { %13588 = vmatprep.subr.bf16.mxu0 %v13587_v58  ;;  %12305 = vmatprep.mubr.msk.f32.mxu1 %vm14565_vm1, %v14566_v57 }
  0x64   : > { %12187 = vmatmul.mubr.f32.vlgmr.msra.gmra.mrb[0].mxu0 %v14738_v44 }
  0x65   : > { %13590 = vmatpush3.bf16.msra.mxu0 %v13587_v58  ;;  %12193 = vmatprep.mubr.f32.mxu0 %v1115_v40  ;;  %v2148_v40 = vand.u32 4294901760, %v2069_v37  ;;  %v2575_v58 = vld [vmem:[%s16280_s2] sm:$0x7f] }
  0x66   : > { %13592 = vmatprep.subr.bf16.mxu0 %v13579_v46 }
  0x6c   : > { %12194 = vmatmul.mubr.f32.vlgmr.msra.gmra.mrb[0].mxu0 %v1125_v49 }
  0x6d   : > { %13594 = vmatpush3.bf16.msra.mxu0 %v13579_v46  ;;  %12200 = vmatprep.mubr.f32.mxu0 %v1116_v45  ;;  %v2149_v45 = vsub.f32 %v2069_v37, %v2148_v40  ;;  %v11407_v37 = vld [vmem:[%s16281_s3 + $0x68] sm:$0xff] }
  0x6e   : > { %13596 = vmatprep.subr.bf16.mxu0 %v13595_v59 }
  0x6f   : > { %v2150_v49 = vand.u32 4294901760, %v2149_v45 }
  0x71   : > { %v2151_v52 = vsub.f32 %v2149_v45, %v2150_v49 }
  0x74   : > { %12201 = vmatmul.mubr.f32.vlgmr.msra.gmra.mrb[0].mxu0 %v1126_v53  ;;  %v2152_v53 = vand.u32 4294901760, %v2151_v52 }
  0x75   : > { %13598 = vmatpush3.bf16.msra.mxu0 %v13595_v59  ;;  %12207 = vmatprep.mubr.f32.mxu0 %v14732_v36  ;;  %v2577_v59 = vsel %vm532_vm0, %v2575_v58, 0 }
  0x76   : > { %13600 = vmatprep.subr.bf16.mxu0 %v13579_v46  ;;  %v2646_v60 = vand.u32 4294901760, %v2577_v59 }
  0x78   : > { %v2647_v61 = vsub.f32 %v2577_v59, %v2646_v60 }
  0x7a   : > { %v2648_v62 = vand.u32 4294901760, %v2647_v61 }
  0x7c   : > { %12208 = vmatmul.mubr.f32.vlgmr.msra.gmra.mrb[0].mxu0 %v14738_v44 }
  0x7d   : > { %13602 = vmatpush3.bf16.msra.mxu0 %v13579_v46  ;;  %12214 = vmatprep.mubr.f32.mxu0 %v14732_v36  ;;  %v2139_v36 = vsub.f32 %v2066_v31, %v2138_v32  ;;  %v11404_v31 = vld [vmem:[%s16281_s3 + $0x50] sm:$0xff] }
  0x7e   : > { %13604 = vmatprep.subr.bf16.mxu0 %v13603_v12  ;;  %v3530_v33 = vand.u32 4294901760, %v11404_v31 }
  0x7f   : > { %v2140_v41 = vand.u32 4294901760, %v2139_v36 }
  0x81   : > { %v2141_v46 = vsub.f32 %v2139_v36, %v2140_v41 }
  0x83   : > { %v2142_v50 = vand.u32 4294901760, %v2141_v46 }
  0x84   : > { %12215 = vmatmul.mubr.f32.vlgmr.msra.gmra.mrb[0].mxu0 %v14738_v44  ;;  %v2169_v44 = vsub.f32 %v2167_v35, %v2168_v39  ;;  %v3539_v39 = vand.u32 4294901760, %v11407_v37 }
  0x85   : > { %13606 = vmatpush3.bf16.msra.mxu0 %v13603_v12  ;;  %12221 = vmatprep.mubr.f32.mxu0 %v1629_v20 }
  0x86   : > { %13608 = vmatprep.subr.bf16.mxu0 %v13607_v21  ;;  %v2170_v48 = vand.u32 4294901760, %v2169_v44  ;;  %v3643_v58 = vsub.f32 %v11407_v37, %v3539_v39 }
  0x88   : > { %v13631_v51 = vpack.c.bf16 %v2170_v48, %v2163_v47  ;;  %v14892_v47 = vsub.f32 %v11404_v31, %v3530_v33 }
  0x8c   : > { %12222 = vmatmul.mubr.f32.vlgmr.msra.gmra.mrb[0].mxu0 %v1639_v23 }
  0x8d   : > { %13610 = vmatpush3.bf16.msra.mxu0 %v13607_v21  ;;  %12228 = vmatprep.mubr.f32.mxu0 %v14752_v2 }
  0x8e   : > { %13612 = vmatprep.subr.bf16.mxu0 %v13611_v24 }
  0x94   : > { %12229 = vmatmul.mubr.f32.vlgmr.msra.gmra.mrb[0].mxu0 %v14758_v10 }
  0x95   : > { %13614 = vmatpush3.bf16.msra.mxu0 %v13611_v24  ;;  %12235 = vmatprep.mubr.f32.mxu0 %v1626_v6  ;;  %v11402_v24 = vld [vmem:[%s16281_s3 + $0x40] sm:$0xff] }
  0x96   : > { %13616 = vmatprep.subr.bf16.mxu0 %v13603_v12  ;;  %v3524_v26 = vand.u32 4294901760, %v11402_v24 }
  0x98   : > { %v14858_v29 = vsub.f32 %v11402_v24, %v3524_v26 }
  0x9c   : > { %12236 = vmatmul.mubr.f32.vlgmr.msra.gmra.mrb[0].mxu0 %v1636_v15 }
  0x9d   : > { %13618 = vmatpush3.bf16.msra.mxu0 %v13603_v12  ;;  %12242 = vmatprep.mubr.f32.mxu0 %v1627_v11 }
  0x9e   : > { %13620 = vmatprep.subr.bf16.mxu0 %v13619_v25 }
  0xa4   : > { %12243 = vmatmul.mubr.f32.vlgmr.msra.gmra.mrb[0].mxu0 %v1637_v19  ;;  %v3118_v19 = vand.u32 4294901760, %v3049_v18 }
  0xa5   : > { %13622 = vmatpush3.bf16.msra.mxu0 %v13619_v25  ;;  %12249 = vmatprep.mubr.f32.mxu0 %v14752_v2  ;;  %v11403_v25 = vld [vmem:[%s16281_s3 + $0x48] sm:$0xff] }
  0xa6   : > { %13624 = vmatprep.subr.bf16.mxu0 %v13603_v12  ;;  %v3119_v20 = vsub.f32 %v3049_v18, %v3118_v19  ;;  %v3527_v27 = vand.u32 4294901760, %v11403_v25 }
  0xa8   : > { %v3120_v21 = vand.u32 4294901760, %v3119_v20  ;;  %v14856_v28 = vpack.c.bf16 %v3527_v27, %v3524_v26  ;;  %v14860_v30 = vsub.f32 %v11403_v25, %v3527_v27 }
  0xaa   : > { %v3121_v22 = vsub.f32 %v3119_v20, %v3120_v21  ;;  %v3616_v46 = vand.u32 4294901760, %v14860_v30 }
  0xac   : > { %12250 = vmatmul.mubr.f32.vlgmr.msra.gmra.mrb[0].mxu0 %v14758_v10  ;;  %v3122_v23 = vand.u32 4294901760, %v3121_v22  ;;  %v13712_v22 = vpack.c.bf16 %v14860_v30, %v14858_v29 }
  0xad   : > { %13626 = vmatpush3.bf16.msra.mxu0 %v13603_v12  ;;  %12256 = vmatprep.mubr.f32.mxu0 %v14752_v2  ;;  %v2649_v2 = vsub.f32 %v2647_v61, %v2648_v62 }
  0xae   : > { %13628 = vmatprep.subr.bf16.mxu0 %v13627_v42 }
  0xaf   : > { %v2650_v8 = vand.u32 4294901760, %v2649_v2 }
  0xb4   : > { %12257 = vmatmul.mubr.f32.vlgmr.msra.gmra.mrb[0].mxu0 %v14758_v10 }
  0xb5   : > { %13630 = vmatpush3.bf16.msra.mxu0 %v13627_v42  ;;  %12263 = vmatprep.mubr.f32.mxu0 %v2142_v50 }
  0xb6   : > { %13632 = vmatprep.subr.bf16.mxu0 %v13631_v51 }
  0xbc   : > { %12264 = vmatmul.mubr.f32.vlgmr.msra.gmra.mrb[0].mxu0 %v2152_v53  ;;  %v3623_v53 = vand.u32 4294901760, %v14892_v47 }
  0xbd   : > { %13634 = vmatpush3.bf16.msra.mxu0 %v13631_v51  ;;  %12270 = vmatprep.mubr.f32.mxu0 %v2138_v32  ;;  %v3617_v51 = vsub.f32 %v14860_v30, %v3616_v46 }
  0xbe   : > { %13636 = vmatprep.subr.bf16.mxu0 %v13635_v54 }
  0xc4   : > { %12271 = vmatmul.mubr.f32.vlgmr.msra.gmra.mrb[0].mxu0 %v2148_v40 }
  0xc5   : > { %13638 = vmatpush3.bf16.msra.mxu0 %v13635_v54  ;;  %12277 = vmatprep.mubr.f32.mxu0 %v2139_v36  ;;  %v11406_v36 = vld [vmem:[%s16281_s3 + $0x60] sm:$0xff] }
  0xc6   : > { %13640 = vmatprep.subr.bf16.mxu0 %v13627_v42  ;;  %v3536_v38 = vand.u32 4294901760, %v11406_v36 }
  0xcc   : > { %12278 = vmatmul.mubr.f32.vlgmr.msra.gmra.mrb[0].mxu0 %v2149_v45  ;;  %v3609_v45 = vand.u32 4294901760, %v14858_v29 }
  0xcd   : > { %13642 = vmatpush3.bf16.msra.mxu0 %v13627_v42  ;;  %12284 = vmatprep.mubr.f32.mxu0 %v2140_v41  ;;  %v11408_v41 = vld [vmem:[%s16281_s3 + $0x70] sm:$0xff] }
  0xce   : > { %13644 = vmatprep.subr.bf16.mxu0 %v13643_v55  ;;  %v3542_v43 = vand.u32 4294901760, %v11408_v41  ;;  %v3610_v50 = vsub.f32 %v14858_v29, %v3609_v45  ;;  %v13736_v26 = vpack.c.bf16 %v3616_v46, %v3609_v45  ;;  %v3041_v46 = vld [vmem:[%s16281_s3 + $0x18] sm:$0xff] }
  0xd0   : > { %v3611_v52 = vand.u32 4294901760, %v3610_v50  ;;  %v3650_v59 = vsub.f32 %v11408_v41, %v3542_v43 }
  0xd4   : > { %12285 = vmatmul.mubr.f32.vlgmr.msra.gmra.mrb[0].mxu0 %v2150_v49 }
  0xd5   : > { %13646 = vmatpush3.bf16.msra.mxu0 %v13643_v55  ;;  %12291 = vmatprep.mubr.f32.mxu0 %v2138_v32  ;;  %v3636_v55 = vsub.f32 %v11406_v36, %v3536_v38 }
  0xd6   : > { %13648 = vmatprep.subr.bf16.mxu0 %v13627_v42 }
  0xd7   : > { %v13718_v24 = vpack.c.bf16 %v3643_v58, %v3636_v55 }
  0xdc   : > { %12292 = vmatmul.mubr.f32.vlgmr.msra.gmra.mrb[0].mxu0 %v2148_v40 }
  0xdd   : > { %13650 = vmatpush3.bf16.msra.mxu0 %v13627_v42  ;;  %12298 = vmatprep.mubr.f32.mxu0 %v2138_v32  ;;  %v11405_v32 = vld [vmem:[%s16281_s3 + $0x58] sm:$0xff] }
  0xde   : > { %12769 = vmatprep.subr.mxu0 %v14566_v57  ;;  %v3533_v34 = vand.u32 4294901760, %v11405_v32  ;;  %v11409_v42 = vld [vmem:[%s16281_s3 + $0x78] sm:$0xff] }
  0xdf   : > { %v3545_v44 = vand.u32 4294901760, %v11409_v42 }
  0xe0   : > { %v14870_v35 = vpack.c.bf16 %v3533_v34, %v3530_v33  ;;  %v14894_v48 = vsub.f32 %v11405_v32, %v3533_v34 }
  0xe1   : > { %v14896_v49 = vpack.c.bf16 %v3545_v44, %v3542_v43  ;;  %v3038_v43 = vld [vmem:[%s16281_s3] sm:$0xff] }
  0xe2   : > { %v3630_v54 = vand.u32 4294901760, %v14894_v48 }
  0xe4   : > { %12299 = vmatmul.mubr.f32.vlgmr.msra.gmra.mrb[0].mxu0 %v2148_v40  ;;  %v14880_v40 = vpack.c.bf16 %v3539_v39, %v3536_v38  ;;  %v13739_v27 = vpack.c.bf16 %v3630_v54, %v3623_v53 }
  0xe5   : > { %12771 = vmatprep.mubr.msk.f32.mxu0 %vm14565_vm1, %v14566_v57 }
 0x1b7   : > { %v12300_v63 = vpop.f32.mrb[0].mxu0 }
 0x1b8   : > { %v2583_v0 = vand.u32 4294901760, %v12300_v63  ;;  %v2563_v1 = vpop.f32.mrb[1].mxu0 }
 0x1b9   : > { %v2580_v3 = vand.u32 4294901760, %v2563_v1 }
 0x1ba   : > { %v2665_v4 = vsub.f32 %v12300_v63, %v2583_v0  ;;  %v3631_v63 = vsub.f32 %v14894_v48, %v3630_v54  ;;  %v3042_v54 = vld [vmem:[%s16281_s3 + $0x20] sm:$0xff] }
 0x1bb   : > { %v14790_v5 = vpack.c.bf16 %v2583_v0, %v2580_v3  ;;  %v2658_v6 = vsub.f32 %v2563_v1, %v2580_v3  ;;  %v3637_v3 = vand.u32 4294901760, %v3636_v55 }
 0x1bc   : > { %v2666_v7 = vand.u32 4294901760, %v2665_v4  ;;  %v3632_v2 = vand.u32 4294901760, %v3631_v63 }
 0x1bd   : > { %v2659_v9 = vand.u32 4294901760, %v2658_v6  ;;  %v14792_v10 = vpack.c.bf16 %v2665_v4, %v2658_v6  ;;  %13653 = vmatpush3.bf16.msra.mxu1 %v14790_v5 }
 0x1be   : > { %v2667_v11 = vsub.f32 %v2665_v4, %v2666_v7  ;;  %13654 = vmatprep.subr.bf16.mxu1 %v14564_v56  ;;  %v3644_v4 = vand.u32 4294901760, %v3643_v58 }
 0x1bf   : > { %v2660_v12 = vsub.f32 %v2658_v6, %v2659_v9  ;;  %v14796_v13 = vpack.c.bf16 %v2666_v7, %v2659_v9  ;;  %v3638_v7 = vsub.f32 %v3636_v55, %v3637_v3  ;;  %v3043_v55 = vld [vmem:[%s16281_s3 + $0x28] sm:$0xff] }
 0x1c0   : > { %v2668_v14 = vand.u32 4294901760, %v2667_v11  ;;  %12306 = vmatmul.mubr.f32.vlgmr.msra.gmra.mrb[0].mxu1 %v2650_v8  ;;  %v3645_v8 = vsub.f32 %v3643_v58, %v3644_v4  ;;  %v3651_v11 = vand.u32 4294901760, %v3650_v59  ;;  %v13742_v31 = vpack.c.bf16 %v3644_v4, %v3637_v3 }
 0x1c1   : > { %v2661_v15 = vand.u32 4294901760, %v2660_v12  ;;  %12312 = vmatprep.mubr.msk.f32.mxu1 %vm14565_vm1, %v14566_v57  ;;  %v3639_v9 = vand.u32 4294901760, %v3638_v7 }
 0x1c3   : > { %v14800_v16 = vpack.c.bf16 %v2668_v14, %v2661_v15  ;;  %v3646_v14 = vand.u32 4294901760, %v3645_v8  ;;  %v3652_v15 = vsub.f32 %v3650_v59, %v3651_v11 }
 0x1c5   : > { %13656 = vmatpush3.bf16.msra.mxu1 %v14800_v16  ;;  %v13706_v18 = vpack.c.bf16 %v3646_v14, %v3639_v9 }
 0x1c6   : > { %13657 = vmatprep.subr.bf16.mxu1 %v14564_v56 }
 0x1c8   : > { %12313 = vmatmul.mubr.f32.vlgmr.msra.gmra.mrb[0].mxu1 %v2646_v60 }
 0x1c9   : > { %13659 = vmatpush3.bf16.msra.mxu1 %v14792_v10  ;;  %12319 = vmatprep.mubr.msk.f32.mxu1 %vm14565_vm1, %v14566_v57 }
 0x1ca   : > { %13660 = vmatprep.subr.bf16.mxu1 %v14564_v56 }
 0x1d0   : > { %12320 = vmatmul.mubr.f32.vlgmr.msra.gmra.mrb[0].mxu1 %v2647_v61  ;;  %v3618_v61 = vand.u32 4294901760, %v3617_v51 }
 0x1d1   : > { %13662 = vmatpush3.bf16.msra.mxu1 %v14790_v5  ;;  %12326 = vmatprep.mubr.msk.f32.mxu1 %vm14565_vm1, %v14566_v57 }
 0x1d2   : > { %13663 = vmatprep.subr.bf16.mxu1 %v14564_v56  ;;  %v13700_v0 = vpack.c.bf16 %v3618_v61, %v3611_v52  ;;  %v4073_v52 = vand.u32 4294901760, %v3041_v46 }
 0x1d8   : > { %12327 = vmatmul.mubr.f32.vlgmr.msra.gmra.mrb[0].mxu1 %v2648_v62  ;;  %v3624_v62 = vsub.f32 %v14892_v47, %v3623_v53 }
 0x1d9   : > { %13665 = vmatpush3.bf16.msra.mxu1 %v14796_v13  ;;  %12333 = vmatprep.mubr.msk.f32.mxu1 %vm14565_vm1, %v14566_v57 }
 0x1da   : > { %13666 = vmatprep.subr.bf16.mxu1 %v14564_v56  ;;  %v3625_v1 = vand.u32 4294901760, %v3624_v62 }
 0x1dc   : > { %v13703_v6 = vpack.c.bf16 %v3632_v2, %v3625_v1  ;;  %v4079_v1 = vand.u32 4294901760, %v3043_v55 }
 0x1de   : > { %v15019_v14 = vsub.f32 %v3043_v55, %v4079_v1  ;;  %v11410_v55 = vld [vmem:[%s16280_s2 + $0x10] sm:$0x7f] }
 0x1e0   : > { %12334 = vmatmul.mubr.f32.vlgmr.msra.gmra.mrb[0].mxu1 %v2646_v60 }
 0x1e1   : > { %13668 = vmatpush3.bf16.msra.mxu1 %v14790_v5  ;;  %12340 = vmatprep.mubr.msk.f32.mxu1 %vm14565_vm1, %v14566_v57 }
 0x1e2   : > { %13669 = vmatprep.subr.bf16.mxu1 %v14564_v56 }
 0x1e8   : > { %12341 = vmatmul.mubr.f32.vlgmr.msra.gmra.mrb[0].mxu1 %v2646_v60  ;;  %v3657_v60 = vsub.f32 %v11409_v42, %v3545_v44  ;;  %v3039_v44 = vld [vmem:[%s16281_s3 + $0x8] sm:$0xff] }
 0x1e9   : > { %13671 = vmatpush3.bf16.msra.mxu1 %v14790_v5  ;;  %12347 = vmatprep.mubr.msk.f32.mxu1 %vm14565_vm1, %v14566_v57  ;;  %v4067_v45 = vand.u32 4294901760, %v3039_v44 }
 0x1ea   : > { %13672 = vmatprep.subr.bf16.mxu1 %v14564_v56  ;;  %v3658_v12 = vand.u32 4294901760, %v3657_v60  ;;  %v13721_v25 = vpack.c.bf16 %v3657_v60, %v3650_v59  ;;  %v3044_v59 = vld [vmem:[%s16281_s3 + $0x30] sm:$0xff] }
 0x1eb   : > { %v14970_v50 = vsub.f32 %v3039_v44, %v4067_v45  ;;  %v4082_v3 = vand.u32 4294901760, %v3044_v59 }
 0x1ec   : > { %12348 = vmatmul.mubr.f32.vlgmr.msra.gmra.mrb[2].mxu1 %v3122_v23  ;;  %v3659_v17 = vsub.f32 %v3657_v60, %v3658_v12  ;;  %v13715_v23 = vpack.c.bf16 %v14894_v48, %v14892_v47  ;;  %v13745_v32 = vpack.c.bf16 %v3658_v12, %v3651_v11  ;;  %v3045_v60 = vld [vmem:[%s16281_s3 + $0x38] sm:$0xff] }
 0x1ed   : > { %13674 = vmatpush3.bf16.msra.mxu1 %v14800_v16  ;;  %12354 = vmatprep.mubr.msk.f32.mxu1 %vm14565_vm1, %v14566_v57  ;;  %v4156_v62 = vand.u32 4294901760, %v14970_v50  ;;  %v4085_v4 = vand.u32 4294901760, %v3045_v60 }
 0x1ee   : > { %13675 = vmatprep.subr.bf16.mxu1 %v14564_v56 }
 0x1ef   : > { %v4157_v7 = vsub.f32 %v14970_v50, %v4156_v62 }
 0x1f4   : > { %12355 = vmatmul.mubr.f32.vlgmr.msra.gmra.mrb[2].mxu1 %v3118_v19 }
 0x1f5   : > { %13677 = vmatpush3.bf16.msra.mxu1 %v14792_v10  ;;  %12361 = vmatprep.mubr.msk.f32.mxu1 %vm14565_vm1, %v14566_v57 }
 0x1f6   : > { %13678 = vmatprep.subr.bf16.mxu1 %v14564_v56 }
 0x1fc   : > { %12362 = vmatmul.mubr.f32.vlgmr.msra.gmra.mrb[2].mxu1 %v3119_v20  ;;  %v3660_v20 = vand.u32 4294901760, %v3659_v17  ;;  %v15023_v17 = vpack.c.bf16 %v4085_v4, %v4082_v3 }
 0x1fd   : > { %13680 = vmatpush3.bf16.msra.mxu1 %v14790_v5  ;;  %12368 = vmatprep.mubr.msk.f32.mxu1 %vm14565_vm1, %v14566_v57 }
 0x1fe   : > { %13681 = vmatprep.subr.bf16.mxu1 %v14564_v56 }
 0x204   : > { %12369 = vmatmul.mubr.f32.vlgmr.msra.gmra.mrb[2].mxu1 %v3120_v21 }
 0x205   : > { %13683 = vmatpush3.bf16.msra.mxu1 %v14796_v13  ;;  %12375 = vmatprep.mubr.msk.f32.mxu1 %vm14565_vm1, %v14566_v57 }
 0x206   : > { %13684 = vmatprep.subr.bf16.mxu1 %v14564_v56 }
 0x20c   : > { %12376 = vmatmul.mubr.f32.vlgmr.msra.gmra.mrb[2].mxu1 %v3118_v19 }
 0x20d   : > { %13686 = vmatpush3.bf16.msra.mxu1 %v14790_v5  ;;  %12382 = vmatprep.mubr.msk.f32.mxu1 %vm14565_vm1, %v14566_v57 }
 0x20e   : > { %13687 = vmatprep.subr.bf16.mxu1 %v14564_v56 }
 0x214   : > { %12383 = vmatmul.mubr.f32.vlgmr.msra.gmra.mrb[2].mxu1 %v3118_v19  ;;  %v3653_v19 = vand.u32 4294901760, %v3652_v15 }
 0x215   : > { %12401 = vmatprep.mubr.msk.f32.mxu1 %vm14565_vm1, %v14566_v57  ;;  %13689 = vmatpush3.bf16.msra.mxu1 %v14856_v28 }
 0x216   : > { %13690 = vmatprep.subr.bf16.mxu1 %v14564_v56  ;;  %v13709_v21 = vpack.c.bf16 %v3660_v20, %v3653_v19  ;;  %v4158_v19 = vand.u32 4294901760, %v4157_v7 }
 0x219   : > { %13692 = vmatpush3.bf16.msra.mxu1 %v14870_v35 }
 0x21a   : > { %13693 = vmatprep.subr.bf16.mxu1 %v14564_v56 }
 0x21d   : > { %13695 = vmatpush3.bf16.msra.mxu1 %v14880_v40 }
 0x21e   : > { %13696 = vmatprep.subr.bf16.mxu1 %v14564_v56 }
 0x221   : > { %13698 = vmatpush3.bf16.msra.mxu1 %v14896_v49 }
 0x222   : > { %13699 = vmatprep.subr.bf16.mxu1 %v14564_v56 }
 0x2bb   : > { %v14910_v33 = vpop.f32.mrb[0].mxu1 }
 0x2bc   : > { %v12342_v34 = vpop.f32.mrb[1].mxu1  ;;  %v4061_v47 = vsel %vm3519_vm2, %v14910_v33, 0 }
 0x2bd   : > { %v14975_v53 = vand.u32 4294901760, %v4061_v47 }
 0x2bf   : > { %v15003_v2 = vsub.f32 %v4061_v47, %v14975_v53 }
 0x2c1   : > { %v4138_v15 = vand.u32 4294901760, %v15003_v2 }
 0x2e7   : > { %v3506_v36 = vpop.f32.mrb[2].mxu1 }
 0x2e8   : > { %v3521_v37 = vsel %vm3519_vm2, %v3506_v36, 0  ;;  %v12384_v38 = vpop.f32.mrb[3].mxu1 }
 0x2e9   : > { %v14913_v39 = vand.u32 4294901760, %v3521_v37 }
 0x2eb   : > { %v3597_v29 = vsub.f32 %v3521_v37, %v14913_v39 }
 0x2ed   : > { %v3598_v30 = vand.u32 4294901760, %v3597_v29 }
 0x2ef   : > { %v3599_v41 = vsub.f32 %v3597_v29, %v3598_v30 }
 0x2f1   : > { %v3600_v42 = vand.u32 4294901760, %v3599_v41 }
 0x2f3   : > { %12402 = vmatmul.mubr.f32.vlgmr.msra.gmra.mrb[4].mxu1 %v3600_v42 }
 0x2f4   : > { %13701 = vmatpush3.bf16.msra.mxu1 %v13700_v0  ;;  %12420 = vmatprep.mubr.msk.f32.mxu1 %vm14565_vm1, %v14566_v57  ;;  %v4076_v0 = vand.u32 4294901760, %v3042_v54 }
 0x2f5   : > { %13702 = vmatprep.subr.bf16.mxu1 %v14564_v56 }
 0x2f6   : > { %v15015_v11 = vpack.c.bf16 %v4079_v1, %v4076_v0  ;;  %v15017_v12 = vsub.f32 %v3042_v54, %v4076_v0 }
 0x2f8   : > { %13704 = vmatpush3.bf16.msra.mxu1 %v13703_v6  ;;  %v13790_v47 = vpack.c.bf16 %v15019_v14, %v15017_v12 }
 0x2f9   : > { %13705 = vmatprep.subr.bf16.mxu1 %v14564_v56 }
 0x2fc   : > { %13707 = vmatpush3.bf16.msra.mxu1 %v13706_v18 }
 0x2fd   : > { %13708 = vmatprep.subr.bf16.mxu1 %v14564_v56 }
 0x300   : > { %13710 = vmatpush3.bf16.msra.mxu1 %v13709_v21 }
 0x301   : > { %13711 = vmatprep.subr.bf16.mxu1 %v14564_v56 }
 0x303   : > { %12421 = vmatmul.mubr.f32.vlgmr.msra.gmra.mrb[6].mxu1 %v14913_v39 }
 0x304   : > { %13713 = vmatpush3.bf16.msra.mxu1 %v13712_v22  ;;  %12439 = vmatprep.mubr.msk.f32.mxu1 %vm14565_vm1, %v14566_v57  ;;  %v15032_v22 = vsub.f32 %v3044_v59, %v4082_v3 }
 0x305   : > { %13714 = vmatprep.subr.bf16.mxu1 %v14564_v56 }
 0x306   : > { %v4191_v36 = vand.u32 4294901760, %v15032_v22 }
 0x308   : > { %13716 = vmatpush3.bf16.msra.mxu1 %v13715_v23  ;;  %v15034_v23 = vsub.f32 %v3045_v60, %v4085_v4  ;;  %v4192_v41 = vsub.f32 %v15032_v22, %v4191_v36 }
 0x309   : > { %13717 = vmatprep.subr.bf16.mxu1 %v14564_v56 }
 0x30a   : > { %v4198_v37 = vand.u32 4294901760, %v15034_v23  ;;  %v4193_v44 = vand.u32 4294901760, %v4192_v41 }
 0x30c   : > { %13719 = vmatpush3.bf16.msra.mxu1 %v13718_v24  ;;  %v4177_v24 = vand.u32 4294901760, %v15017_v12  ;;  %v4199_v42 = vsub.f32 %v15034_v23, %v4198_v37 }
 0x30d   : > { %13720 = vmatprep.subr.bf16.mxu1 %v14564_v56 }
 0x30e   : > { %v4178_v33 = vsub.f32 %v15017_v12, %v4177_v24 }
 0x310   : > { %13722 = vmatpush3.bf16.msra.mxu1 %v13721_v25  ;;  %v4184_v25 = vand.u32 4294901760, %v15019_v14 }
 0x311   : > { %13723 = vmatprep.subr.bf16.mxu1 %v14564_v56 }
 0x312   : > { %v4185_v34 = vsub.f32 %v15019_v14, %v4184_v25 }
 0x313   : > { %12440 = vmatmul.mubr.f32.vlgmr.msra.gmra.mrb[8].mxu1 %v3597_v29  ;;  %v4179_v29 = vand.u32 4294901760, %v4178_v33 }
 0x314   : > { %13725 = vmatpush3.bf16.msra.mxu1 %v14856_v28  ;;  %12458 = vmatprep.mubr.msk.f32.mxu1 %vm14565_vm1, %v14566_v57 }
 0x315   : > { %13726 = vmatprep.subr.bf16.mxu1 %v14564_v56 }
 0x318   : > { %13728 = vmatpush3.bf16.msra.mxu1 %v14870_v35 }
 0x319   : > { %13729 = vmatprep.subr.bf16.mxu1 %v14564_v56 }
 0x31c   : > { %13731 = vmatpush3.bf16.msra.mxu1 %v14880_v40 }
 0x31d   : > { %13732 = vmatprep.subr.bf16.mxu1 %v14564_v56 }
 0x320   : > { %13734 = vmatpush3.bf16.msra.mxu1 %v14896_v49 }
 0x321   : > { %13735 = vmatprep.subr.bf16.mxu1 %v14564_v56 }
 0x323   : > { %12459 = vmatmul.mubr.f32.vlgmr.msra.gmra.mrb[10].mxu1 %v3598_v30  ;;  %v4186_v30 = vand.u32 4294901760, %v4185_v34 }
 0x324   : > { %13737 = vmatpush3.bf16.msra.mxu1 %v13736_v26  ;;  %12477 = vmatprep.mubr.msk.f32.mxu1 %vm14565_vm1, %v14566_v57  ;;  %v4139_v26 = vsub.f32 %v15003_v2, %v4138_v15 }
 0x325   : > { %13738 = vmatprep.subr.bf16.mxu1 %v14564_v56 }
 0x326   : > { %v4140_v38 = vand.u32 4294901760, %v4139_v26  ;;  %v11415_v26 = vld [vmem:[%s16281_s3 + $0xa0] sm:$0xff] }
 0x328   : > { %13740 = vmatpush3.bf16.msra.mxu1 %v13739_v27 }
 0x329   : > { %13741 = vmatprep.subr.bf16.mxu1 %v14564_v56 }
 0x32c   : > { %13743 = vmatpush3.bf16.msra.mxu1 %v13742_v31 }
 0x32d   : > { %13744 = vmatprep.subr.bf16.mxu1 %v14564_v56 }
 0x330   : > { %13746 = vmatpush3.bf16.msra.mxu1 %v13745_v32 }
 0x331   : > { %13747 = vmatprep.subr.bf16.mxu1 %v14564_v56 }
 0x333   : > { %12478 = vmatmul.mubr.f32.vlgmr.msra.gmra.mrb[12].mxu1 %v14913_v39 }
 0x334   : > { %13749 = vmatpush3.bf16.msra.mxu1 %v14856_v28  ;;  %12496 = vmatprep.mubr.msk.f32.mxu1 %vm14565_vm1, %v14566_v57  ;;  %v4064_v28 = vand.u32 4294901760, %v3038_v43 }
 0x335   : > { %13750 = vmatprep.subr.bf16.mxu1 %v14564_v56 }
 0x336   : > { %v14968_v48 = vsub.f32 %v3038_v43, %v4064_v28  ;;  %v13778_v43 = vpack.c.bf16 %v4186_v30, %v4179_v29 }
 0x338   : > { %13752 = vmatpush3.bf16.msra.mxu1 %v14870_v35  ;;  %v3040_v35 = vld [vmem:[%s16281_s3 + $0x10] sm:$0xff]  ;;  %v4149_v61 = vand.u32 4294901760, %v14968_v48 }
 0x339   : > { %13753 = vmatprep.subr.bf16.mxu1 %v14564_v56  ;;  %v4070_v51 = vand.u32 4294901760, %v3040_v35 }
 0x33a   : > { %v4150_v6 = vsub.f32 %v14968_v48, %v4149_v61 }
 0x33b   : > { %v14985_v58 = vsub.f32 %v3040_v35, %v4070_v51  ;;  %v14998_v63 = vpack.c.bf16 %v4073_v52, %v4070_v51  ;;  %v13784_v35 = vpack.c.bf16 %v14970_v50, %v14968_v48  ;;  %v13793_v51 = vpack.c.bf16 %v15034_v23, %v15032_v22  ;;  %v11414_v22 = vld [vmem:[%s16281_s3 + $0x98] sm:$0xff] }
 0x33c   : > { %13755 = vmatpush3.bf16.msra.mxu1 %v14880_v40  ;;  %v14973_v40 = vpack.c.bf16 %v4067_v45, %v4064_v28  ;;  %v4151_v18 = vand.u32 4294901760, %v4150_v6  ;;  %v4200_v28 = vand.u32 4294901760, %v4199_v42  ;;  %v13814_v48 = vpack.c.bf16 %v4184_v25, %v4177_v24  ;;  %v11412_v6 = vld [vmem:[%s16281_s3 + $0x88] sm:$0xff] }
 0x33d   : > { %13756 = vmatprep.subr.bf16.mxu1 %v14564_v56  ;;  %v4163_v8 = vand.u32 4294901760, %v14985_v58  ;;  %v13817_v50 = vpack.c.bf16 %v4198_v37, %v4191_v36  ;;  %v5086_v24 = vand.u32 4294901760, %v11414_v22  ;;  %v11417_v36 = vld [vmem:[%s16281_s3 + $0xb0] sm:$0xff]  ;;  %v11418_v37 = vld [vmem:[%s16281_s3 + $0xb8] sm:$0xff] }
 0x33e   : > { %v13772_v27 = vpack.c.bf16 %v4158_v19, %v4151_v18  ;;  %v13781_v45 = vpack.c.bf16 %v4200_v28, %v4193_v44  ;;  %v5095_v29 = vand.u32 4294901760, %v11417_v36  ;;  %v5098_v30 = vand.u32 4294901760, %v11418_v37 }
 0x33f   : > { %v4164_v20 = vsub.f32 %v14985_v58, %v4163_v8  ;;  %v15192_v44 = vsub.f32 %v11414_v22, %v5086_v24 }
 0x340   : > { %13758 = vmatpush3.bf16.msra.mxu1 %v14896_v49  ;;  %v14987_v49 = vsub.f32 %v3041_v46, %v4073_v52  ;;  %v13808_v52 = vpack.c.bf16 %v4156_v62, %v4149_v61  ;;  %v15194_v28 = vpack.c.bf16 %v5098_v30, %v5095_v29 }
 0x341   : > { %13759 = vmatprep.subr.bf16.mxu1 %v14564_v56  ;;  %v4165_v31 = vand.u32 4294901760, %v4164_v20 }
 0x342   : > { %v4170_v9 = vand.u32 4294901760, %v14987_v49  ;;  %v13787_v46 = vpack.c.bf16 %v14987_v49, %v14985_v58  ;;  %v4603_v58 = vsel %vm532_vm0, %v11410_v55, 0 }
 0x343   : > { %12497 = vmatmul.mubr.f32.vlgmr.msra.gmra.mrb[14].mxu1 %v14913_v39 }
 0x344   : > { %13761 = vmatpush3.bf16.msra.mxu1 %v14973_v40  ;;  %12515 = vmatprep.mubr.msk.f32.mxu1 %vm14565_vm1, %v14566_v57  ;;  %v4171_v21 = vsub.f32 %v14987_v49, %v4170_v9  ;;  %v13811_v54 = vpack.c.bf16 %v4170_v9, %v4163_v8  ;;  %v4672_v49 = vand.u32 4294901760, %v4603_v58  ;;  %v5080_v8 = vand.u32 4294901760, %v11412_v6 }
 0x345   : > { %13762 = vmatprep.subr.bf16.mxu1 %v14564_v56 }
 0x346   : > { %v4172_v32 = vand.u32 4294901760, %v4171_v21  ;;  %v4673_v59 = vsub.f32 %v4603_v58, %v4672_v49  ;;  %v15158_v12 = vsub.f32 %v11412_v6, %v5080_v8  ;;  %v11413_v21 = vld [vmem:[%s16281_s3 + $0x90] sm:$0xff] }
 0x347   : > { %v5083_v23 = vand.u32 4294901760, %v11413_v21 }
 0x348   : > { %13764 = vmatpush3.bf16.msra.mxu1 %v14998_v63  ;;  %v13775_v39 = vpack.c.bf16 %v4172_v32, %v4165_v31  ;;  %v4674_v60 = vand.u32 4294901760, %v4673_v59  ;;  %v5089_v31 = vand.u32 4294901760, %v11415_v26  ;;  %v5169_v42 = vand.u32 4294901760, %v15158_v12 }
 0x349   : > { %13765 = vmatprep.subr.bf16.mxu1 %v14564_v56  ;;  %v15168_v25 = vpack.c.bf16 %v5086_v24, %v5083_v23 }
 0x34a   : > { %v4675_v61 = vsub.f32 %v4673_v59, %v4674_v60 }
 0x34c   : > { %13767 = vmatpush3.bf16.msra.mxu1 %v15015_v11 }
 0x34d   : > { %13768 = vmatprep.subr.bf16.mxu1 %v14564_v56 }
 0x350   : > { %13770 = vmatpush3.bf16.msra.mxu1 %v15023_v17 }
 0x351   : > { %13771 = vmatprep.subr.bf16.mxu1 %v14564_v56 }
 0x353   : > { %12516 = vmatmul.mubr.f32.vlgmr.msra.gmra.mrb[16].mxu1 %v4140_v38 }
 0x354   : > { %13773 = vmatpush3.bf16.msra.mxu1 %v13772_v27  ;;  %12534 = vmatprep.mubr.msk.f32.mxu1 %vm14565_vm1, %v14566_v57  ;;  %v11416_v27 = vld [vmem:[%s16281_s3 + $0xa8] sm:$0xff] }
 0x355   : > { %13774 = vmatprep.subr.bf16.mxu1 %v14564_v56  ;;  %v5092_v32 = vand.u32 4294901760, %v11416_v27 }
 0x357   : > { %v15178_v33 = vpack.c.bf16 %v5092_v32, %v5089_v31 }
 0x358   : > { %13776 = vmatpush3.bf16.msra.mxu1 %v13775_v39 }
 0x359   : > { %13777 = vmatprep.subr.bf16.mxu1 %v14564_v56 }
 0x35c   : > { %13779 = vmatpush3.bf16.msra.mxu1 %v13778_v43  ;;  %v15190_v43 = vsub.f32 %v11413_v21, %v5083_v23 }
 0x35d   : > { %13780 = vmatprep.subr.bf16.mxu1 %v14564_v56 }
 0x360   : > { %13782 = vmatpush3.bf16.msra.mxu1 %v13781_v45 }
 0x361   : > { %13783 = vmatprep.subr.bf16.mxu1 %v14564_v56 }
 0x363   : > { %12535 = vmatmul.mubr.f32.vlgmr.msra.gmra.mrb[18].mxu1 %v14975_v53 }
 0x364   : > { %13785 = vmatpush3.bf16.msra.mxu1 %v13784_v35  ;;  %12553 = vmatprep.mubr.msk.f32.mxu1 %vm14565_vm1, %v14566_v57  ;;  %v5170_v35 = vsub.f32 %v15158_v12, %v5169_v42 }
 0x365   : > { %13786 = vmatprep.subr.bf16.mxu1 %v14564_v56 }
 0x366   : > { %v5171_v55 = vand.u32 4294901760, %v5170_v35 }
 0x368   : > { %13788 = vmatpush3.bf16.msra.mxu1 %v13787_v46 }
 0x369   : > { %13789 = vmatprep.subr.bf16.mxu1 %v14564_v56 }
 0x36c   : > { %13791 = vmatpush3.bf16.msra.mxu1 %v13790_v47  ;;  %v5176_v47 = vand.u32 4294901760, %v15190_v43 }
 0x36d   : > { %13792 = vmatprep.subr.bf16.mxu1 %v14564_v56 }
 0x36e   : > { %v5177_v58 = vsub.f32 %v15190_v43, %v5176_v47 }
 0x370   : > { %13794 = vmatpush3.bf16.msra.mxu1 %v13793_v51  ;;  %v5183_v51 = vand.u32 4294901760, %v15192_v44 }
 0x371   : > { %13795 = vmatprep.subr.bf16.mxu1 %v14564_v56 }
 0x373   : > { %12554 = vmatmul.mubr.f32.vlgmr.msra.gmra.mrb[20].mxu1 %v15003_v2 }
 0x374   : > { %13797 = vmatpush3.bf16.msra.mxu1 %v14973_v40  ;;  %12572 = vmatprep.mubr.msk.f32.mxu1 %vm14565_vm1, %v14566_v57 }
 0x375   : > { %13798 = vmatprep.subr.bf16.mxu1 %v14564_v56 }
 0x378   : > { %13800 = vmatpush3.bf16.msra.mxu1 %v14998_v63 }
 0x379   : > { %13801 = vmatprep.subr.bf16.mxu1 %v14564_v56 }
 0x37c   : > { %13803 = vmatpush3.bf16.msra.mxu1 %v15015_v11 }
 0x37d   : > { %13804 = vmatprep.subr.bf16.mxu1 %v14564_v56 }
 0x380   : > { %13806 = vmatpush3.bf16.msra.mxu1 %v15023_v17 }
 0x381   : > { %13807 = vmatprep.subr.bf16.mxu1 %v14564_v56 }
 0x383   : > { %12573 = vmatmul.mubr.f32.vlgmr.msra.gmra.mrb[22].mxu1 %v4138_v15 }
 0x384   : > { %13809 = vmatpush3.bf16.msra.mxu1 %v13808_v52  ;;  %12591 = vmatprep.mubr.msk.f32.mxu1 %vm14565_vm1, %v14566_v57  ;;  %v15201_v52 = vsub.f32 %v11415_v26, %v5089_v31 }
 0x385   : > { %13810 = vmatprep.subr.bf16.mxu1 %v14564_v56 }
 0x388   : > { %13812 = vmatpush3.bf16.msra.mxu1 %v13811_v54  ;;  %v15203_v54 = vsub.f32 %v11416_v27, %v5092_v32  ;;  %v13901_v32 = vpack.c.bf16 %v5183_v51, %v5176_v47 }
 0x389   : > { %13813 = vmatprep.subr.bf16.mxu1 %v14564_v56 }
 0x38c   : > { %13815 = vmatpush3.bf16.msra.mxu1 %v13814_v48  ;;  %v15205_v48 = vsub.f32 %v11417_v36, %v5095_v29 }
 0x38d   : > { %13816 = vmatprep.subr.bf16.mxu1 %v14564_v56 }
 0x390   : > { %13818 = vmatpush3.bf16.msra.mxu1 %v13817_v50  ;;  %v15207_v50 = vsub.f32 %v11418_v37, %v5098_v30 }
 0x391   : > { %13819 = vmatprep.subr.bf16.mxu1 %v14564_v56 }
 0x392   : > { %v13883_v23 = vpack.c.bf16 %v15207_v50, %v15205_v48 }
 0x393   : > { %12592 = vmatmul.mubr.f32.vlgmr.msra.gmra.mrb[24].mxu1 %v14975_v53 }
 0x394   : > { %13821 = vmatpush3.bf16.msra.mxu1 %v14973_v40  ;;  %12610 = vmatprep.mubr.msk.f32.mxu1 %vm14565_vm1, %v14566_v57  ;;  %v4676_v40 = vand.u32 4294901760, %v4675_v61 }
 0x395   : > { %13822 = vmatprep.subr.bf16.mxu1 %v14564_v56 }
 0x398   : > { %13824 = vmatpush3.bf16.msra.mxu1 %v14998_v63 }
 0x399   : > { %13825 = vmatprep.subr.bf16.mxu1 %v14564_v56 }
 0x39c   : > { %13827 = vmatpush3.bf16.msra.mxu1 %v15015_v11 }
 0x39d   : > { %13828 = vmatprep.subr.bf16.mxu1 %v14564_v56 }
 0x3a0   : > { %13830 = vmatpush3.bf16.msra.mxu1 %v15023_v17 }
 0x3a1   : > { %13831 = vmatprep.subr.bf16.mxu1 %v14564_v56 }
 0x3a3   : > { %12611 = vmatmul.mubr.f32.vlgmr.msra.gmra.mrb[26].mxu1 %v14975_v53 }
 0x3a4   : > { %13833 = vmatpush3.bf16.msra.mxu1 %v14790_v5  ;;  %12617 = vmatprep.mubr.msk.f32.mxu1 %vm14565_vm1, %v14566_v57 }
 0x3a5   : > { %13834 = vmatprep.subr.bf16.mxu1 %v14564_v56 }
 0x3a7   : > { %12618 = vmatmul.mubr.f32.vlgmr.msra.gmra.mrb[28].mxu1 %v4676_v40  ;;  %v5190_v40 = vand.u32 4294901760, %v15201_v52 }
 0x3a8   : > { %13836 = vmatpush3.bf16.msra.mxu1 %v14800_v16  ;;  %12624 = vmatprep.mubr.msk.f32.mxu1 %vm14565_vm1, %v14566_v57 }
 0x3a9   : > { %13837 = vmatprep.subr.bf16.mxu1 %v14564_v56 }
 0x3af   : > { %12625 = vmatmul.mubr.f32.vlgmr.msra.gmra.mrb[28].mxu1 %v4672_v49 }
 0x3b0   : > { %13839 = vmatpush3.bf16.msra.mxu1 %v14792_v10  ;;  %12631 = vmatprep.mubr.msk.f32.mxu1 %vm14565_vm1, %v14566_v57 }
 0x3b1   : > { %13840 = vmatprep.subr.bf16.mxu1 %v14564_v56 }
 0x3b7   : > { %12632 = vmatmul.mubr.f32.vlgmr.msra.gmra.mrb[28].mxu1 %v4673_v59 }
 0x3b8   : > { %13842 = vmatpush3.bf16.msra.mxu1 %v14790_v5  ;;  %12638 = vmatprep.mubr.msk.f32.mxu1 %vm14565_vm1, %v14566_v57 }
 0x3b9   : > { %13843 = vmatprep.subr.bf16.mxu1 %v14564_v56 }
 0x3bf   : > { %12639 = vmatmul.mubr.f32.vlgmr.msra.gmra.mrb[28].mxu1 %v4674_v60  ;;  %v5178_v60 = vand.u32 4294901760, %v5177_v58 }
 0x3c0   : > { %13845 = vmatpush3.bf16.msra.mxu1 %v14796_v13  ;;  %12645 = vmatprep.mubr.msk.f32.mxu1 %vm14565_vm1, %v14566_v57 }
 0x3c1   : > { %13846 = vmatprep.subr.bf16.mxu1 %v14564_v56 }
 0x3c6   : > { %v3602_v10 = vpop.f32.mrb[4].mxu1 }
 0x3c7   : > { %12646 = vmatmul.mubr.f32.vlgmr.msra.gmra.mrb[28].mxu1 %v4672_v49  ;;  %v12403_v16 = vpop.f32.mrb[5].mxu1 }
 0x3c8   : > { %13848 = vmatpush3.bf16.msra.mxu1 %v14790_v5  ;;  %12652 = vmatprep.mubr.msk.f32.mxu1 %vm14565_vm1, %v14566_v57  ;;  %v11411_v5 = vld [vmem:[%s16281_s3 + $0x80] sm:$0xff] }
 0x3c9   : > { %13849 = vmatprep.subr.bf16.mxu1 %v14564_v56  ;;  %v5077_v7 = vand.u32 4294901760, %v11411_v5 }
 0x3cb   : > { %v15154_v9 = vpack.c.bf16 %v5080_v8, %v5077_v7  ;;  %v15156_v11 = vsub.f32 %v11411_v5, %v5077_v7 }
 0x3cd   : > { %v5162_v41 = vand.u32 4294901760, %v15156_v11 }
 0x3cf   : > { %12653 = vmatmul.mubr.f32.vlgmr.msra.gmra.mrb[28].mxu1 %v4672_v49  ;;  %v5163_v45 = vsub.f32 %v15156_v11, %v5162_v41  ;;  %v5184_v49 = vsub.f32 %v15192_v44, %v5183_v51  ;;  %v13898_v31 = vpack.c.bf16 %v5169_v42, %v5162_v41 }
 0x3d0   : > { %12671 = vmatprep.mubr.msk.f32.mxu1 %vm14565_vm1, %v14566_v57  ;;  %13851 = vmatpush3.bf16.msra.mxu1 %v15154_v9 }
 0x3d1   : > { %13852 = vmatprep.subr.bf16.mxu1 %v14564_v56  ;;  %v5164_v46 = vand.u32 4294901760, %v5163_v45  ;;  %v5185_v61 = vand.u32 4294901760, %v5184_v49 }
 0x3d3   : > { %v13862_v59 = vpack.c.bf16 %v5171_v55, %v5164_v46  ;;  %v13865_v16 = vpack.c.bf16 %v5185_v61, %v5178_v60 }
 0x3d4   : > { %13854 = vmatpush3.bf16.msra.mxu1 %v15168_v25 }
 0x3d5   : > { %13855 = vmatprep.subr.bf16.mxu1 %v14564_v56 }
 0x3d6   : > { %v3713_v13 = vpop.f32.mrb[6].mxu1 }
 0x3d7   : > { %v3714_v53 = vadd.f32 %v3713_v13, %v3602_v10  ;;  %v12422_v62 = vpop.f32.mrb[7].mxu1  ;;  %v5197_v10 = vand.u32 4294901760, %v15203_v54  ;;  %v5191_v13 = vsub.f32 %v15201_v52, %v5190_v40 }
 0x3d8   : > { %13857 = vmatpush3.bf16.msra.mxu1 %v15178_v33 }
 0x3d9   : > { %13858 = vmatprep.subr.bf16.mxu1 %v14564_v56  ;;  %v5192_v62 = vand.u32 4294901760, %v5191_v13 }
 0x3dc   : > { %13860 = vmatpush3.bf16.msra.mxu1 %v15194_v28 }
 0x3dd   : > { %13861 = vmatprep.subr.bf16.mxu1 %v14564_v56 }
 0x3e6   : > { %v3801_v63 = vpop.f32.mrb[8].mxu1 }
 0x3e7   : > { %v3802_v0 = vadd.f32 %v3801_v63, %v3714_v53  ;;  %v12441_v1 = vpop.f32.mrb[9].mxu1  ;;  %v5198_v53 = vsub.f32 %v15203_v54, %v5197_v10  ;;  %v5204_v63 = vand.u32 4294901760, %v15205_v48 }
 0x3e9   : > { %v5199_v1 = vand.u32 4294901760, %v5198_v53 }
 0x3eb   : > { %v13868_v5 = vpack.c.bf16 %v5199_v1, %v5192_v62 }
 0x3f6   : > { %v3882_v2 = vpop.f32.mrb[10].mxu1 }
 0x3f7   : > { %v3883_v3 = vadd.f32 %v3882_v2, %v3802_v0  ;;  %v12460_v4 = vpop.f32.mrb[11].mxu1  ;;  %v5211_v0 = vand.u32 4294901760, %v15207_v50  ;;  %v5205_v2 = vsub.f32 %v15205_v48, %v5204_v63 }
 0x3f9   : > { %v5206_v8 = vand.u32 4294901760, %v5205_v2  ;;  %v13907_v37 = vpack.c.bf16 %v5211_v0, %v5204_v63 }
 0x406   : > { %v3977_v14 = vpop.f32.mrb[12].mxu1 }
 0x407   : > { %v3978_v15 = vadd.f32 %v3977_v14, %v3883_v3  ;;  %v12479_v17 = vpop.f32.mrb[13].mxu1  ;;  %v5212_v3 = vsub.f32 %v15207_v50, %v5211_v0 }
 0x408   : > { %v13874_v17 = vpack.c.bf16 %v15158_v12, %v15156_v11 }
 0x409   : > { %v5213_v14 = vand.u32 4294901760, %v5212_v3 }
 0x416   : > { %v4056_v18 = vpop.f32.mrb[14].mxu1 }
 0x417   : > { %v4057_v19 = vadd.f32 %v4056_v18, %v3978_v15  ;;  %v12498_v20 = vpop.f32.mrb[15].mxu1  ;;  %v13871_v15 = vpack.c.bf16 %v5213_v14, %v5206_v8  ;;  %v13877_v18 = vpack.c.bf16 %v15192_v44, %v15190_v43 }
 0x426   : > { %v4142_v34 = vpop.f32.mrb[16].mxu1 }
 0x427   : > { %v4143_v38 = vadd.f32 %v4142_v34, %v4057_v19  ;;  %v12517_v39 = vpop.f32.mrb[17].mxu1  ;;  %v13880_v19 = vpack.c.bf16 %v15203_v54, %v15201_v52  ;;  %v13904_v34 = vpack.c.bf16 %v5197_v10, %v5190_v40  ;;  %v11419_v10 = vld [vmem:[%s16256_s4] ss:$0 sm:$0xff] }
 0x436   : > { %v4253_v4 = vpop.f32.mrb[18].mxu1 }
 0x437   : > { %v4254_v6 = vadd.f32 %v4253_v4, %v4143_v38  ;;  %v12536_v7 = vpop.f32.mrb[19].mxu1 }
 0x446   : > { %v4341_v20 = vpop.f32.mrb[20].mxu1 }
 0x447   : > { %v4342_v21 = vadd.f32 %v4341_v20, %v4254_v6  ;;  %v12555_v22 = vpop.f32.mrb[21].mxu1 }
 0x456   : > { %v4422_v24 = vpop.f32.mrb[22].mxu1 }
 0x457   : > { %v4423_v26 = vadd.f32 %v4422_v24, %v4342_v21  ;;  %v12574_v27 = vpop.f32.mrb[23].mxu1 }
 0x466   : > { %v4517_v36 = vpop.f32.mrb[24].mxu1 }
 0x467   : > { %v4518_v11 = vadd.f32 %v4517_v36, %v4423_v26  ;;  %v12593_v12 = vpop.f32.mrb[25].mxu1 }
 0x476   : > { %v4596_v38 = vpop.f32.mrb[26].mxu1 }
 0x477   : > { %v15228_v39 = vadd.f32 %v4596_v38, %v4518_v11  ;;  %v12612_v29 = vpop.f32.mrb[27].mxu1 }
 0x4a2   : > { %v5060_v30 = vpop.f32.mrb[28].mxu1 }
 0x4a3   : > { %v5074_v43 = vsel %vm3519_vm2, %v5060_v30, 0  ;;  %v12654_v44 = vpop.f32.mrb[29].mxu1 }
 0x4a4   : > { %v5149_v45 = vand.u32 4294901760, %v5074_v43 }
 0x4a6   : > { %v5150_v35 = vsub.f32 %v5074_v43, %v5149_v45 }
 0x4a8   : > { %v5151_v46 = vand.u32 4294901760, %v5150_v35 }
 0x4aa   : > { %v5152_v52 = vsub.f32 %v5150_v35, %v5151_v46 }
 0x4ac   : > { %v5153_v54 = vand.u32 4294901760, %v5152_v52 }
 0x4ae   : > { %12672 = vmatmul.mubr.f32.vlgmr.msra.gmra.mrb[30].mxu1 %v5153_v54  ;;  %v5684_v54 = vld [vmem:[%s16259_s7] sm:$0x1f] }
 0x4af   : > { %13863 = vmatpush3.bf16.msra.mxu1 %v13862_v59  ;;  %12690 = vmatprep.mubr.msk.f32.mxu1 %vm14565_vm1, %v14566_v57 }
 0x4b0   : > { %13864 = vmatprep.subr.bf16.mxu1 %v14564_v56 }
 0x4b3   : > { %13866 = vmatpush3.bf16.msra.mxu1 %v13865_v16 }
 0x4b4   : > { %13867 = vmatprep.subr.bf16.mxu1 %v14564_v56 }
 0x4b7   : > { %13869 = vmatpush3.bf16.msra.mxu1 %v13868_v5 }
 0x4b8   : > { %13870 = vmatprep.subr.bf16.mxu1 %v14564_v56 }
 0x4bb   : > { %13872 = vmatpush3.bf16.msra.mxu1 %v13871_v15 }
 0x4bc   : > { %13873 = vmatprep.subr.bf16.mxu1 %v14564_v56 }
 0x4be   : > { %12691 = vmatmul.mubr.f32.vlgmr.msra.gmra.mrb[32].mxu1 %v5149_v45 }
 0x4bf   : > { %13875 = vmatpush3.bf16.msra.mxu1 %v13874_v17  ;;  %12709 = vmatprep.mubr.msk.f32.mxu1 %vm14565_vm1, %v14566_v57 }
 0x4c0   : > { %13876 = vmatprep.subr.bf16.mxu1 %v14564_v56 }
 0x4c3   : > { %13878 = vmatpush3.bf16.msra.mxu1 %v13877_v18 }
 0x4c4   : > { %13879 = vmatprep.subr.bf16.mxu1 %v14564_v56 }
 0x4c7   : > { %13881 = vmatpush3.bf16.msra.mxu1 %v13880_v19 }
 0x4c8   : > { %13882 = vmatprep.subr.bf16.mxu1 %v14564_v56 }
 0x4cb   : > { %13884 = vmatpush3.bf16.msra.mxu1 %v13883_v23 }
 0x4cc   : > { %13885 = vmatprep.subr.bf16.mxu1 %v14564_v56 }
 0x4ce   : > { %12710 = vmatmul.mubr.f32.vlgmr.msra.gmra.mrb[34].mxu1 %v5150_v35 }
 0x4cf   : > { %13887 = vmatpush3.bf16.msra.mxu1 %v15154_v9  ;;  %12728 = vmatprep.mubr.msk.f32.mxu1 %vm14565_vm1, %v14566_v57 }
 0x4d0   : > { %13888 = vmatprep.subr.bf16.mxu1 %v14564_v56 }
 0x4d3   : > { %13890 = vmatpush3.bf16.msra.mxu1 %v15168_v25 }
 0x4d4   : > { %13891 = vmatprep.subr.bf16.mxu1 %v14564_v56 }
 0x4d7   : > { %13893 = vmatpush3.bf16.msra.mxu1 %v15178_v33 }
 0x4d8   : > { %13894 = vmatprep.subr.bf16.mxu1 %v14564_v56 }
 0x4db   : > { %13896 = vmatpush3.bf16.msra.mxu1 %v15194_v28 }
 0x4dc   : > { %13897 = vmatprep.subr.bf16.mxu1 %v14564_v56 }
 0x4de   : > { %12729 = vmatmul.mubr.f32.vlgmr.msra.gmra.mrb[36].mxu1 %v5151_v46 }
 0x4df   : > { %13899 = vmatpush3.bf16.msra.mxu1 %v13898_v31  ;;  %12747 = vmatprep.mubr.msk.f32.mxu1 %vm14565_vm1, %v14566_v57  ;;  %v5622_v31 = vld [vmem:[%s16257_s5] sm:$0x7f] }
 0x4e0   : > { %13900 = vmatprep.subr.bf16.mxu1 %v14564_v56 }
 0x4e3   : > { %13902 = vmatpush3.bf16.msra.mxu1 %v13901_v32 }
 0x4e4   : > { %13903 = vmatprep.subr.bf16.mxu1 %v14564_v56 }
 0x4e7   : > { %13905 = vmatpush3.bf16.msra.mxu1 %v13904_v34  ;;  %v5623_v34 = vld [vmem:[%s16258_s6] sm:$0x7f] }
 0x4e8   : > { %13906 = vmatprep.subr.bf16.mxu1 %v14564_v56 }
 0x4eb   : > { %13908 = vmatpush3.bf16.msra.mxu1 %v13907_v37 }
 0x4ec   : > { %13909 = vmatprep.subr.bf16.mxu1 %v14564_v56 }
 0x4ee   : > { %12748 = vmatmul.mubr.f32.vlgmr.msra.gmra.mrb[38].mxu1 %v5149_v45 }
 0x4ef   : > { %13911 = vmatpush3.bf16.msra.mxu1 %v15154_v9  ;;  %12766 = vmatprep.mubr.msk.f32.mxu1 %vm14565_vm1, %v14566_v57 }
 0x4f0   : > { %13912 = vmatprep.subr.bf16.mxu1 %v14564_v56 }
 0x4f3   : > { %13914 = vmatpush3.bf16.msra.mxu1 %v15168_v25 }
 0x4f4   : > { %13915 = vmatprep.subr.bf16.mxu1 %v14564_v56 }
 0x4f7   : > { %13917 = vmatpush3.bf16.msra.mxu1 %v15178_v33 }
 0x4f8   : > { %13918 = vmatprep.subr.bf16.mxu1 %v14564_v56 }
 0x4fb   : > { %13920 = vmatpush3.bf16.msra.mxu1 %v15194_v28 }
 0x4fc   : > { %12799 = vmatprep.subr.mxu1 %v14566_v57 }
 0x4fe   : > { %12767 = vmatmul.mubr.f32.vlgmr.msra.gmra.mrb[40].mxu1 %v5149_v45 }
 0x4ff   : > { %12801 = vmatprep.mubr.msk.f32.mxu1 %vm14565_vm1, %v14566_v57 }
 0x581   : > { %v5155_v9 = vpop.f32.mrb[30].mxu1 }
 0x582   : > { %v12673_v41 = vpop.f32.mrb[31].mxu1 }
 0x591   : > { %v5266_v42 = vpop.f32.mrb[32].mxu1 }
 0x592   : > { %v5267_v47 = vadd.f32 %v5266_v42, %v5155_v9  ;;  %v12692_v51 = vpop.f32.mrb[33].mxu1  ;;  %v11420_v9 = vld [vmem:[%s16259_s7 + $0x8] sm:$0x1f] }
 0x593   : > { %v6149_v51 = vsel %vm5685_vm4, %v11420_v9, 0 }
 0x5a1   : > { %v5354_v25 = vpop.f32.mrb[34].mxu1 }
 0x5a2   : > { %v5355_v48 = vadd.f32 %v5354_v25, %v5267_v47  ;;  %v12711_v50 = vpop.f32.mrb[35].mxu1  ;;  %v5687_v47 = vsel %vm5685_vm4, %v5684_v54, 0 }
 0x5a3   : > { %v15293_v50 = vand.u32 4294901760, %v6149_v51 }
 0x5b1   : > { %v5435_v55 = vpop.f32.mrb[36].mxu1 }
 0x5b2   : > { %v5436_v33 = vadd.f32 %v5435_v55, %v5355_v48  ;;  %v12730_v58 = vpop.f32.mrb[37].mxu1  ;;  %v15291_v48 = vand.u32 4294901760, %v5687_v47 }
 0x5c1   : > { %v5530_v49 = vpop.f32.mrb[38].mxu1 }
 0x5c2   : > { %v5531_v59 = vadd.f32 %v5530_v49, %v5436_v33  ;;  %v12749_v28 = vpop.f32.mrb[39].mxu1  ;;  %v5760_v49 = vsub.f32 %v5687_v47, %v15291_v48 }
 0x5d1   : > { %v5609_v60 = vpop.f32.mrb[40].mxu1 }
 0x5d2   : > { %v5610_v61 = vadd.f32 %v5609_v60, %v5531_v59  ;;  %v12768_v40 = vpop.f32.mrb[41].mxu1  ;;  %v6218_v59 = vsub.f32 %v6149_v51, %v15293_v50 }
 0x5d4   : > { %v5613_v16 = vadd.f32 %v5610_v61, %v15228_v39  ;;  %v5761_v61 = vand.u32 4294901760, %v5760_v49  ;;  %v6219_v40 = vand.u32 4294901760, %v6218_v59 }
 0x5d6   : > { %v5621_v13 = vadd.f32 %v11419_v10, %v5613_v16 }
 0x5d8   : > { %v5625_v53 = vsel %vm5624_vm3, %v5621_v13, 0.0 }
 0x5d9   : > { %5626 = vadd.xlane.f32.xlu0 %v5625_v53 }
 0x666   : > { %v5627_v62 = vpop.xlane.xlu0 %5626 }
 0x667   : > { %v5628_v63 = vrot.slane %v5627_v62, 4 }
 0x669   : > { %v5629_v0 = vadd.f32 %v5628_v63, %v5627_v62  ;;  %v5762_v62 = vsub.f32 %v5760_v49, %v5761_v61  ;;  %v6220_v63 = vsub.f32 %v6218_v59, %v6219_v40 }
 0x66b   : > { %v5630_v1 = vrot.slane %v5629_v0, 2 }
 0x66d   : > { %v5631_v2 = vadd.f32 %v5630_v1, %v5629_v0 }
 0x66f   : > { %v5632_v3 = vrot.slane %v5631_v2, 1 }
 0x671   : > { %v5633_v4 = vadd.f32 %v5632_v3, %v5631_v2  ;;  %v5763_v2 = vand.u32 4294901760, %v5762_v62  ;;  %v6221_v3 = vand.u32 4294901760, %v6220_v63 }
 0x673   : > { %14428 = vpush %v5633_v4 }
 0x6a4   : > { %s14429_s23 = spop %14428 }
 0x6a5   : > { %v5635_v5 = vstv %s14429_s23 }
 0x6a6   : > { %v5637_v6 = vmul.f32 0.0025510204, %v5635_v5 }
 0x6a8   : > { %v5638_v7 = vsub.f32 %v5621_v13, %v5637_v6 }
 0x6aa   : > { %v5639_v8 = vmul.f32 %v5638_v7, %v5638_v7 }
 0x6ac   : > { %v5640_v14 = vsel %vm5624_vm3, %v5639_v8, 0.0 }
 0x6ad   : > { %5641 = vadd.xlane.f32.xlu0 %v5640_v14  ;;  %v11421_v14 = vld [vmem:[%s16260_s8 + $0x38] sm:$0xff] }
 0x73a   : > { %v5642_v15 = vpop.xlane.xlu0 %5641 }
 0x73b   : > { %v5643_v17 = vrot.slane %v5642_v15, 4 }
 0x73d   : > { %v5644_v18 = vadd.f32 %v5643_v17, %v5642_v15  ;;  %v11422_v15 = vld [vmem:[%s16260_s8 + $0x40] sm:$0xff]  ;;  %v6610_v17 = vand.u32 4294901760, %v11421_v14 }
 0x73f   : > { %v5645_v19 = vrot.slane %v5644_v18, 2 }
 0x741   : > { %v5646_v20 = vadd.f32 %v5645_v19, %v5644_v18  ;;  %v6613_v18 = vand.u32 4294901760, %v11422_v15  ;;  %v11423_v19 = vld [vmem:[%s16260_s8 + $0x48] sm:$0xff] }
 0x743   : > { %v5647_v21 = vrot.slane %v5646_v20, 1 }
 0x745   : > { %v5648_v22 = vadd.f32 %v5647_v21, %v5646_v20  ;;  %v11424_v20 = vld [vmem:[%s16260_s8 + $0x50] sm:$0xff]  ;;  %v15362_v21 = vsub.f32 %v11421_v14, %v6610_v17 }
 0x747   : > { %14430 = vpush %v5648_v22  ;;  %v15364_v22 = vsub.f32 %v11422_v15, %v6613_v18 }
 0x778   : > { %s14431_s18 = spop %14430 }
 0x779   : > { %v5650_v23 = vstv %s14431_s18  ;;  %s11457_s18 = sshll.u32 %s14674_s25, 4  ;;  %s14567_s25 = smov [#allocation2]  }
 0x77a   : > { %v5651_v24 = vmul.f32 0.0025510204, %v5650_v23  ;;  %v6616_v23 = vand.u32 4294901760, %v11423_v19  ;;  %s16209_s28 = scalar_lea.hbm %s16268_s16, %s11457_s18  ;;  %s14504_s2 = sshll.u32 %s14567_s25, 4  ;;  %s14505_s2 = int_to_ptr.vmem [resolvable:$false] %s14504_s2 }
 0x77b   : > { %s14506_s3 = scalar_lea.vmem %s14505_s2, 32 }
 0x77c   : > { %v5652_v26 = vadd.f32 1e-05, %v5651_v24  ;;  %v6619_v24 = vand.u32 4294901760, %v11424_v20 }
 0x77e   : > { %14482 = vrsqrt.f32 %v5652_v26  ;;  %v13940_v26 = vpack.c.bf16 %v15364_v22, %v15362_v21 }
 0x788   : > { %v14483_v27 = vpop.eup %14482 }
 0x789   : > { %v5654_v32 = vmul.f32 %v14483_v27, %v5638_v7  ;;  %v15375_v27 = vsub.f32 %v11423_v19, %v6616_v23 }
 0x78b   : > { %v5655_v36 = vmul.f32 %v5654_v32, %v5622_v31  ;;  %v15377_v31 = vsub.f32 %v11424_v20, %v6619_v24  ;;  %v15379_v32 = vpack.c.bf16 %v6613_v18, %v6610_v17  ;;  %v6139_v17 = vld [vmem:[%s16260_s8] sm:$0xff]  ;;  %v6140_v18 = vld [vmem:[%s16260_s8 + $0x8] sm:$0xff] }
 0x78d   : > { %v5656_v11 = vadd.f32 %v5655_v36, %v5623_v34  ;;  %v13943_v34 = vpack.c.bf16 %v15377_v31, %v15375_v27  ;;  %v11425_v36 = vld [vmem:[%s16260_s8 + $0x58] sm:$0xff] }
 0x78f   : > { %v5658_v12 = vmul.f32 0.70710677, %v5656_v11  ;;  %v5657_v13 = vmul.f32 0.5, %v5656_v11  ;;  %v11426_v11 = vld [vmem:[%s16260_s8 + $0x60] sm:$0xff] }
 0x791   : > { %v5659_v37 = vand.u32 2147483647, %v5658_v12  ;;  %vm5679_vm5 = vcmp.ge.f32.partialorder %v5658_v12, 0.0  ;;  %v6622_v12 = vand.u32 4294901760, %v11425_v36 }
 0x793   : > { %v5660_v38 = vmul.f32 0.3275911, %v5659_v37  ;;  %v5673_v29 = vsub.f32 0.0, %v5659_v37 }
 0x795   : > { %v5661_v39 = vadd.f32 1.0, %v5660_v38  ;;  %v5674_v43 = vmul.f32 %v5673_v29, %v5659_v37  ;;  %v6625_v37 = vand.u32 4294901760, %v11426_v11  ;;  %v6721_v38 = vsub.f32 %v11425_v36, %v6622_v12 }
 0x797   : > { %14484 = vrcp.f32 %v5661_v39  ;;  %v5675_v35 = vmul.f32 1.442695, %v5674_v43  ;;  %v6728_v39 = vsub.f32 %v11426_v11, %v6625_v37  ;;  %v15402_v43 = vpack.c.bf16 %v6619_v24, %v6616_v23  ;;  %v6141_v23 = vld [vmem:[%s16260_s8 + $0x10] sm:$0xff]  ;;  %v6142_v24 = vld [vmem:[%s16260_s8 + $0x18] sm:$0xff] }
 0x798   : > { %v7143_v36 = vand.u32 4294901760, %v6141_v23  ;;  %v7146_v11 = vand.u32 4294901760, %v6142_v24 }
 0x799   : > { %14486 = vpow2.f32 %v5675_v35  ;;  %v13946_v29 = vpack.c.bf16 %v6728_v39, %v6721_v38  ;;  %v15413_v35 = vpack.c.bf16 %v6625_v37, %v6622_v12  ;;  %v6143_v12 = vld [vmem:[%s16260_s8 + $0x20] sm:$0xff]  ;;  %v6144_v37 = vld [vmem:[%s16260_s8 + $0x28] sm:$0xff] }
 0x7a1   : > { %v14485_v30 = vpop.eup %14484 }
 0x7a2   : > { %v5664_v44 = vmul.f32 1.0614054, %v14485_v30 }
 0x7a3   : > { %v14487_v58 = vpop.eup %14486 }
 0x7a4   : > { %v5665_v45 = vadd.f32 -1.4531521, %v5664_v44 }
 0x7a6   : > { %v5666_v46 = vmul.f32 %v14485_v30, %v5665_v45 }
 0x7a8   : > { %v5667_v52 = vadd.f32 1.4214138, %v5666_v46  ;;  %v6722_v46 = vand.u32 4294901760, %v6721_v38 }
 0x7aa   : > { %v5668_v41 = vmul.f32 %v14485_v30, %v5667_v52  ;;  %v6729_v52 = vand.u32 4294901760, %v6728_v39  ;;  %v6723_v9 = vsub.f32 %v6721_v38, %v6722_v46 }
 0x7ac   : > { %v5669_v42 = vadd.f32 -0.28449672, %v5668_v41  ;;  %v13964_v54 = vpack.c.bf16 %v6729_v52, %v6722_v46  ;;  %v6730_v41 = vsub.f32 %v6728_v39, %v6729_v52 }
 0x7ae   : > { %v5670_v25 = vmul.f32 %v14485_v30, %v5669_v42  ;;  %v6724_v42 = vand.u32 4294901760, %v6723_v9  ;;  %v6731_v47 = vand.u32 4294901760, %v6730_v41 }
 0x7b0   : > { %v5671_v55 = vadd.f32 0.2548296, %v5670_v25  ;;  %v13937_v51 = vpack.c.bf16 %v6731_v47, %v6724_v42 }
 0x7b2   : > { %v5672_v33 = vmul.f32 %v14485_v30, %v5671_v55  ;;  %v11427_v30 = vld [vmem:[%s16260_s8 + $0x68] sm:$0xff] }
 0x7b3   : > { %v15404_v44 = vand.u32 4294901760, %v11427_v30 }
 0x7b4   : > { %v5677_v28 = vmul.f32 %v14487_v58, %v5672_v33 }
 0x7b5   : > { %v15409_v45 = vsub.f32 %v11427_v30, %v15404_v44  ;;  %v7149_v30 = vand.u32 4294901760, %v6143_v12 }
 0x7b6   : > { %v5678_v60 = vsub.f32 1.0, %v5677_v28 }
 0x7b8   : > { %v5680_v10 = vsub.f32 0.0, %v5678_v60 }
 0x7ba   : > { %v5681_v16 = vsel %vm5679_vm5, %v5678_v60, %v5680_v10  ;;  %v6715_v10 = vand.u32 4294901760, %v15377_v31 }
 0x7bb   : > { %v5682_v53 = vadd.f32 1.0, %v5681_v16 }
 0x7bc   : > { %v6716_v63 = vsub.f32 %v15377_v31, %v6715_v10 }
 0x7bd   : > { %v5683_v0 = vmul.f32 %v5682_v53, %v5657_v13 }
 0x7be   : > { %v6717_v14 = vand.u32 4294901760, %v6716_v63 }
 0x7bf   : > { %v5691_v1 = vsel %vm5689_vm6, %v5683_v0, 0 }
 0x7c0   : > { %v15297_v4 = vand.u32 4294901760, %v5691_v1 }
 0x7c2   : > { %12770 = vmatpush3.msra.mxu0 %v15297_v4  ;;  %12800 = vmatpush3.msra.mxu1 %v15297_v4  ;;  %v15302_v5 = vsub.f32 %v5691_v1, %v15297_v4 }
 0x7c3   : > { %12772 = vmatmul.mubr.f32.vlgmr.msra.gmra.mrb[2].mxu0 %v5763_v2  ;;  %12802 = vmatmul.mubr.f32.vlgmr.msra.gmra.mrb[42].mxu1 %v6221_v3 }
 0x7c4   : > { %12774 = vmatprep.subr.mxu0 %v14566_v57  ;;  %12804 = vmatprep.subr.mxu1 %v14566_v57  ;;  %v15307_v6 = vand.u32 4294901760, %v15302_v5 }
 0x7c5   : > { %12776 = vmatprep.mubr.msk.f32.mxu0 %vm14565_vm1, %v14566_v57  ;;  %12806 = vmatprep.mubr.msk.f32.mxu1 %vm14565_vm1, %v14566_v57 }
 0x7c6   : > { %v5773_v7 = vsub.f32 %v15302_v5, %v15307_v6 }
 0x7c8   : > { %v15315_v8 = vand.u32 4294901760, %v5773_v7 }
 0x7ca   : > { %12775 = vmatpush3.msra.mxu0 %v15315_v8  ;;  %12805 = vmatpush3.msra.mxu1 %v15315_v8 }
 0x7cb   : > { %12777 = vmatmul.mubr.f32.vlgmr.msra.gmra.mrb[2].mxu0 %v15291_v48  ;;  %12779 = vmatprep.subr.mxu0 %v14566_v57 }
 0x7cc   : > { %12807 = vmatmul.mubr.f32.vlgmr.msra.gmra.mrb[42].mxu1 %v15293_v50  ;;  %12809 = vmatprep.subr.mxu1 %v14566_v57 }
 0x7cd   : > { %12780 = vmatpush3.msra.mxu0 %v15302_v5  ;;  %12810 = vmatpush3.msra.mxu1 %v15302_v5 }
 0x7ce   : > { %12781 = vmatprep.mubr.msk.f32.mxu0 %vm14565_vm1, %v14566_v57  ;;  %12784 = vmatprep.subr.mxu0 %v14566_v57 }
 0x7cf   : > { %12811 = vmatprep.mubr.msk.f32.mxu1 %vm14565_vm1, %v14566_v57  ;;  %12814 = vmatprep.subr.mxu1 %v14566_v57 }
 0x7d3   : > { %12782 = vmatmul.mubr.f32.vlgmr.msra.gmra.mrb[2].mxu0 %v5760_v49 }
 0x7d4   : > { %12785 = vmatpush3.msra.mxu0 %v15297_v4  ;;  %12812 = vmatmul.mubr.f32.vlgmr.msra.gmra.mrb[42].mxu1 %v6218_v59 }
 0x7d5   : > { %12815 = vmatpush3.msra.mxu1 %v15297_v4  ;;  %12786 = vmatprep.mubr.msk.f32.mxu0 %vm14565_vm1, %v14566_v57 }
 0x7d6   : > { %12789 = vmatprep.subr.mxu0 %v14566_v57  ;;  %12816 = vmatprep.mubr.msk.f32.mxu1 %vm14565_vm1, %v14566_v57 }
 0x7d7   : > { %12819 = vmatprep.subr.mxu1 %v14566_v57 }
 0x7db   : > { %12787 = vmatmul.mubr.f32.vlgmr.msra.gmra.mrb[2].mxu0 %v5761_v61 }
 0x7dc   : > { %12790 = vmatpush3.msra.mxu0 %v15307_v6  ;;  %12817 = vmatmul.mubr.f32.vlgmr.msra.gmra.mrb[42].mxu1 %v6219_v40  ;;  %v6708_v40 = vand.u32 4294901760, %v15375_v27 }
 0x7dd   : > { %12820 = vmatpush3.msra.mxu1 %v15307_v6  ;;  %12791 = vmatprep.mubr.msk.f32.mxu0 %vm14565_vm1, %v14566_v57 }
 0x7de   : > { %12794 = vmatprep.subr.mxu0 %v14566_v57  ;;  %12821 = vmatprep.mubr.msk.f32.mxu1 %vm14565_vm1, %v14566_v57  ;;  %v6709_v62 = vsub.f32 %v15375_v27, %v6708_v40  ;;  %v13961_v1 = vpack.c.bf16 %v6715_v10, %v6708_v40 }
 0x7df   : > { %12824 = vmatprep.subr.mxu1 %v14566_v57 }
 0x7e0   : > { %v6710_v7 = vand.u32 4294901760, %v6709_v62 }
 0x7e2   : > { %v13934_v20 = vpack.c.bf16 %v6717_v14, %v6710_v7 }
 0x7e3   : > { %12792 = vmatmul.mubr.f32.vlgmr.msra.gmra.mrb[2].mxu0 %v15291_v48 }
 0x7e4   : > { %12795 = vmatpush3.msra.mxu0 %v15297_v4  ;;  %12822 = vmatmul.mubr.f32.vlgmr.msra.gmra.mrb[42].mxu1 %v15293_v50 }
 0x7e5   : > { %12825 = vmatpush3.msra.mxu1 %v15297_v4  ;;  %12796 = vmatprep.mubr.msk.f32.mxu0 %vm14565_vm1, %v14566_v57 }
 0x7e6   : > { %12826 = vmatprep.mubr.msk.f32.mxu1 %vm14565_vm1, %v14566_v57  ;;  %13939 = vmatprep.subr.bf16.mxu0 %v14564_v56 }
 0x7e7   : > { %13921 = vmatprep.subr.bf16.mxu1 %v14564_v56 }
 0x7eb   : > { %12797 = vmatmul.mubr.f32.vlgmr.msra.gmra.mrb[2].mxu0 %v15291_v48  ;;  %v6694_v48 = vand.u32 4294901760, %v15362_v21 }
 0x7ec   : > { %12827 = vmatmul.mubr.f32.vlgmr.msra.gmra.mrb[42].mxu1 %v15293_v50  ;;  %13941 = vmatpush3.bf16.msra.mxu0 %v13940_v26  ;;  %v6701_v50 = vand.u32 4294901760, %v15364_v22  ;;  %v6736_v26 = vand.u32 4294901760, %v15409_v45 }
 0x7ed   : > { %13942 = vmatprep.subr.bf16.mxu0 %v14564_v56  ;;  %13923 = vmatpush3.bf16.msra.mxu1 %v15379_v32  ;;  %v6695_v59 = vsub.f32 %v15362_v21, %v6694_v48  ;;  %v7137_v21 = vand.u32 4294901760, %v6139_v17 }
 0x7ee   : > { %13924 = vmatprep.subr.bf16.mxu1 %v14564_v56  ;;  %12877 = vmatprep.mubr.msk.f32.mxu0 %vm14565_vm1, %v14566_v57  ;;  %v6702_v28 = vsub.f32 %v15364_v22, %v6701_v50  ;;  %v13958_v61 = vpack.c.bf16 %v6701_v50, %v6694_v48  ;;  %v7140_v22 = vand.u32 4294901760, %v6140_v18 }
 0x7ef   : > { %12843 = vmatprep.mubr.msk.f32.mxu1 %vm14565_vm1, %v14566_v57  ;;  %v6696_v13 = vand.u32 4294901760, %v6695_v59  ;;  %v7220_v9 = vsub.f32 %v6139_v17, %v7137_v21 }
 0x7f0   : > { %13944 = vmatpush3.bf16.msra.mxu0 %v13943_v34  ;;  %v6703_v53 = vand.u32 4294901760, %v6702_v28  ;;  %v15463_v31 = vpack.c.bf16 %v7140_v22, %v7137_v21  ;;  %v6737_v34 = vsub.f32 %v15409_v45, %v6736_v26  ;;  %v7227_v41 = vsub.f32 %v6140_v18, %v7140_v22 }
 0x7f1   : > { %13945 = vmatprep.subr.bf16.mxu0 %v14564_v56  ;;  %13926 = vmatpush3.bf16.msra.mxu1 %v15402_v43  ;;  %v7221_v59 = vand.u32 4294901760, %v7220_v9 }
 0x7f2   : > { %13927 = vmatprep.subr.bf16.mxu1 %v14564_v56  ;;  %v13931_v3 = vpack.c.bf16 %v6703_v53, %v6696_v13  ;;  %v6738_v39 = vand.u32 4294901760, %v6737_v34  ;;  %v13994_v48 = vpack.c.bf16 %v7227_v41, %v7220_v9  ;;  %v7228_v28 = vand.u32 4294901760, %v7227_v41 }
 0x7f3   : > { %v7222_v40 = vsub.f32 %v7220_v9, %v7221_v59  ;;  %v11434_v9 = vld [vmem:[%s16260_s8 + $0x98] sm:$0xff] }
 0x7f4   : > { %13947 = vmatpush3.bf16.msra.mxu0 %v13946_v29  ;;  %v15479_v29 = vpack.c.bf16 %v7146_v11, %v7143_v36  ;;  %v7229_v10 = vsub.f32 %v7227_v41, %v7228_v28  ;;  %v14012_v53 = vpack.c.bf16 %v7228_v28, %v7221_v59 }
 0x7f5   : > { %12875 = vmatprep.subr.mxu0 %v14566_v57  ;;  %13929 = vmatpush3.bf16.msra.mxu1 %v15413_v35  ;;  %v7223_v63 = vand.u32 4294901760, %v7222_v40 }
 0x7f6   : > { %12841 = vmatprep.subr.mxu1 %v14566_v57 }
 0x7f8   : > { %12876 = vmatpush3.msra.mxu0 %v15409_v45  ;;  %v7152_v45 = vand.u32 4294901760, %v6144_v37 }
 0x7f9   : > { %13957 = vmatprep.subr.bf16.mxu0 %v14564_v56  ;;  %12842 = vmatpush3.msra.mxu1 %v15404_v44 }
 0x7fa   : > { %13930 = vmatprep.subr.bf16.mxu1 %v14564_v56  ;;  %v15487_v52 = vpack.c.bf16 %v7152_v45, %v7149_v30 }
 0x8be   : > { %v6135_v25 = vpop.f32.mrb[2].mxu0 }
 0x8bf   : > { %v6593_v55 = vpop.f32.mrb[42].mxu1  ;;  %v12798_v33 = vpop.f32.mrb[3].mxu0  ;;  %v7134_v19 = vsel %vm6605_vm7, %v6135_v25, 0  ;;  %v7241_v25 = vsub.f32 %v6142_v24, %v7146_v11 }
 0x8c0   : > { %v6607_v58 = vsel %vm6605_vm7, %v6593_v55, 0  ;;  %v12828_v49 = vpop.f32.mrb[43].mxu1  ;;  %v15460_v27 = vand.u32 4294901760, %v7134_v19  ;;  %v7248_v55 = vsub.f32 %v6143_v12, %v7149_v30  ;;  %v7255_v33 = vsub.f32 %v6144_v37, %v7152_v45  ;;  %v11431_v37 = vld [vmem:[%s16260_s8 + $0x80] sm:$0xff] }
 0x8c1   : > { %v15425_v60 = vand.u32 4294901760, %v6607_v58  ;;  %v7242_v62 = vand.u32 4294901760, %v7241_v25  ;;  %v8129_v30 = vand.u32 4294901760, %v11431_v37 }
 0x8c2   : > { %v15474_v38 = vsub.f32 %v7134_v19, %v15460_v27  ;;  %v14000_v49 = vpack.c.bf16 %v7255_v33, %v7248_v55  ;;  %v7249_v7 = vand.u32 4294901760, %v7248_v55  ;;  %v7256_v14 = vand.u32 4294901760, %v7255_v33 }
 0x8c3   : > { %v15430_v16 = vsub.f32 %v6607_v58, %v15425_v60 }
 0x8c4   : > { %v7210_v46 = vand.u32 4294901760, %v15474_v38  ;;  %v7257_v21 = vsub.f32 %v7255_v33, %v7256_v14 }
 0x8c5   : > { %v6683_v0 = vand.u32 4294901760, %v15430_v16  ;;  %12878 = vmatmul.mubr.f32.vlgmr.msra.gmra.mrb[4].mxu0 %v15430_v16 }
 0x8c6   : > { %13959 = vmatpush3.bf16.msra.mxu0 %v13958_v61  ;;  %12911 = vmatprep.mubr.msk.f32.mxu0 %vm14565_vm1, %v14566_v57  ;;  %v7211_v42 = vsub.f32 %v15474_v38, %v7210_v46  ;;  %v11428_v61 = vld [vmem:[%s16259_s7 + $0x10] sm:$0x1f] }
 0x8c7   : > { %v6684_v2 = vsub.f32 %v15430_v16, %v6683_v0  ;;  %13960 = vmatprep.subr.bf16.mxu0 %v14564_v56  ;;  %v7663_v13 = vsel %vm5685_vm4, %v11428_v61, 0 }
 0x8c8   : > { %v7212_v50 = vand.u32 4294901760, %v7211_v42 }
 0x8c9   : > { %v6685_v15 = vand.u32 4294901760, %v6684_v2 }
 0x8ca   : > { %13962 = vmatpush3.bf16.msra.mxu0 %v13961_v1  ;;  %v15532_v1 = vand.u32 4294901760, %v7663_v13 }
 0x8cb   : > { %12844 = vmatmul.mubr.f32.vlgmr.msra.gmra.mrb[44].mxu1 %v6685_v15  ;;  %13963 = vmatprep.subr.bf16.mxu0 %v14564_v56 }
 0x8cc   : > { %13932 = vmatpush3.bf16.msra.mxu1 %v13931_v3  ;;  %12860 = vmatprep.mubr.msk.f32.mxu1 %vm14565_vm1, %v14566_v57  ;;  %v7243_v3 = vsub.f32 %v7241_v25, %v7242_v62  ;;  %v15540_v17 = vsub.f32 %v7663_v13, %v15532_v1 }
 0x8cd   : > { %13933 = vmatprep.subr.bf16.mxu1 %v14564_v56 }
 0x8ce   : > { %13965 = vmatpush3.bf16.msra.mxu0 %v13964_v54  ;;  %v6145_v54 = vld [vmem:[%s16260_s8 + $0x30] sm:$0xff]  ;;  %v7244_v19 = vand.u32 4294901760, %v7243_v3  ;;  %v7733_v22 = vand.u32 4294901760, %v15540_v17 }
 0x8cf   : > { %12909 = vmatprep.subr.mxu0 %v14566_v57  ;;  %v15503_v47 = vand.u32 4294901760, %v6145_v54 }
 0x8d0   : > { %13935 = vmatpush3.bf16.msra.mxu1 %v13934_v20  ;;  %v7250_v20 = vsub.f32 %v7248_v55, %v7249_v7 }
 0x8d1   : > { %13936 = vmatprep.subr.bf16.mxu1 %v14564_v56  ;;  %v7262_v16 = vsub.f32 %v6145_v54, %v15503_v47  ;;  %v11433_v54 = vld [vmem:[%s16260_s8 + $0x90] sm:$0xff] }
 0x8d2   : > { %12910 = vmatpush3.msra.mxu0 %v6736_v26  ;;  %v7251_v24 = vand.u32 4294901760, %v7250_v20  ;;  %v7258_v26 = vand.u32 4294901760, %v7257_v21  ;;  %v8135_v42 = vand.u32 4294901760, %v11433_v54 }
 0x8d3   : > { %12912 = vmatmul.mubr.f32.vlgmr.msra.gmra.mrb[6].mxu0 %v15425_v60  ;;  %13975 = vmatprep.subr.bf16.mxu0 %v14564_v56 }
 0x8d4   : > { %13938 = vmatpush3.bf16.msra.mxu1 %v13937_v51  ;;  %13977 = vmatpush3.bf16.msra.mxu0 %v15463_v31  ;;  %v7234_v51 = vsub.f32 %v6141_v23, %v7143_v36  ;;  %v13991_v34 = vpack.c.bf16 %v7258_v26, %v7251_v24 }
 0x8d5   : > { %12858 = vmatprep.subr.mxu1 %v14566_v57  ;;  %13978 = vmatprep.subr.bf16.mxu0 %v14564_v56 }
 0x8d6   : > { %12945 = vmatprep.mubr.msk.f32.mxu0 %vm14565_vm1, %v14566_v57  ;;  %v13997_v58 = vpack.c.bf16 %v7241_v25, %v7234_v51 }
 0x8d8   : > { %12859 = vmatpush3.msra.mxu1 %v6738_v39  ;;  %13980 = vmatpush3.bf16.msra.mxu0 %v15479_v29 }
 0x8d9   : > { %12861 = vmatmul.mubr.f32.vlgmr.msra.gmra.mrb[46].mxu1 %v15425_v60  ;;  %13948 = vmatprep.subr.bf16.mxu1 %v14564_v56 }
 0x8da   : > { %13950 = vmatpush3.bf16.msra.mxu1 %v15379_v32  ;;  %13981 = vmatprep.subr.bf16.mxu0 %v14564_v56 }
 0x8db   : > { %13951 = vmatprep.subr.bf16.mxu1 %v14564_v56  ;;  %12894 = vmatprep.mubr.msk.f32.mxu1 %vm14565_vm1, %v14566_v57 }
 0x8dc   : > { %13983 = vmatpush3.bf16.msra.mxu0 %v15487_v52 }
 0x8dd   : > { %12943 = vmatprep.subr.mxu0 %v14566_v57 }
 0x8de   : > { %13953 = vmatpush3.bf16.msra.mxu1 %v15402_v43 }
 0x8df   : > { %13954 = vmatprep.subr.bf16.mxu1 %v14564_v56 }
 0x8e0   : > { %12944 = vmatpush3.msra.mxu0 %v15503_v47 }
 0x8e1   : > { %12946 = vmatmul.mubr.f32.vlgmr.msra.gmra.mrb[8].mxu0 %v7212_v50  ;;  %13993 = vmatprep.subr.bf16.mxu0 %v14564_v56  ;;  %v11435_v50 = vld [vmem:[%s16260_s8 + $0xa0] sm:$0xff] }
 0x8e2   : > { %13956 = vmatpush3.bf16.msra.mxu1 %v15413_v35  ;;  %13995 = vmatpush3.bf16.msra.mxu0 %v13994_v48  ;;  %v15644_v33 = vand.u32 4294901760, %v11435_v50 }
 0x8e3   : > { %12892 = vmatprep.subr.mxu1 %v14566_v57  ;;  %13996 = vmatprep.subr.bf16.mxu0 %v14564_v56 }
 0x8e4   : > { %12979 = vmatprep.mubr.msk.f32.mxu0 %vm14565_vm1, %v14566_v57 }
 0x8e6   : > { %12893 = vmatpush3.msra.mxu1 %v15404_v44  ;;  %13998 = vmatpush3.bf16.msra.mxu0 %v13997_v58  ;;  %v15649_v58 = vsub.f32 %v11435_v50, %v15644_v33 }
 0x8e7   : > { %12895 = vmatmul.mubr.f32.vlgmr.msra.gmra.mrb[48].mxu1 %v6683_v0  ;;  %13966 = vmatprep.subr.bf16.mxu1 %v14564_v56  ;;  %v7230_v0 = vand.u32 4294901760, %v7229_v10 }
 0x8e8   : > { %13968 = vmatpush3.bf16.msra.mxu1 %v15379_v32  ;;  %13999 = vmatprep.subr.bf16.mxu0 %v14564_v56  ;;  %v7235_v32 = vand.u32 4294901760, %v7234_v51 }
 0x8e9   : > { %13969 = vmatprep.subr.bf16.mxu1 %v14564_v56  ;;  %12928 = vmatprep.mubr.msk.f32.mxu1 %vm14565_vm1, %v14566_v57  ;;  %v13985_v15 = vpack.c.bf16 %v7230_v0, %v7223_v63 }
 0x8ea   : > { %14001 = vmatpush3.bf16.msra.mxu0 %v14000_v49  ;;  %v7236_v2 = vsub.f32 %v7234_v51, %v7235_v32  ;;  %v8234_v51 = vsub.f32 %v11433_v54, %v8135_v42 }
 0x8eb   : > { %12977 = vmatprep.subr.mxu0 %v14566_v57 }
 0x8ec   : > { %13971 = vmatpush3.bf16.msra.mxu1 %v15402_v43  ;;  %v14015_v43 = vpack.c.bf16 %v7242_v62, %v7235_v32  ;;  %v7237_v18 = vand.u32 4294901760, %v7236_v2  ;;  %v8235_v0 = vand.u32 4294901760, %v8234_v51 }
 0x8ed   : > { %13972 = vmatprep.subr.bf16.mxu1 %v14564_v56 }
 0x8ee   : > { %12978 = vmatpush3.msra.mxu0 %v7262_v16  ;;  %v13988_v23 = vpack.c.bf16 %v7244_v19, %v7237_v18 }
 0x8ef   : > { %12980 = vmatmul.mubr.f32.vlgmr.msra.gmra.mrb[10].mxu0 %v15474_v38  ;;  %14011 = vmatprep.subr.bf16.mxu0 %v14564_v56  ;;  %v11432_v38 = vld [vmem:[%s16260_s8 + $0x88] sm:$0xff] }
 0x8f0   : > { %13974 = vmatpush3.bf16.msra.mxu1 %v15413_v35  ;;  %14013 = vmatpush3.bf16.msra.mxu0 %v14012_v53  ;;  %v14018_v35 = vpack.c.bf16 %v7256_v14, %v7249_v7  ;;  %v8132_v45 = vand.u32 4294901760, %v11432_v38 }
 0x8f1   : > { %12926 = vmatprep.subr.mxu1 %v14566_v57  ;;  %14014 = vmatprep.subr.bf16.mxu0 %v14564_v56 }
 0x8f2   : > { %13013 = vmatprep.mubr.msk.f32.mxu0 %vm14565_vm1, %v14566_v57  ;;  %v15642_v55 = vpack.c.bf16 %v8132_v45, %v8129_v30 }
 0x8f4   : > { %12927 = vmatpush3.msra.mxu1 %v15404_v44  ;;  %14016 = vmatpush3.bf16.msra.mxu0 %v14015_v43  ;;  %v7263_v44 = vand.u32 4294901760, %v7262_v16 }
 0x8f5   : > { %12929 = vmatmul.mubr.f32.vlgmr.msra.gmra.mrb[50].mxu1 %v15425_v60  ;;  %13984 = vmatprep.subr.bf16.mxu1 %v14564_v56  ;;  %v7734_v60 = vsub.f32 %v15540_v17, %v7733_v22 }
 0x8f6   : > { %13986 = vmatpush3.bf16.msra.mxu1 %v13985_v15  ;;  %14017 = vmatprep.subr.bf16.mxu0 %v14564_v56  ;;  %v7264_v36 = vsub.f32 %v7262_v16, %v7263_v44  ;;  %v8236_v15 = vsub.f32 %v8234_v51, %v8235_v0 }
 0x8f7   : > { %13987 = vmatprep.subr.bf16.mxu1 %v14564_v56  ;;  %12962 = vmatprep.mubr.msk.f32.mxu1 %vm14565_vm1, %v14566_v57  ;;  %v7735_v11 = vand.u32 4294901760, %v7734_v60 }
 0x8f8   : > { %14019 = vmatpush3.bf16.msra.mxu0 %v14018_v35  ;;  %v7265_v12 = vand.u32 4294901760, %v7264_v36  ;;  %v8237_v19 = vand.u32 4294901760, %v8236_v15 }
 0x8f9   : > { %13011 = vmatprep.subr.mxu0 %v14566_v57 }
 0x8fa   : > { %13989 = vmatpush3.bf16.msra.mxu1 %v13988_v23 }
 0x8fb   : > { %13990 = vmatprep.subr.bf16.mxu1 %v14564_v56 }
 0x8fc   : > { %13012 = vmatpush3.msra.mxu0 %v7263_v44 }
 0x8fd   : > { %13014 = vmatmul.mubr.f32.vlgmr.msra.gmra.mrb[12].mxu0 %v15460_v27  ;;  %13033 = vmatprep.subr.mxu0 %v14566_v57 }
 0x8fe   : > { %13992 = vmatpush3.bf16.msra.mxu1 %v13991_v34  ;;  %13034 = vmatpush3.msra.mxu0 %v15297_v4 }
 0x8ff   : > { %13035 = vmatprep.mubr.msk.f32.mxu0 %vm14565_vm1, %v14566_v57  ;;  %13038 = vmatprep.subr.mxu0 %v14566_v57 }
 0x900   : > { %12960 = vmatprep.subr.mxu1 %v14566_v57 }
 0x901   : > { %13036 = vmatmul.mubr.f32.vlgmr.msra.gmra.mrb[14].mxu0 %v7735_v11 }
 0x902   : > { %13039 = vmatpush3.msra.mxu0 %v15315_v8  ;;  %12961 = vmatpush3.msra.mxu1 %v7265_v12 }
 0x903   : > { %12963 = vmatmul.mubr.f32.vlgmr.msra.gmra.mrb[52].mxu1 %v15460_v27  ;;  %14002 = vmatprep.subr.bf16.mxu1 %v14564_v56 }
 0x904   : > { %14004 = vmatpush3.bf16.msra.mxu1 %v15463_v31  ;;  %13040 = vmatprep.mubr.msk.f32.mxu0 %vm14565_vm1, %v14566_v57 }
 0x905   : > { %14005 = vmatprep.subr.bf16.mxu1 %v14564_v56  ;;  %13043 = vmatprep.subr.mxu0 %v14566_v57 }
 0x906   : > { %12996 = vmatprep.mubr.msk.f32.mxu1 %vm14565_vm1, %v14566_v57 }
 0x908   : > { %14007 = vmatpush3.bf16.msra.mxu1 %v15479_v29 }
 0x909   : > { %13041 = vmatmul.mubr.f32.vlgmr.msra.gmra.mrb[14].mxu0 %v15532_v1  ;;  %14008 = vmatprep.subr.bf16.mxu1 %v14564_v56 }
 0x90a   : > { %13044 = vmatpush3.msra.mxu0 %v15302_v5  ;;  %13045 = vmatprep.mubr.msk.f32.mxu0 %vm14565_vm1, %v14566_v57  ;;  %v11429_v5 = vld [vmem:[%s16260_s8 + $0x70] sm:$0xff] }
 0x90b   : > { %13048 = vmatprep.subr.mxu0 %v14566_v57  ;;  %v8123_v8 = vand.u32 4294901760, %v11429_v5 }
 0x90c   : > { %14010 = vmatpush3.bf16.msra.mxu1 %v15487_v52 }
 0x90d   : > { %12994 = vmatprep.subr.mxu1 %v14566_v57 }
 0x910   : > { %12995 = vmatpush3.msra.mxu1 %v15503_v47 }
 0x911   : > { %12997 = vmatmul.mubr.f32.vlgmr.msra.gmra.mrb[54].mxu1 %v7210_v46  ;;  %14020 = vmatprep.subr.bf16.mxu1 %v14564_v56  ;;  %v8220_v46 = vsub.f32 %v11431_v37, %v8129_v30 }
 0x912   : > { %13046 = vmatmul.mubr.f32.vlgmr.msra.gmra.mrb[14].mxu0 %v15540_v17  ;;  %14022 = vmatpush3.bf16.msra.mxu1 %v15463_v31 }
 0x913   : > { %13049 = vmatpush3.msra.mxu0 %v15297_v4  ;;  %14023 = vmatprep.subr.bf16.mxu1 %v14564_v56  ;;  %v8221_v40 = vand.u32 4294901760, %v8220_v46 }
 0x914   : > { %13050 = vmatprep.mubr.msk.f32.mxu0 %vm14565_vm1, %v14566_v57  ;;  %13053 = vmatprep.subr.mxu0 %v14566_v57 }
 0x915   : > { %13030 = vmatprep.mubr.msk.f32.mxu1 %vm14565_vm1, %v14566_v57  ;;  %v8222_v2 = vsub.f32 %v8220_v46, %v8221_v40 }
 0x916   : > { %14025 = vmatpush3.bf16.msra.mxu1 %v15479_v29 }
 0x917   : > { %14026 = vmatprep.subr.bf16.mxu1 %v14564_v56  ;;  %v8223_v7 = vand.u32 4294901760, %v8222_v2 }
 0x91a   : > { %13051 = vmatmul.mubr.f32.vlgmr.msra.gmra.mrb[14].mxu0 %v7733_v22  ;;  %14028 = vmatpush3.bf16.msra.mxu1 %v15487_v52  ;;  %v8227_v52 = vsub.f32 %v11432_v38, %v8132_v45 }
 0x91b   : > { %13054 = vmatpush3.msra.mxu0 %v15307_v6  ;;  %13028 = vmatprep.subr.mxu1 %v14566_v57  ;;  %v11430_v6 = vld [vmem:[%s16260_s8 + $0x78] sm:$0xff] }
 0x91c   : > { %13055 = vmatprep.mubr.msk.f32.mxu0 %vm14565_vm1, %v14566_v57  ;;  %13058 = vmatprep.subr.mxu0 %v14566_v57  ;;  %v14051_v41 = vpack.c.bf16 %v8227_v52, %v8220_v46  ;;  %v8228_v10 = vand.u32 4294901760, %v8227_v52 }
 0x91e   : > { %13029 = vmatpush3.msra.mxu1 %v15503_v47  ;;  %v8138_v47 = vand.u32 4294901760, %v11434_v9  ;;  %v15660_v53 = vpack.c.bf16 %v8228_v10, %v8221_v40  ;;  %v8229_v3 = vsub.f32 %v8227_v52, %v8228_v10 }
 0x91f   : > { %13031 = vmatmul.mubr.f32.vlgmr.msra.gmra.mrb[56].mxu1 %v15460_v27  ;;  %14029 = vmatprep.subr.bf16.mxu1 %v14564_v56  ;;  %v8206_v27 = vsub.f32 %v11429_v5, %v8123_v8 }
 0x920   : > { %13077 = vmatprep.mubr.msk.f32.mxu1 %vm14565_vm1, %v14566_v57  ;;  %v8241_v25 = vsub.f32 %v11434_v9, %v8138_v47  ;;  %v15653_v28 = vpack.c.bf16 %v8138_v47, %v8135_v42  ;;  %v8230_v14 = vand.u32 4294901760, %v8229_v3 }
 0x921   : > { %v8207_v49 = vand.u32 4294901760, %v8206_v27 }
 0x922   : > { %13056 = vmatmul.mubr.f32.vlgmr.msra.gmra.mrb[14].mxu0 %v15532_v1  ;;  %v14054_v48 = vpack.c.bf16 %v8241_v25, %v8234_v51  ;;  %v14042_v18 = vpack.c.bf16 %v8230_v14, %v8223_v7 }
 0x923   : > { %13059 = vmatpush3.msra.mxu0 %v15297_v4  ;;  %13060 = vmatprep.mubr.msk.f32.mxu0 %vm14565_vm1, %v14566_v57  ;;  %v8126_v4 = vand.u32 4294901760, %v11430_v6  ;;  %v8208_v16 = vsub.f32 %v8206_v27, %v8207_v49 }
 0x924   : > { %14047 = vmatprep.subr.bf16.mxu0 %v14564_v56 }
 0x925   : > { %v8213_v31 = vsub.f32 %v11430_v6, %v8126_v4  ;;  %v15627_v39 = vpack.c.bf16 %v8126_v4, %v8123_v8  ;;  %v8209_v32 = vand.u32 4294901760, %v8208_v16 }
 0x927   : > { %v14048_v29 = vpack.c.bf16 %v8213_v31, %v8206_v27  ;;  %14031 = vmatpush3.bf16.msra.mxu1 %v15627_v39  ;;  %v8214_v59 = vand.u32 4294901760, %v8213_v31 }
 0x928   : > { %14032 = vmatprep.subr.bf16.mxu1 %v14564_v56 }
 0x929   : > { %v15655_v61 = vpack.c.bf16 %v8214_v59, %v8207_v49  ;;  %v8215_v13 = vsub.f32 %v8213_v31, %v8214_v59 }
 0x92a   : > { %13061 = vmatmul.mubr.f32.vlgmr.msra.gmra.mrb[14].mxu0 %v15532_v1  ;;  %v8242_v1 = vand.u32 4294901760, %v8241_v25 }
 0x92b   : > { %13111 = vmatprep.mubr.msk.f32.mxu0 %vm14565_vm1, %v14566_v57  ;;  %14049 = vmatpush3.bf16.msra.mxu0 %v14048_v29  ;;  %v8216_v62 = vand.u32 4294901760, %v8215_v13 }
 0x92c   : > { %14050 = vmatprep.subr.bf16.mxu0 %v14564_v56  ;;  %14034 = vmatpush3.bf16.msra.mxu1 %v15642_v55  ;;  %v14072_v43 = vpack.c.bf16 %v8242_v1, %v8235_v0  ;;  %v8243_v17 = vsub.f32 %v8241_v25, %v8242_v1 }
 0x92d   : > { %14035 = vmatprep.subr.bf16.mxu1 %v14564_v56  ;;  %v15663_v63 = vpack.c.bf16 %v8216_v62, %v8209_v32 }
 0x92e   : > { %v8244_v20 = vand.u32 4294901760, %v8243_v17 }
 0x92f   : > { %14052 = vmatpush3.bf16.msra.mxu0 %v14051_v41 }
 0x930   : > { %14053 = vmatprep.subr.bf16.mxu0 %v14564_v56  ;;  %14037 = vmatpush3.bf16.msra.mxu1 %v15653_v28  ;;  %v14045_v21 = vpack.c.bf16 %v8244_v20, %v8237_v19 }
 0x931   : > { %13075 = vmatprep.subr.mxu1 %v14566_v57 }
 0x933   : > { %14055 = vmatpush3.bf16.msra.mxu0 %v14054_v48 }
 0x934   : > { %13109 = vmatprep.subr.mxu0 %v14566_v57  ;;  %13076 = vmatpush3.msra.mxu1 %v15644_v33 }
 0x935   : > { %14038 = vmatprep.subr.bf16.mxu1 %v14564_v56 }
 0x937   : > { %13110 = vmatpush3.msra.mxu0 %v15649_v58 }
 0x938   : > { %14065 = vmatprep.subr.bf16.mxu0 %v14564_v56 }
 0x998   : > { %v6879_v35 = vpop.f32.mrb[4].mxu0 }
 0x999   : > { %v12879_v22 = vpop.f32.mrb[5].mxu0 }
 0x99e   : > { %v6687_v23 = vpop.f32.mrb[44].mxu1 }
 0x99f   : > { %v12845_v24 = vpop.f32.mrb[45].mxu1 }
 0x9a6   : > { %v7051_v26 = vpop.f32.mrb[6].mxu0 }
 0x9a7   : > { %v12913_v44 = vpop.f32.mrb[7].mxu0 }
 0x9ac   : > { %v6793_v60 = vpop.f32.mrb[46].mxu1 }
 0x9ad   : > { %v6794_v34 = vadd.f32 %v6793_v60, %v6687_v23  ;;  %v12862_v36 = vpop.f32.mrb[47].mxu1 }
 0x9af   : > { %v6880_v11 = vadd.f32 %v6879_v35, %v6794_v34 }
 0x9b4   : > { %v7214_v12 = vpop.f32.mrb[8].mxu0 }
 0x9b5   : > { %v12947_v5 = vpop.f32.mrb[9].mxu0 }
 0x9ba   : > { %v6959_v6 = vpop.f32.mrb[48].mxu1 }
 0x9bb   : > { %v6960_v8 = vadd.f32 %v6959_v6, %v6880_v11  ;;  %v12896_v4 = vpop.f32.mrb[49].mxu1 }
 0x9bd   : > { %v7052_v27 = vadd.f32 %v7051_v26, %v6960_v8 }
 0x9c2   : > { %v7406_v31 = vpop.f32.mrb[10].mxu0 }
 0x9c3   : > { %v12981_v37 = vpop.f32.mrb[11].mxu0 }
 0x9c8   : > { %v7129_v38 = vpop.f32.mrb[50].mxu1 }
 0x9c9   : > { %v7130_v29 = vadd.f32 %v7129_v38, %v7052_v27  ;;  %v12930_v30 = vpop.f32.mrb[51].mxu1 }
 0x9ca   : > { %v8719_v30 = vld [vmem:[%s16264_s12 + $0x8] sm:$0xff] }
 0x9cb   : > { %v7215_v45 = vadd.f32 %v7214_v12, %v7130_v29  ;;  %v8718_v29 = vld [vmem:[%s16264_s12] sm:$0xff] }
 0x9d0   : > { %v7578_v46 = vpop.f32.mrb[12].mxu0 }
 0x9d1   : > { %v13015_v52 = vpop.f32.mrb[13].mxu0 }
 0x9d6   : > { %v7320_v54 = vpop.f32.mrb[52].mxu1 }
 0x9d7   : > { %v7321_v9 = vadd.f32 %v7320_v54, %v7215_v45  ;;  %v12964_v41 = vpop.f32.mrb[53].mxu1  ;;  %v8728_v45 = vand.u32 4294901760, %v8718_v29  ;;  %v8720_v54 = vld [vmem:[%s16264_s12 + $0x10] sm:$0xff] }
 0x9d9   : > { %v7407_v42 = vadd.f32 %v7406_v31, %v7321_v9  ;;  %v8721_v9 = vld [vmem:[%s16264_s12 + $0x18] sm:$0xff] }
 0x9e4   : > { %v7486_v47 = vpop.f32.mrb[54].mxu1 }
 0x9e5   : > { %v7487_v51 = vadd.f32 %v7486_v47, %v7407_v42  ;;  %v12998_v25 = vpop.f32.mrb[55].mxu1  ;;  %v15727_v42 = vsub.f32 %v8718_v29, %v8728_v45 }
 0x9e7   : > { %v7579_v48 = vadd.f32 %v7578_v46, %v7487_v51  ;;  %v8731_v46 = vand.u32 4294901760, %v8719_v30  ;;  %v8734_v51 = vand.u32 4294901760, %v8720_v54 }
 0x9e9   : > { %v15725_v41 = vpack.c.bf16 %v8731_v46, %v8728_v45  ;;  %v15729_v47 = vsub.f32 %v8719_v30, %v8731_v46 }
 0x9f2   : > { %v7656_v50 = vpop.f32.mrb[56].mxu1 }
 0x9f3   : > { %v15666_v49 = vadd.f32 %v7656_v50, %v7579_v48  ;;  %v13032_v59 = vpop.f32.mrb[57].mxu1  ;;  %v8737_v48 = vand.u32 4294901760, %v8721_v9  ;;  %v15732_v50 = vsub.f32 %v8720_v54, %v8734_v51 }
 0x9f5   : > { %v15735_v59 = vpack.c.bf16 %v8737_v48, %v8734_v51 }
 0x9fd   : > { %v8107_v40 = vpop.f32.mrb[14].mxu0 }
 0x9fe   : > { %v8120_v10 = vsel %vm6605_vm7, %v8107_v40, 0  ;;  %v13062_v16 = vpop.f32.mrb[15].mxu0  ;;  %v15737_v40 = vsub.f32 %v8721_v9, %v8737_v48 }
 0x9ff   : > { %v8194_v13 = vand.u32 4294901760, %v8120_v10  ;;  %v8810_v16 = vand.u32 4294901760, %v15727_v42 }
 0xa01   : > { %v8195_v32 = vsub.f32 %v8120_v10, %v8194_v13  ;;  %v15742_v10 = vld [vmem:[%s16264_s12 + $0x20] sm:$0xff] }
 0xa03   : > { %v8196_v62 = vand.u32 4294901760, %v8195_v32  ;;  %13112 = vmatmul.mubr.f32.vlgmr.msra.gmra.mrb[16].mxu0 %v8195_v32 }
 0xa04   : > { %14067 = vmatpush3.bf16.msra.mxu0 %v15655_v61  ;;  %13145 = vmatprep.mubr.msk.f32.mxu0 %vm14565_vm1, %v14566_v57  ;;  %v8249_v61 = vand.u32 4294901760, %v15649_v58 }
 0xa05   : > { %v8197_v0 = vsub.f32 %v8195_v32, %v8196_v62  ;;  %14068 = vmatprep.subr.bf16.mxu0 %v14564_v56 }
 0xa06   : > { %v8250_v2 = vsub.f32 %v15649_v58, %v8249_v61 }
 0xa07   : > { %v8198_v1 = vand.u32 4294901760, %v8197_v0  ;;  %v8811_v0 = vsub.f32 %v15727_v42, %v8810_v16 }
 0xa08   : > { %14070 = vmatpush3.bf16.msra.mxu0 %v15660_v53  ;;  %v8251_v53 = vand.u32 4294901760, %v8250_v2 }
 0xa09   : > { %13078 = vmatmul.mubr.f32.vlgmr.msra.gmra.mrb[58].mxu1 %v8198_v1  ;;  %14071 = vmatprep.subr.bf16.mxu0 %v14564_v56  ;;  %v8812_v2 = vand.u32 4294901760, %v8811_v0 }
 0xa0a   : > { %14040 = vmatpush3.bf16.msra.mxu1 %v15663_v63  ;;  %13094 = vmatprep.mubr.msk.f32.mxu1 %vm14565_vm1, %v14566_v57 }
 0xa0b   : > { %14041 = vmatprep.subr.bf16.mxu1 %v14564_v56 }
 0xa0c   : > { %14073 = vmatpush3.bf16.msra.mxu0 %v14072_v43 }
 0xa0d   : > { %13143 = vmatprep.subr.mxu0 %v14566_v57 }
 0xa0e   : > { %14043 = vmatpush3.bf16.msra.mxu1 %v14042_v18 }
 0xa0f   : > { %14044 = vmatprep.subr.bf16.mxu1 %v14564_v56 }
 0xa10   : > { %13144 = vmatpush3.msra.mxu0 %v8249_v61 }
 0xa11   : > { %13146 = vmatmul.mubr.f32.vlgmr.msra.gmra.mrb[18].mxu0 %v8194_v13  ;;  %14083 = vmatprep.subr.bf16.mxu0 %v14564_v56 }
 0xa12   : > { %14046 = vmatpush3.bf16.msra.mxu1 %v14045_v21  ;;  %13175 = vmatprep.mubr.msk.f32.mxu0 %vm14565_vm1, %v14566_v57 }
 0xa13   : > { %13092 = vmatprep.subr.mxu1 %v14566_v57  ;;  %14085 = vmatpush3.bf16.msra.mxu0 %v15725_v41 }
 0xa14   : > { %14086 = vmatprep.subr.bf16.mxu0 %v14564_v56 }
 0xa16   : > { %13093 = vmatpush3.msra.mxu1 %v8251_v53 }
 0xa17   : > { %13095 = vmatmul.mubr.f32.vlgmr.msra.gmra.mrb[60].mxu1 %v8194_v13  ;;  %14056 = vmatprep.subr.bf16.mxu1 %v14564_v56 }
 0xa18   : > { %14058 = vmatpush3.bf16.msra.mxu1 %v15627_v39  ;;  %13128 = vmatprep.mubr.msk.f32.mxu1 %vm14565_vm1, %v14566_v57 }
 0xa19   : > { %14059 = vmatprep.subr.bf16.mxu1 %v14564_v56  ;;  %14088 = vmatpush3.bf16.msra.mxu0 %v15735_v59 }
 0xa1a   : > { %13173 = vmatprep.subr.mxu0 %v14566_v57 }
 0xa1c   : > { %14061 = vmatpush3.bf16.msra.mxu1 %v15642_v55 }
 0xa1d   : > { %14062 = vmatprep.subr.bf16.mxu1 %v14564_v56 }
 0xa20   : > { %14064 = vmatpush3.bf16.msra.mxu1 %v15653_v28 }
 0xa21   : > { %13126 = vmatprep.subr.mxu1 %v14566_v57 }
 0xa24   : > { %13127 = vmatpush3.msra.mxu1 %v15644_v33 }
 0xa25   : > { %13129 = vmatmul.mubr.f32.vlgmr.msra.gmra.mrb[62].mxu1 %v8196_v62  ;;  %14074 = vmatprep.subr.bf16.mxu1 %v14564_v56  ;;  %v15748_v62 = vand.u32 4294901760, %v15742_v10 }
 0xa26   : > { %14076 = vmatpush3.bf16.msra.mxu1 %v15627_v39  ;;  %13162 = vmatprep.mubr.msk.f32.mxu1 %vm14565_vm1, %v14566_v57 }
 0xa27   : > { %14077 = vmatprep.subr.bf16.mxu1 %v14564_v56  ;;  %13174 = vmatpush3.msra.mxu0 %v15748_v62 }
 0xa28   : > { %14089 = vmatprep.subr.bf16.mxu0 %v14564_v56 }
 0xa2a   : > { %14079 = vmatpush3.bf16.msra.mxu1 %v15642_v55 }
 0xa2b   : > { %14080 = vmatprep.subr.bf16.mxu1 %v14564_v56 }
 0xa2e   : > { %14082 = vmatpush3.bf16.msra.mxu1 %v15653_v28 }
 0xa2f   : > { %13160 = vmatprep.subr.mxu1 %v14566_v57 }
 0xa32   : > { %13161 = vmatpush3.msra.mxu1 %v15644_v33  ;;  %v11436_v33 = vld [vmem:[%s16261_s9] ss:$0 sm:$0xff] }
 0xa33   : > { %13163 = vmatmul.mubr.f32.vlgmr.msra.gmra.mrb[64].mxu1 %v8194_v13  ;;  %v8817_v13 = vand.u32 4294901760, %v15729_v47 }
 0xa35   : > { %v8818_v1 = vsub.f32 %v15729_v47, %v8817_v13 }
 0xa37   : > { %v8819_v53 = vand.u32 4294901760, %v8818_v1 }
 0xad6   : > { %v8392_v58 = vpop.f32.mrb[16].mxu0 }
 0xad7   : > { %v13113_v63 = vpop.f32.mrb[17].mxu0 }
 0xad8   : > { %v8831_v63 = vand.u32 4294901760, %v15737_v40 }
 0xadc   : > { %v8200_v3 = vpop.f32.mrb[58].mxu1 }
 0xadd   : > { %v13079_v39 = vpop.f32.mrb[59].mxu1 }
 0xae4   : > { %v8564_v43 = vpop.f32.mrb[18].mxu0 }
 0xae5   : > { %v13147_v7 = vpop.f32.mrb[19].mxu0 }
 0xaea   : > { %v8306_v14 = vpop.f32.mrb[60].mxu1 }
 0xaeb   : > { %v8307_v15 = vadd.f32 %v8306_v14, %v8200_v3  ;;  %v13096_v17 = vpop.f32.mrb[61].mxu1  ;;  %v15756_v3 = vpack.c.bf16 %v8819_v53, %v8812_v2 }
 0xaec   : > { %v14096_v17 = vpack.c.bf16 %v15729_v47, %v15727_v42  ;;  %v11437_v42 = vld [vmem:[%s16264_s12 + $0x28] sm:$0xff] }
 0xaed   : > { %v8393_v18 = vadd.f32 %v8392_v58, %v8307_v15  ;;  %v8824_v58 = vand.u32 4294901760, %v15732_v50 }
 0xaef   : > { %v8825_v39 = vsub.f32 %v15732_v50, %v8824_v58 }
 0xaf1   : > { %v8826_v7 = vand.u32 4294901760, %v8825_v39 }
 0xaf8   : > { %v8472_v55 = vpop.f32.mrb[62].mxu1 }
 0xaf9   : > { %v8473_v19 = vadd.f32 %v8472_v55, %v8393_v18  ;;  %v13130_v20 = vpop.f32.mrb[63].mxu1  ;;  %v14099_v18 = vpack.c.bf16 %v15737_v40, %v15732_v50  ;;  %v15767_v55 = vpack.c.bf16 %v8817_v13, %v8810_v16  ;;  %v11438_v50 = vld [vmem:[%s16264_s12 + $0x30] sm:$0xff] }
 0xafb   : > { %v8565_v21 = vadd.f32 %v8564_v43, %v8473_v19  ;;  %v8832_v43 = vsub.f32 %v15737_v40, %v8831_v63  ;;  %v15769_v19 = vpack.c.bf16 %v8831_v63, %v8824_v58  ;;  %v9236_v40 = vand.u32 4294901760, %v11437_v42 }
 0xafd   : > { %v8833_v14 = vand.u32 4294901760, %v8832_v43 }
 0xaff   : > { %v15761_v15 = vpack.c.bf16 %v8833_v14, %v8826_v7 }
 0xb06   : > { %v8642_v28 = vpop.f32.mrb[64].mxu1 }
 0xb07   : > { %v8643_v35 = vadd.f32 %v8642_v28, %v8565_v21  ;;  %v13164_v22 = vpop.f32.mrb[65].mxu1 }
 0xb08   : > { %v8655_v22 = vld [vmem:[%s16262_s10] sm:$0x1f] }
 0xb09   : > { %v8646_v23 = vadd.f32 %v8643_v35, %v15666_v49 }
 0xb0b   : > { %v8654_v24 = vadd.f32 %v11436_v33, %v8646_v23  ;;  %v8656_v23 = vld [vmem:[%s16263_s11] sm:$0x1f] }
 0xb0d   : > { %v8658_v26 = vsel %vm8657_vm8, %v8654_v24, 0.0 }
 0xb0e   : > { %8659 = vadd.xlane.f32.xlu1 %v8658_v26 }
 0xb9b   : > { %v8660_v44 = vpop.xlane.xlu1 %8659 }
 0xb9c   : > { %v8661_v60 = vrot.slane %v8660_v44, 4 }
 0xb9e   : > { %v8662_v34 = vadd.f32 %v8661_v60, %v8660_v44 }
 0xba0   : > { %v8663_v36 = vrot.slane %v8662_v34, 2 }
 0xba2   : > { %v8664_v11 = vadd.f32 %v8663_v36, %v8662_v34 }
 0xba4   : > { %v8665_v12 = vrot.slane %v8664_v11, 1 }
 0xba6   : > { %v8666_v5 = vadd.f32 %v8665_v12, %v8664_v11 }
 0xba8   : > { %14432 = vpush %v8666_v5 }
 0xbd9   : > { %s14433_s23 = spop %14432 }
 0xbda   : > { %v8668_v6 = vstv %s14433_s23  ;;  %s512_s23 = sand.u32 1, %s14554_s22  }
 0xbdb   : > { %v8670_v8 = vmul.f32 0.005, %v8668_v6  ;;  %s11322_s29 = scalar_lea.sflag [#allocation3], %s512_s23 }
 0xbdd   : > { %v8671_v4 = vsub.f32 %v8654_v24, %v8670_v8 }
 0xbdf   : > { %v8672_v27 = vmul.f32 %v8671_v4, %v8671_v4 }
 0xbe1   : > { %v8673_v31 = vsel %vm8657_vm8, %v8672_v27, 0.0 }
 0xbe2   : > { %8674 = vadd.xlane.f32.xlu1 %v8673_v31 }
 0xc6f   : > { %v8675_v37 = vpop.xlane.xlu1 %8674 }
 0xc70   : > { %v8676_v38 = vrot.slane %v8675_v37, 4 }
 0xc72   : > { %v8677_v52 = vadd.f32 %v8676_v38, %v8675_v37 }
 0xc74   : > { %v8678_v25 = vrot.slane %v8677_v52, 2 }
 0xc76   : > { %v8679_v49 = vadd.f32 %v8678_v25, %v8677_v52 }
 0xc78   : > { %v8680_v32 = vrot.slane %v8679_v49, 1 }
 0xc7a   : > { %v8681_v61 = vadd.f32 %v8680_v32, %v8679_v49 }
 0xc7c   : > { %14434 = vpush %v8681_v61  ;;  %v8837_v61 = vsub.f32 %v15742_v10, %v15748_v62 }
 0xc7e   : > { %v8838_v43 = vand.u32 4294901760, %v8837_v61 }
 0xcad   : > { %s14435_s30 = spop %14434 }
 0xcae   : > { %v8683_v20 = vstv %s14435_s30 }
 0xcaf   : > { %v8684_v21 = vmul.f32 0.005, %v8683_v20  ;;  %v8839_v20 = vsub.f32 %v8837_v61, %v8838_v43 }
 0xcb1   : > { %v8685_v28 = vadd.f32 1e-05, %v8684_v21  ;;  %v8840_v10 = vand.u32 4294901760, %v8839_v20 }
 0xcb3   : > { %14488 = vrsqrt.f32 %v8685_v28 }
 0xcbd   : > { %v14489_v35 = vpop.eup %14488 }
 0xcbe   : > { %v8687_v33 = vmul.f32 %v14489_v35, %v8671_v4 }
 0xcc0   : > { %v8688_v24 = vmul.f32 %v8687_v33, %v8655_v22 }
 0xcc2   : > { %v8689_v26 = vadd.f32 %v8688_v24, %v8656_v23 }
 0xcc4   : > { %v8691_v44 = vmul.f32 0.70710677, %v8689_v26  ;;  %v8690_v25 = vmul.f32 0.5, %v8689_v26 }
 0xcc6   : > { %v8692_v60 = vand.u32 2147483647, %v8691_v44  ;;  %vm8712_vm9 = vcmp.ge.f32.partialorder %v8691_v44, 0.0  ;;  %v11441_v44 = vld [vmem:[%s16264_s12 + $0x48] sm:$0xff] }
 0xcc8   : > { %v8693_v34 = vmul.f32 0.3275911, %v8692_v60  ;;  %v8706_v11 = vsub.f32 0.0, %v8692_v60 }
 0xcca   : > { %v8694_v36 = vadd.f32 1.0, %v8693_v34  ;;  %v8707_v5 = vmul.f32 %v8706_v11, %v8692_v60 }
 0xccc   : > { %14490 = vrcp.f32 %v8694_v36  ;;  %v8708_v27 = vmul.f32 1.442695, %v8707_v5  ;;  %v15876_v5 = vand.u32 4294901760, %v11441_v44 }
 0xcce   : > { %14492 = vpow2.f32 %v8708_v27 }
 0xcd6   : > { %v14491_v12 = vpop.eup %14490 }
 0xcd7   : > { %v8697_v6 = vmul.f32 1.0614054, %v14491_v12 }
 0xcd8   : > { %v14493_v46 = vpop.eup %14492 }
 0xcd9   : > { %v8698_v8 = vadd.f32 -1.4531521, %v8697_v6  ;;  %v9345_v6 = vsub.f32 %v11441_v44, %v15876_v5 }
 0xcdb   : > { %v8699_v31 = vmul.f32 %v14491_v12, %v8698_v8 }
 0xcdd   : > { %v8700_v37 = vadd.f32 1.4214138, %v8699_v31 }
 0xcdf   : > { %v8701_v4 = vmul.f32 %v14491_v12, %v8700_v37 }
 0xce1   : > { %v8702_v38 = vadd.f32 -0.28449672, %v8701_v4 }
 0xce3   : > { %v8703_v29 = vmul.f32 %v14491_v12, %v8702_v38 }
 0xce5   : > { %v8704_v30 = vadd.f32 0.2548296, %v8703_v29 }
 0xce7   : > { %v8705_v45 = vmul.f32 %v14491_v12, %v8704_v30  ;;  %v9346_v30 = vand.u32 4294901760, %v9345_v6 }
 0xce9   : > { %v8710_v52 = vmul.f32 %v14493_v46, %v8705_v45 }
 0xceb   : > { %v8711_v54 = vsub.f32 1.0, %v8710_v52  ;;  %v9347_v52 = vsub.f32 %v9345_v6, %v9346_v30 }
 0xced   : > { %v8713_v9 = vsub.f32 0.0, %v8711_v54 }
 0xcef   : > { %v8714_v51 = vsel %vm8712_vm9, %v8711_v54, %v8713_v9  ;;  %v9348_v54 = vand.u32 4294901760, %v9347_v52 }
 0xcf0   : > { %v8715_v48 = vadd.f32 1.0, %v8714_v51 }
 0xcf2   : > { %v8716_v49 = vmul.f32 %v8715_v48, %v8690_v25 }
 0xcf4   : > { %v8725_v16 = vsel %vm8723_vm10, %v8716_v49, 0  ;;  %v9740_v13 = vrot.slane %v8716_v49, 2  ;;  %v10248_v2 = vrot.slane %v8716_v49, 3  ;;  %v10756_v53 = vrot.slane %v8716_v49, 4 }
 0xcf5   : > { %v15778_v32 = vand.u32 4294901760, %v8725_v16  ;;  %v9232_v47 = vrot.slane %v8716_v49, 1  ;;  %v11442_v49 = vld [vmem:[%s16264_s12 + $0x50] sm:$0xff] }
 0xcf6   : > { %v15781_v0 = vsel %vm8723_vm10, %v9740_v13, 0  ;;  %v15787_v63 = vsel %vm8723_vm10, %v10248_v2, 0  ;;  %v15790_v7 = vsel %vm8723_vm10, %v10756_v53, 0  ;;  %v9744_v13 = vand.u32 4294901760, %v11442_v49  ;;  %v11445_v2 = vld [vmem:[%s16264_s12 + $0x68] sm:$0xff] }
 0xcf7   : > { %v8798_v1 = vsub.f32 %v8725_v16, %v15778_v32  ;;  %v11443_v16 = vld [vmem:[%s16264_s12 + $0x58] sm:$0xff] }
 0xcf9   : > { %v8799_v58 = vand.u32 4294901760, %v8798_v1 }
 0xcfb   : > { %v8800_v39 = vsub.f32 %v8798_v1, %v8799_v58 }
 0xcfd   : > { %v8801_v14 = vand.u32 4294901760, %v8800_v39 }
 0xcff   : > { %13176 = vmatmul.mubr.f32.vlgmr.msra.gmra.mrb[20].mxu0 %v8801_v14 }
 0xd00   : > { %14091 = vmatpush3.bf16.msra.mxu0 %v15756_v3  ;;  %13188 = vmatprep.mubr.msk.f32.mxu0 %vm14565_vm1, %v14566_v57  ;;  %v9239_v3 = vand.u32 4294901760, %v11438_v50 }
 0xd01   : > { %14092 = vmatprep.subr.bf16.mxu0 %v14564_v56 }
 0xd02   : > { %v15859_v26 = vpack.c.bf16 %v9239_v3, %v9236_v40 }
 0xd04   : > { %14094 = vmatpush3.bf16.msra.mxu0 %v15761_v15  ;;  %v9233_v15 = vsel %vm8723_vm10, %v9232_v47, 0 }
 0xd05   : > { %13186 = vmatprep.subr.mxu0 %v14566_v57  ;;  %v15848_v21 = vand.u32 4294901760, %v9233_v15 }
 0xd07   : > { %v9306_v24 = vsub.f32 %v9233_v15, %v15848_v21 }
 0xd08   : > { %13187 = vmatpush3.msra.mxu0 %v8840_v10 }
 0xd09   : > { %13189 = vmatmul.mubr.f32.vlgmr.msra.gmra.mrb[20].mxu0 %v15778_v32  ;;  %14095 = vmatprep.subr.bf16.mxu0 %v14564_v56  ;;  %v9307_v11 = vand.u32 4294901760, %v9306_v24 }
 0xd0a   : > { %14097 = vmatpush3.bf16.msra.mxu0 %v14096_v17  ;;  %13201 = vmatprep.mubr.msk.f32.mxu0 %vm14565_vm1, %v14566_v57  ;;  %v15834_v17 = vsub.f32 %v11437_v42, %v9236_v40  ;;  %v11446_v40 = vld [vmem:[%s16264_s12 + $0x70] sm:$0xff] }
 0xd0b   : > { %14098 = vmatprep.subr.bf16.mxu0 %v14564_v56  ;;  %v9308_v37 = vsub.f32 %v9306_v24, %v9307_v11 }
 0xd0c   : > { %v9318_v22 = vand.u32 4294901760, %v15834_v17 }
 0xd0d   : > { %v9309_v45 = vand.u32 4294901760, %v9308_v37  ;;  %v11449_v37 = vld [vmem:[%s16264_s12 + $0x88] sm:$0xff] }
 0xd0e   : > { %14100 = vmatpush3.bf16.msra.mxu0 %v14099_v18  ;;  %v11439_v18 = vld [vmem:[%s16264_s12 + $0x38] sm:$0xff] }
 0xd0f   : > { %13199 = vmatprep.subr.mxu0 %v14566_v57  ;;  %v9242_v28 = vand.u32 4294901760, %v11439_v18 }
 0xd11   : > { %v15852_v33 = vsub.f32 %v11439_v18, %v9242_v28 }
 0xd12   : > { %13200 = vmatpush3.msra.mxu0 %v8837_v61  ;;  %v11444_v61 = vld [vmem:[%s16264_s12 + $0x60] sm:$0xff] }
 0xd13   : > { %13202 = vmatmul.mubr.f32.vlgmr.msra.gmra.mrb[20].mxu0 %v8798_v1  ;;  %14101 = vmatprep.subr.bf16.mxu0 %v14564_v56  ;;  %v9332_v34 = vand.u32 4294901760, %v15852_v33  ;;  %v15925_v1 = vsub.f32 %v11442_v49, %v9744_v13  ;;  %v9750_v39 = vand.u32 4294901760, %v11444_v61  ;;  %v11451_v49 = vld [vmem:[%s16264_s12 + $0x98] sm:$0xff] }
 0xd14   : > { %14103 = vmatpush3.bf16.msra.mxu0 %v15725_v41  ;;  %13214 = vmatprep.mubr.msk.f32.mxu0 %vm14565_vm1, %v14566_v57 }
 0xd15   : > { %14104 = vmatprep.subr.bf16.mxu0 %v14564_v56  ;;  %v9333_v27 = vsub.f32 %v15852_v33, %v9332_v34  ;;  %v9826_v14 = vand.u32 4294901760, %v15925_v1  ;;  %v15944_v20 = vsub.f32 %v11444_v61, %v9750_v39 }
 0xd17   : > { %v9334_v38 = vand.u32 4294901760, %v9333_v27 }
 0xd18   : > { %14106 = vmatpush3.bf16.msra.mxu0 %v15735_v59 }
 0xd19   : > { %13212 = vmatprep.subr.mxu0 %v14566_v57 }
 0xd1c   : > { %13213 = vmatpush3.msra.mxu0 %v15748_v62 }
 0xd1d   : > { %13215 = vmatmul.mubr.f32.vlgmr.msra.gmra.mrb[20].mxu0 %v8799_v58  ;;  %14107 = vmatprep.subr.bf16.mxu0 %v14564_v56  ;;  %v15940_v58 = vand.u32 4294901760, %v15781_v0 }
 0xd1e   : > { %14109 = vmatpush3.bf16.msra.mxu0 %v15767_v55  ;;  %13227 = vmatprep.mubr.msk.f32.mxu0 %vm14565_vm1, %v14566_v57  ;;  %v11440_v55 = vld [vmem:[%s16264_s12 + $0x40] sm:$0xff] }
 0xd1f   : > { %14110 = vmatprep.subr.bf16.mxu0 %v14564_v56  ;;  %v9245_v35 = vand.u32 4294901760, %v11440_v55  ;;  %v9814_v47 = vsub.f32 %v15781_v0, %v15940_v58 }
 0xd21   : > { %v15854_v23 = vsub.f32 %v11440_v55, %v9245_v35  ;;  %v15874_v12 = vpack.c.bf16 %v9245_v35, %v9242_v28  ;;  %v9815_v0 = vand.u32 4294901760, %v9814_v47 }
 0xd22   : > { %14112 = vmatpush3.bf16.msra.mxu0 %v15769_v19  ;;  %v15845_v19 = vsub.f32 %v11438_v50, %v9239_v3  ;;  %v9827_v3 = vsub.f32 %v15925_v1, %v9826_v14 }
 0xd23   : > { %13225 = vmatprep.subr.mxu0 %v14566_v57  ;;  %v9339_v36 = vand.u32 4294901760, %v15854_v23  ;;  %v14135_v51 = vpack.c.bf16 %v15854_v23, %v15852_v33 }
 0xd24   : > { %v14132_v9 = vpack.c.bf16 %v15845_v19, %v15834_v17  ;;  %v9828_v28 = vand.u32 4294901760, %v9827_v3 }
 0xd25   : > { %v9340_v31 = vsub.f32 %v15854_v23, %v9339_v36  ;;  %v14147_v48 = vpack.c.bf16 %v9339_v36, %v9332_v34  ;;  %v9816_v23 = vsub.f32 %v9814_v47, %v9815_v0 }
 0xd26   : > { %13226 = vmatpush3.msra.mxu0 %v8838_v43  ;;  %v9753_v43 = vand.u32 4294901760, %v11445_v2 }
 0xd27   : > { %13228 = vmatmul.mubr.f32.vlgmr.msra.gmra.mrb[20].mxu0 %v15778_v32  ;;  %14113 = vmatprep.subr.bf16.mxu0 %v14564_v56  ;;  %v9341_v29 = vand.u32 4294901760, %v9340_v31 }
 0xd28   : > { %14115 = vmatpush3.bf16.msra.mxu0 %v15725_v41  ;;  %13240 = vmatprep.mubr.msk.f32.mxu0 %vm14565_vm1, %v14566_v57  ;;  %v9325_v41 = vand.u32 4294901760, %v15845_v19  ;;  %v15946_v10 = vsub.f32 %v11445_v2, %v9753_v43  ;;  %v15967_v55 = vpack.c.bf16 %v9753_v43, %v9750_v39 }
 0xd29   : > { %14116 = vmatprep.subr.bf16.mxu0 %v14564_v56  ;;  %v14129_v46 = vpack.c.bf16 %v9341_v29, %v9334_v38 }
 0xd2a   : > { %v9326_v60 = vsub.f32 %v15845_v19, %v9325_v41  ;;  %v14144_v25 = vpack.c.bf16 %v9325_v41, %v9318_v22  ;;  %v9847_v18 = vand.u32 4294901760, %v15946_v10  ;;  %v15969_v19 = vand.u32 4294901760, %v11446_v40 }
 0xd2c   : > { %14118 = vmatpush3.bf16.msra.mxu0 %v15735_v59  ;;  %v9319_v59 = vsub.f32 %v15834_v17, %v9318_v22  ;;  %v9327_v8 = vand.u32 4294901760, %v9326_v60  ;;  %v9840_v17 = vand.u32 4294901760, %v15944_v20  ;;  %v9853_v35 = vsub.f32 %v11446_v40, %v15969_v19 }
 0xd2d   : > { %13238 = vmatprep.subr.mxu0 %v14566_v57  ;;  %v9848_v33 = vsub.f32 %v15946_v10, %v9847_v18 }
 0xd2e   : > { %v9854_v44 = vand.u32 4294901760, %v9853_v35 }
 0xd30   : > { %13239 = vmatpush3.msra.mxu0 %v15748_v62  ;;  %v9320_v62 = vand.u32 4294901760, %v9319_v59  ;;  %v9817_v59 = vand.u32 4294901760, %v9816_v23  ;;  %v9855_v34 = vsub.f32 %v9853_v35, %v9854_v44  ;;  %v11455_v23 = vld [vmem:[%s16264_s12 + $0xb8] sm:$0xff] }
 0xd31   : > { %13241 = vmatmul.mubr.f32.vlgmr.msra.gmra.mrb[20].mxu0 %v15778_v32  ;;  %14119 = vmatprep.subr.bf16.mxu0 %v14564_v56  ;;  %v9747_v32 = vand.u32 4294901760, %v11443_v16 }
 0xd32   : > { %14121 = vmatpush3.bf16.msra.mxu0 %v15859_v26  ;;  %13253 = vmatprep.mubr.msk.f32.mxu0 %vm14565_vm1, %v14566_v57  ;;  %v14126_v4 = vpack.c.bf16 %v9327_v8, %v9320_v62  ;;  %v9856_v36 = vand.u32 4294901760, %v9855_v34  ;;  %v14183_v62 = vpack.c.bf16 %v9847_v18, %v9840_v17  ;;  %v11448_v8 = vld [vmem:[%s16264_s12 + $0x80] sm:$0xff] }
 0xd33   : > { %14122 = vmatprep.subr.bf16.mxu0 %v14564_v56  ;;  %v15936_v53 = vsub.f32 %v11443_v16, %v9747_v32  ;;  %v15952_v50 = vpack.c.bf16 %v9747_v32, %v9744_v13  ;;  %v10255_v31 = vand.u32 4294901760, %v11448_v8 }
 0xd35   : > { %v9833_v42 = vand.u32 4294901760, %v15936_v53  ;;  %v16029_v29 = vsub.f32 %v11448_v8, %v10255_v31 }
 0xd36   : > { %14124 = vmatpush3.bf16.msra.mxu0 %v15874_v12 }
 0xd37   : > { %13251 = vmatprep.subr.mxu0 %v14566_v57  ;;  %v9834_v15 = vsub.f32 %v15936_v53, %v9833_v42 }
 0xd39   : > { %v9835_v22 = vand.u32 4294901760, %v9834_v15 }
 0xd3a   : > { %13252 = vmatpush3.msra.mxu0 %v15876_v5 }
 0xd3b   : > { %13254 = vmatmul.mubr.f32.vlgmr.msra.gmra.mrb[20].mxu0 %v9309_v45  ;;  %14125 = vmatprep.subr.bf16.mxu0 %v14564_v56  ;;  %v14162_v41 = vpack.c.bf16 %v9835_v22, %v9828_v28  ;;  %v10258_v45 = vand.u32 4294901760, %v11449_v37  ;;  %v11452_v28 = vld [vmem:[%s16264_s12 + $0xa0] sm:$0xff] }
 0xd3c   : > { %14127 = vmatpush3.bf16.msra.mxu0 %v14126_v4  ;;  %13266 = vmatprep.mubr.msk.f32.mxu0 %vm14565_vm1, %v14566_v57  ;;  %v11450_v4 = vld [vmem:[%s16264_s12 + $0x90] sm:$0xff]  ;;  %v10760_v22 = vand.u32 4294901760, %v11452_v28 }
 0xd3d   : > { %14128 = vmatprep.subr.bf16.mxu0 %v14564_v56  ;;  %v16036_v52 = vsub.f32 %v11449_v37, %v10258_v45 }
 0xd3f   : > { %v10348_v32 = vand.u32 4294901760, %v16036_v52 }
 0xd40   : > { %14130 = vmatpush3.bf16.msra.mxu0 %v14129_v46  ;;  %v10261_v46 = vand.u32 4294901760, %v11450_v4 }
 0xd41   : > { %13264 = vmatprep.subr.mxu0 %v14566_v57 }
 0xd42   : > { %v16060_v2 = vpack.c.bf16 %v10261_v46, %v10258_v45 }
 0xd44   : > { %13265 = vmatpush3.msra.mxu0 %v9348_v54  ;;  %v16038_v54 = vsub.f32 %v11450_v4, %v10261_v46 }
 0xd45   : > { %13267 = vmatmul.mubr.f32.vlgmr.msra.gmra.mrb[20].mxu0 %v15848_v21  ;;  %14131 = vmatprep.subr.bf16.mxu0 %v14564_v56 }
 0xd46   : > { %14133 = vmatpush3.bf16.msra.mxu0 %v14132_v9  ;;  %13279 = vmatprep.mubr.msk.f32.mxu0 %vm14565_vm1, %v14566_v57 }
 0xd47   : > { %14134 = vmatprep.subr.bf16.mxu0 %v14564_v56 }
 0xd4a   : > { %14136 = vmatpush3.bf16.msra.mxu0 %v14135_v51  ;;  %v10341_v51 = vand.u32 4294901760, %v16029_v29 }
 0xd4b   : > { %13277 = vmatprep.subr.mxu0 %v14566_v57 }
 0xd4c   : > { %v10342_v13 = vsub.f32 %v16029_v29, %v10341_v51 }
 0xd4e   : > { %13278 = vmatpush3.msra.mxu0 %v9345_v6  ;;  %v11447_v6 = vld [vmem:[%s16264_s12 + $0x78] sm:$0xff]  ;;  %v10343_v43 = vand.u32 4294901760, %v10342_v13 }
 0xd4f   : > { %13280 = vmatmul.mubr.f32.vlgmr.msra.gmra.mrb[20].mxu0 %v9306_v24  ;;  %14137 = vmatprep.subr.bf16.mxu0 %v14564_v56  ;;  %v10252_v27 = vand.u32 4294901760, %v11447_v6 }
 0xd50   : > { %14139 = vmatpush3.bf16.msra.mxu0 %v15859_v26  ;;  %13292 = vmatprep.mubr.msk.f32.mxu0 %vm14565_vm1, %v14566_v57 }
 0xd51   : > { %14140 = vmatprep.subr.bf16.mxu0 %v14564_v56  ;;  %v16027_v38 = vsub.f32 %v11447_v6, %v10252_v27 }
 0xd53   : > { %v10334_v9 = vand.u32 4294901760, %v16027_v38  ;;  %v14204_v18 = vpack.c.bf16 %v16029_v29, %v16027_v38 }
 0xd54   : > { %14142 = vmatpush3.bf16.msra.mxu0 %v15874_v12 }
 0xd55   : > { %13290 = vmatprep.subr.mxu0 %v14566_v57  ;;  %v10335_v16 = vsub.f32 %v16027_v38, %v10334_v9 }
 0xd57   : > { %v10336_v39 = vand.u32 4294901760, %v10335_v16 }
 0xd58   : > { %13291 = vmatpush3.msra.mxu0 %v15876_v5 }
 0xd59   : > { %13293 = vmatmul.mubr.f32.vlgmr.msra.gmra.mrb[20].mxu0 %v9307_v11  ;;  %14143 = vmatprep.subr.bf16.mxu0 %v14564_v56  ;;  %v14168_v11 = vpack.c.bf16 %v15936_v53, %v15925_v1  ;;  %v10355_v1 = vand.u32 4294901760, %v16038_v54 }
 0xd5a   : > { %14145 = vmatpush3.bf16.msra.mxu0 %v14144_v25  ;;  %13305 = vmatprep.mubr.msk.f32.mxu0 %vm14565_vm1, %v14566_v57 }
 0xd5b   : > { %14146 = vmatprep.subr.bf16.mxu0 %v14564_v56 }
 0xd5e   : > { %14148 = vmatpush3.bf16.msra.mxu0 %v14147_v48  ;;  %v16045_v48 = vpack.c.bf16 %v10255_v31, %v10252_v27 }
 0xd5f   : > { %13303 = vmatprep.subr.mxu0 %v14566_v57 }
 0xd62   : > { %13304 = vmatpush3.msra.mxu0 %v9346_v30  ;;  %v16033_v30 = vand.u32 4294901760, %v15787_v63 }
 0xd63   : > { %13306 = vmatmul.mubr.f32.vlgmr.msra.gmra.mrb[20].mxu0 %v15848_v21  ;;  %14149 = vmatprep.subr.bf16.mxu0 %v14564_v56 }
 0xd64   : > { %14151 = vmatpush3.bf16.msra.mxu0 %v15859_v26  ;;  %13318 = vmatprep.mubr.msk.f32.mxu0 %vm14565_vm1, %v14566_v57  ;;  %v9849_v26 = vand.u32 4294901760, %v9848_v33  ;;  %v10322_v25 = vsub.f32 %v15787_v63, %v16033_v30  ;;  %v16057_v63 = vand.u32 4294901760, %v11451_v49  ;;  %v11454_v33 = vld [vmem:[%s16264_s12 + $0xb0] sm:$0xff] }
 0xd65   : > { %14152 = vmatprep.subr.bf16.mxu0 %v14564_v56 }
 0xd66   : > { %v10323_v61 = vand.u32 4294901760, %v10322_v25  ;;  %v10361_v53 = vsub.f32 %v11451_v49, %v16057_v63 }
 0xd68   : > { %14154 = vmatpush3.bf16.msra.mxu0 %v15874_v12  ;;  %v14171_v12 = vpack.c.bf16 %v15946_v10, %v15944_v20  ;;  %v14198_v10 = vpack.c.bf16 %v10343_v43, %v10336_v39 }
 0xd69   : > { %13316 = vmatprep.subr.mxu0 %v14566_v57 }
 0xd6c   : > { %13317 = vmatpush3.msra.mxu0 %v15876_v5  ;;  %v14180_v5 = vpack.c.bf16 %v9833_v42, %v9826_v14  ;;  %v10356_v14 = vsub.f32 %v16038_v54, %v10355_v1 }
 0xd6d   : > { %13319 = vmatmul.mubr.f32.vlgmr.msra.gmra.mrb[20].mxu0 %v15848_v21  ;;  %14155 = vmatprep.subr.bf16.mxu0 %v14564_v56  ;;  %v9841_v21 = vsub.f32 %v15944_v20, %v9840_v17  ;;  %v10324_v20 = vsub.f32 %v10322_v25, %v10323_v61 }
 0xd6e   : > { %14157 = vmatpush3.bf16.msra.mxu0 %v15952_v50  ;;  %13331 = vmatprep.mubr.msk.f32.mxu0 %vm14565_vm1, %v14566_v57 }
 0xd6f   : > { %14158 = vmatprep.subr.bf16.mxu0 %v14564_v56  ;;  %v9842_v24 = vand.u32 4294901760, %v9841_v21  ;;  %v10325_v40 = vand.u32 4294901760, %v10324_v20 }
 0xd71   : > { %v14165_v60 = vpack.c.bf16 %v9849_v26, %v9842_v24  ;;  %v16122_v26 = vand.u32 4294901760, %v15790_v7 }
 0xd72   : > { %14160 = vmatpush3.bf16.msra.mxu0 %v15967_v55 }
 0xd73   : > { %13329 = vmatprep.subr.mxu0 %v14566_v57 }
 0xd76   : > { %13330 = vmatpush3.msra.mxu0 %v15969_v19 }
 0xd77   : > { %13332 = vmatmul.mubr.f32.vlgmr.msra.gmra.mrb[20].mxu0 %v9817_v59  ;;  %14161 = vmatprep.subr.bf16.mxu0 %v14564_v56  ;;  %v10769_v59 = vand.u32 4294901760, %v11455_v23 }
 0xd78   : > { %14163 = vmatpush3.bf16.msra.mxu0 %v14162_v41  ;;  %13344 = vmatprep.mubr.msk.f32.mxu0 %vm14565_vm1, %v14566_v57  ;;  %v16116_v41 = vsub.f32 %v11452_v28, %v10760_v22 }
 0xd79   : > { %14164 = vmatprep.subr.bf16.mxu0 %v14564_v56  ;;  %v16127_v34 = vsub.f32 %v11455_v23, %v10769_v59 }
 0xd7b   : > { %v10863_v31 = vand.u32 4294901760, %v16127_v34 }
 0xd7c   : > { %14166 = vmatpush3.bf16.msra.mxu0 %v14165_v60 }
 0xd7d   : > { %13342 = vmatprep.subr.mxu0 %v14566_v57 }
 0xd80   : > { %13343 = vmatpush3.msra.mxu0 %v9856_v36  ;;  %v10842_v36 = vand.u32 4294901760, %v16116_v41 }
 0xd81   : > { %13345 = vmatmul.mubr.f32.vlgmr.msra.gmra.mrb[20].mxu0 %v15940_v58  ;;  %14167 = vmatprep.subr.bf16.mxu0 %v14564_v56 }
 0xd82   : > { %14169 = vmatpush3.bf16.msra.mxu0 %v14168_v11  ;;  %13357 = vmatprep.mubr.msk.f32.mxu0 %vm14565_vm1, %v14566_v57  ;;  %v10843_v6 = vsub.f32 %v16116_v41, %v10842_v36 }
 0xd83   : > { %14170 = vmatprep.subr.bf16.mxu0 %v14564_v56 }
 0xd84   : > { %v10844_v29 = vand.u32 4294901760, %v10843_v6 }
 0xd86   : > { %14172 = vmatpush3.bf16.msra.mxu0 %v14171_v12  ;;  %v10830_v12 = vsub.f32 %v15790_v7, %v16122_v26 }
 0xd87   : > { %13355 = vmatprep.subr.mxu0 %v14566_v57 }
 0xd88   : > { %v10831_v37 = vand.u32 4294901760, %v10830_v12 }
 0xd8a   : > { %13356 = vmatpush3.msra.mxu0 %v9853_v35  ;;  %v11453_v35 = vld [vmem:[%s16264_s12 + $0xa8] sm:$0xff] }
 0xd8b   : > { %13358 = vmatmul.mubr.f32.vlgmr.msra.gmra.mrb[20].mxu0 %v9814_v47  ;;  %14173 = vmatprep.subr.bf16.mxu0 %v14564_v56  ;;  %v10357_v47 = vand.u32 4294901760, %v10356_v14  ;;  %v10763_v21 = vand.u32 4294901760, %v11453_v35 }
 0xd8c   : > { %14175 = vmatpush3.bf16.msra.mxu0 %v15952_v50  ;;  %13370 = vmatprep.mubr.msk.f32.mxu0 %vm14565_vm1, %v14566_v57 }
 0xd8d   : > { %14176 = vmatprep.subr.bf16.mxu0 %v14564_v56  ;;  %v16118_v24 = vsub.f32 %v11453_v35, %v10763_v21 }
 0xd8f   : > { %v10849_v11 = vand.u32 4294901760, %v16118_v24 }
 0xd90   : > { %14178 = vmatpush3.bf16.msra.mxu0 %v15967_v55 }
 0xd91   : > { %13368 = vmatprep.subr.mxu0 %v14566_v57  ;;  %v10850_v8 = vsub.f32 %v16118_v24, %v10849_v11 }
 0xd93   : > { %v10851_v45 = vand.u32 4294901760, %v10850_v8 }
 0xd94   : > { %13369 = vmatpush3.msra.mxu0 %v15969_v19 }
 0xd95   : > { %13371 = vmatmul.mubr.f32.vlgmr.msra.gmra.mrb[20].mxu0 %v9815_v0  ;;  %14179 = vmatprep.subr.bf16.mxu0 %v14564_v56  ;;  %v14207_v0 = vpack.c.bf16 %v16038_v54, %v16036_v52  ;;  %v14234_v54 = vpack.c.bf16 %v10851_v45, %v10844_v29 }
 0xd96   : > { %14181 = vmatpush3.bf16.msra.mxu0 %v14180_v5  ;;  %13383 = vmatprep.mubr.msk.f32.mxu0 %vm14565_vm1, %v14566_v57  ;;  %v16134_v5 = vpack.c.bf16 %v10763_v21, %v10760_v22 }
 0xd97   : > { %14182 = vmatprep.subr.bf16.mxu0 %v14564_v56 }
 0xd9a   : > { %14184 = vmatpush3.bf16.msra.mxu0 %v14183_v62  ;;  %v11456_v62 = vld [vmem:[%s16264_s12 + $0xc0] sm:$0xff] }
 0xd9b   : > { %13381 = vmatprep.subr.mxu0 %v14566_v57  ;;  %v16146_v7 = vand.u32 4294901760, %v11456_v62 }
 0xd9d   : > { %v10869_v38 = vsub.f32 %v11456_v62, %v16146_v7 }
 0xd9e   : > { %13382 = vmatpush3.msra.mxu0 %v9854_v44  ;;  %v10766_v44 = vand.u32 4294901760, %v11454_v33 }
 0xd9f   : > { %13384 = vmatmul.mubr.f32.vlgmr.msra.gmra.mrb[20].mxu0 %v15940_v58  ;;  %14185 = vmatprep.subr.bf16.mxu0 %v14564_v56 }
 0xda0   : > { %14187 = vmatpush3.bf16.msra.mxu0 %v15952_v50  ;;  %13396 = vmatprep.mubr.msk.f32.mxu0 %vm14565_vm1, %v14566_v57  ;;  %v10362_v50 = vand.u32 4294901760, %v10361_v53  ;;  %v16125_v60 = vsub.f32 %v11454_v33, %v10766_v44  ;;  %v14231_v4 = vpack.c.bf16 %v10769_v59, %v10766_v44  ;;  %v11259_v44 = vld [vmem:[%s16267_s15] sm:$0x1] }
 0xda1   : > { %14188 = vmatprep.subr.bf16.mxu0 %v14564_v56 }
 0xda2   : > { %v10363_v15 = vsub.f32 %v10361_v53, %v10362_v50  ;;  %v10856_v27 = vand.u32 4294901760, %v16125_v60 }
 0xda4   : > { %14190 = vmatpush3.bf16.msra.mxu0 %v15967_v55  ;;  %v10364_v17 = vand.u32 4294901760, %v10363_v15  ;;  %v14216_v55 = vpack.c.bf16 %v10341_v51, %v10334_v9  ;;  %v10857_v46 = vsub.f32 %v16125_v60, %v10856_v27 }
 0xda5   : > { %13394 = vmatprep.subr.mxu0 %v14566_v57 }
 0xda6   : > { %v10858_v9 = vand.u32 4294901760, %v10857_v46 }
 0xda8   : > { %13395 = vmatpush3.msra.mxu0 %v15969_v19  ;;  %v14219_v19 = vpack.c.bf16 %v10355_v1, %v10348_v32  ;;  %v14243_v1 = vpack.c.bf16 %v16127_v34, %v16125_v60 }
 0xda9   : > { %13397 = vmatmul.mubr.f32.vlgmr.msra.gmra.mrb[20].mxu0 %v15940_v58  ;;  %14191 = vmatprep.subr.bf16.mxu0 %v14564_v56  ;;  %v10349_v58 = vsub.f32 %v16036_v52, %v10348_v32  ;;  %v10832_v52 = vsub.f32 %v10830_v12, %v10831_v37  ;;  %v14240_v32 = vpack.c.bf16 %v16118_v24, %v16116_v41  ;;  %v11258_v24 = vld [vmem:[%s16266_s14] sm:$0x1] }
 0xdaa   : > { %14193 = vmatpush3.bf16.msra.mxu0 %v16045_v48  ;;  %13409 = vmatprep.mubr.msk.f32.mxu0 %vm14565_vm1, %v14566_v57 }
 0xdab   : > { %14194 = vmatprep.subr.bf16.mxu0 %v14564_v56  ;;  %v10350_v42 = vand.u32 4294901760, %v10349_v58 }
 0xdad   : > { %v14201_v3 = vpack.c.bf16 %v10357_v47, %v10350_v42 }
 0xdae   : > { %14196 = vmatpush3.bf16.msra.mxu0 %v16060_v2 }
 0xdaf   : > { %13407 = vmatprep.subr.mxu0 %v14566_v57 }
 0xdb2   : > { %13408 = vmatpush3.msra.mxu0 %v16057_v63 }
 0xdb3   : > { %13410 = vmatmul.mubr.f32.vlgmr.msra.gmra.mrb[20].mxu0 %v10325_v40  ;;  %14197 = vmatprep.subr.bf16.mxu0 %v14564_v56 }
 0xdb4   : > { %14199 = vmatpush3.bf16.msra.mxu0 %v14198_v10  ;;  %13422 = vmatprep.mubr.msk.f32.mxu0 %vm14565_vm1, %v14566_v57 }
 0xdb5   : > { %14200 = vmatprep.subr.bf16.mxu0 %v14564_v56 }
 0xdb8   : > { %14202 = vmatpush3.bf16.msra.mxu0 %v14201_v3 }
 0xdb9   : > { %13420 = vmatprep.subr.mxu0 %v14566_v57 }
 0xdbc   : > { %13421 = vmatpush3.msra.mxu0 %v10364_v17 }
 0xdbd   : > { %13423 = vmatmul.mubr.f32.vlgmr.msra.gmra.mrb[20].mxu0 %v16033_v30  ;;  %14203 = vmatprep.subr.bf16.mxu0 %v14564_v56 }
 0xdbe   : > { %14205 = vmatpush3.bf16.msra.mxu0 %v14204_v18  ;;  %13435 = vmatprep.mubr.msk.f32.mxu0 %vm14565_vm1, %v14566_v57 }
 0xdbf   : > { %14206 = vmatprep.subr.bf16.mxu0 %v14564_v56 }
 0xdc2   : > { %14208 = vmatpush3.bf16.msra.mxu0 %v14207_v0 }
 0xdc3   : > { %13433 = vmatprep.subr.mxu0 %v14566_v57 }
 0xdc6   : > { %13434 = vmatpush3.msra.mxu0 %v10361_v53 }
 0xdc7   : > { %13436 = vmatmul.mubr.f32.vlgmr.msra.gmra.mrb[20].mxu0 %v10322_v25  ;;  %14209 = vmatprep.subr.bf16.mxu0 %v14564_v56  ;;  %v10870_v25 = vand.u32 4294901760, %v10869_v38 }
 0xdc8   : > { %14211 = vmatpush3.bf16.msra.mxu0 %v16045_v48  ;;  %13448 = vmatprep.mubr.msk.f32.mxu0 %vm14565_vm1, %v14566_v57 }
 0xdc9   : > { %14212 = vmatprep.subr.bf16.mxu0 %v14564_v56  ;;  %v10871_v16 = vsub.f32 %v10869_v38, %v10870_v25 }
 0xdcb   : > { %v10872_v13 = vand.u32 4294901760, %v10871_v16 }
 0xdcc   : > { %14214 = vmatpush3.bf16.msra.mxu0 %v16060_v2 }
 0xdcd   : > { %13446 = vmatprep.subr.mxu0 %v14566_v57 }
 0xdd0   : > { %13447 = vmatpush3.msra.mxu0 %v16057_v63 }
 0xdd1   : > { %13449 = vmatmul.mubr.f32.vlgmr.msra.gmra.mrb[20].mxu0 %v10323_v61  ;;  %14215 = vmatprep.subr.bf16.mxu0 %v14564_v56  ;;  %v14255_v61 = vpack.c.bf16 %v10863_v31, %v10856_v27 }
 0xdd2   : > { %14217 = vmatpush3.bf16.msra.mxu0 %v14216_v55  ;;  %13461 = vmatprep.mubr.msk.f32.mxu0 %vm14565_vm1, %v14566_v57 }
 0xdd3   : > { %14218 = vmatprep.subr.bf16.mxu0 %v14564_v56 }
 0xdd6   : > { %14220 = vmatpush3.bf16.msra.mxu0 %v14219_v19 }
 0xdd7   : > { %13459 = vmatprep.subr.mxu0 %v14566_v57 }
 0xdda   : > { %13460 = vmatpush3.msra.mxu0 %v10362_v50 }
 0xddb   : > { %13462 = vmatmul.mubr.f32.vlgmr.msra.gmra.mrb[20].mxu0 %v16033_v30  ;;  %14221 = vmatprep.subr.bf16.mxu0 %v14564_v56 }
 0xddc   : > { %14223 = vmatpush3.bf16.msra.mxu0 %v16045_v48  ;;  %13474 = vmatprep.mubr.msk.f32.mxu0 %vm14565_vm1, %v14566_v57  ;;  %v10833_v48 = vand.u32 4294901760, %v10832_v52 }
 0xddd   : > { %14224 = vmatprep.subr.bf16.mxu0 %v14564_v56 }
 0xde0   : > { %14226 = vmatpush3.bf16.msra.mxu0 %v16060_v2  ;;  %v8717_v2 = vld [vmem:[%s16265_s13] sm:$0x1] }
 0xde1   : > { %13472 = vmatprep.subr.mxu0 %v14566_v57 }
 0xde4   : > { %13473 = vmatpush3.msra.mxu0 %v16057_v63  ;;  %v14252_v63 = vpack.c.bf16 %v10849_v11, %v10842_v36 }
 0xde5   : > { %13475 = vmatmul.mubr.f32.vlgmr.msra.gmra.mrb[20].mxu0 %v16033_v30  ;;  %14227 = vmatprep.subr.bf16.mxu0 %v14564_v56  ;;  %v10864_v30 = vsub.f32 %v16127_v34, %v10863_v31 }
 0xde6   : > { %14229 = vmatpush3.bf16.msra.mxu0 %v16134_v5  ;;  %13487 = vmatprep.mubr.msk.f32.mxu0 %vm14565_vm1, %v14566_v57 }
 0xde7   : > { %14230 = vmatprep.subr.bf16.mxu0 %v14564_v56  ;;  %v10865_v51 = vand.u32 4294901760, %v10864_v30 }
 0xde9   : > { %v14237_v49 = vpack.c.bf16 %v10865_v51, %v10858_v9 }
 0xdea   : > { %14232 = vmatpush3.bf16.msra.mxu0 %v14231_v4 }
 0xdeb   : > { %13485 = vmatprep.subr.mxu0 %v14566_v57 }
 0xdee   : > { %13486 = vmatpush3.msra.mxu0 %v16146_v7 }
 0xdef   : > { %13488 = vmatmul.mubr.f32.vlgmr.msra.gmra.mrb[20].mxu0 %v10833_v48  ;;  %14233 = vmatprep.subr.bf16.mxu0 %v14564_v56 }
 0xdf0   : > { %14235 = vmatpush3.bf16.msra.mxu0 %v14234_v54  ;;  %13500 = vmatprep.mubr.msk.f32.mxu0 %vm14565_vm1, %v14566_v57 }
 0xdf1   : > { %14236 = vmatprep.subr.bf16.mxu0 %v14564_v56 }
 0xdf4   : > { %14238 = vmatpush3.bf16.msra.mxu0 %v14237_v49 }
 0xdf5   : > { %13498 = vmatprep.subr.mxu0 %v14566_v57 }
 0xdf8   : > { %13499 = vmatpush3.msra.mxu0 %v10872_v13 }
 0xdf9   : > { %13501 = vmatmul.mubr.f32.vlgmr.msra.gmra.mrb[20].mxu0 %v16122_v26  ;;  %14239 = vmatprep.subr.bf16.mxu0 %v14564_v56 }
 0xdfa   : > { %14241 = vmatpush3.bf16.msra.mxu0 %v14240_v32  ;;  %13513 = vmatprep.mubr.msk.f32.mxu0 %vm14565_vm1, %v14566_v57 }
 0xdfb   : > { %14242 = vmatprep.subr.bf16.mxu0 %v14564_v56 }
 0xdfe   : > { %14244 = vmatpush3.bf16.msra.mxu0 %v14243_v1 }
 0xdff   : > { %13511 = vmatprep.subr.mxu0 %v14566_v57 }
 0xe02   : > { %13512 = vmatpush3.msra.mxu0 %v10869_v38 }
 0xe03   : > { %13514 = vmatmul.mubr.f32.vlgmr.msra.gmra.mrb[20].mxu0 %v10830_v12  ;;  %14245 = vmatprep.subr.bf16.mxu0 %v14564_v56 }
 0xe04   : > { %14247 = vmatpush3.bf16.msra.mxu0 %v16134_v5  ;;  %13526 = vmatprep.mubr.msk.f32.mxu0 %vm14565_vm1, %v14566_v57 }
 0xe05   : > { %14248 = vmatprep.subr.bf16.mxu0 %v14564_v56 }
 0xe08   : > { %14250 = vmatpush3.bf16.msra.mxu0 %v14231_v4 }
 0xe09   : > { %13524 = vmatprep.subr.mxu0 %v14566_v57 }
 0xe0c   : > { %13525 = vmatpush3.msra.mxu0 %v16146_v7 }
 0xe0d   : > { %13527 = vmatmul.mubr.f32.vlgmr.msra.gmra.mrb[20].mxu0 %v10831_v37  ;;  %14251 = vmatprep.subr.bf16.mxu0 %v14564_v56 }
 0xe0e   : > { %14253 = vmatpush3.bf16.msra.mxu0 %v14252_v63  ;;  %13539 = vmatprep.mubr.msk.f32.mxu0 %vm14565_vm1, %v14566_v57 }
 0xe0f   : > { %14254 = vmatprep.subr.bf16.mxu0 %v14564_v56 }
 0xe12   : > { %14256 = vmatpush3.bf16.msra.mxu0 %v14255_v61 }
 0xe13   : > { %13537 = vmatprep.subr.mxu0 %v14566_v57 }
 0xe16   : > { %13538 = vmatpush3.msra.mxu0 %v10870_v25 }
 0xe17   : > { %13540 = vmatmul.mubr.f32.vlgmr.msra.gmra.mrb[20].mxu0 %v16122_v26  ;;  %14257 = vmatprep.subr.bf16.mxu0 %v14564_v56 }
 0xe18   : > { %14259 = vmatpush3.bf16.msra.mxu0 %v16134_v5  ;;  %13552 = vmatprep.mubr.msk.f32.mxu0 %vm14565_vm1, %v14566_v57 }
 0xe19   : > { %14260 = vmatprep.subr.bf16.mxu0 %v14564_v56 }
 0xe1c   : > { %14262 = vmatpush3.bf16.msra.mxu0 %v14231_v4 }
 0xe1d   : > { %13550 = vmatprep.subr.mxu0 %v14566_v57 }
 0xe20   : > { %13551 = vmatpush3.msra.mxu0 %v16146_v7 }
 0xe21   : > { %13553 = vmatmul.mubr.f32.vlgmr.msra.gmra.mrb[20].mxu0 %v16122_v26 }
 0xef4   : > { %v11253_v53 = vpop.f32.mrb[20].mxu0 }
 0xef5   : > { %v14263_v39 = vadd.f32 %v11253_v53, %v8717_v2  ;;  %v13554_v43 = vpop.f32.mrb[21].mxu0 }
 0xef7   : > { %v11261_v58 = vsel %vm11260_vm11, %v14263_v39, 0.0 }
 0xef8   : > { %11262 = vadd.xlane.f32.xlu0 %v11261_v58 }
 0xf85   : > { %v11263_v14 = vpop.xlane.xlu0 %11262 }
 0xf86   : > { %v11264_v56 = vrot.slane %v11263_v14, 4 }
 0xf88   : > { %v11265_v20 = vadd.f32 %v11264_v56, %v11263_v14 }
 0xf8a   : > { %v11266_v10 = vrot.slane %v11265_v20, 2 }
 0xf8c   : > { %v11267_v57 = vadd.f32 %v11266_v10, %v11265_v20 }
 0xf8e   : > { %v11268_v42 = vrot.slane %v11267_v57, 1 }
 0xf90   : > { %v11269_v47 = vadd.f32 %v11268_v42, %v11267_v57 }
 0xf92   : > { %14436 = vpush %v11269_v47 }
 0xfc3   : > { %s14437_s19 = spop %14436 }
 0xfc4   : > { %v11271_v50 = vstv %s14437_s19  ;;  %s513_s19 = scalar_lea.vmem [#allocation2], %s512_s23 }
 0xfc5   : > { %v11273_v40 = vmul.f32 0.03125, %v11271_v50 }
 0xfc7   : > { %v11274_v3 = vsub.f32 %v14263_v39, %v11273_v40 }
 0xfc9   : > { %v11275_v15 = vmul.f32 %v11274_v3, %v11274_v3 }
 0xfcb   : > { %v11276_v17 = vsel %vm11260_vm11, %v11275_v15, 0.0 }
 0xfcc   : > { %11277 = vadd.xlane.f32.xlu1 %v11276_v17 }
0x1059   : > { %v11278_v18 = vpop.xlane.xlu1 %11277 }
0x105a   : > { %v11279_v0 = vrot.slane %v11278_v18, 4 }
0x105c   : > { %v11280_v55 = vadd.f32 %v11279_v0, %v11278_v18 }
0x105e   : > { %v11281_v19 = vrot.slane %v11280_v55, 2 }
0x1060   : > { %v11282_v28 = vadd.f32 %v11281_v19, %v11280_v55 }
0x1062   : > { %v11283_v35 = vrot.slane %v11282_v28, 1 }
0x1064   : > { %v11284_v22 = vadd.f32 %v11283_v35, %v11282_v28 }
0x1066   : > { %14438 = vpush %v11284_v22 }
0x1097   : > { %s14439_s30 = spop %14438 }
0x1098   : > { %v11286_v21 = vstv %s14439_s30  ;;  %s11334_s30 = sshll.u32 %s513_s19, 4  ;;  %s16211_s30 = int_to_ptr.vmem [resolvable:$true] %s11334_s30 }
0x1099   : > { %v11287_v33 = vmul.f32 0.03125, %v11286_v21  ;;  %s14500_s1 = scalar_lea.vmem %s16211_s30, 16  ;;  %p14507_p0 = scmp.lt.s32.totalorder %s16211_s30, %s14505_s2 }
0x109a   : > { %p14501_p11 = scmp.ne.s32.totalorder %s16211_s30, %s14500_s1  ;;  %p14508_p1 = scmp.lt.s32.totalorder %s14506_s3, %s14500_s1 }
0x109b   : > { %v11288_v23 = vadd.f32 1e-05, %v11287_v33 }
0x109c   : > { %p14502_p12 = pnand %p14501_p11, %p14691_p5  ;;  %p14509_p2 = por %p14508_p1, %p14507_p0 }
0x109d   : > { %14494 = vrsqrt.f32 %v11288_v23 }
0x109e   : > { %p14503_p13 = pneg %p14502_p12 }
0x10a0   : > { %p14510_p3 = pnand %p14509_p2, %p14503_p13 }
0x10a7   : > { %v14495_v41 = vpop.eup %14494 }
0x10a8   : > { %v11290_v26 = vmul.f32 %v14495_v41, %v11274_v3 }
0x10aa   : > { %v11291_v59 = vmul.f32 %v11290_v26, %v11258_v24 }
0x10ac   : > { %v11292_v60 = vadd.f32 %v11291_v59, %v11259_v44 }
0x10ae   : > { %v11294_v34 = vmul.f32 0.70710677, %v11292_v60  ;;  %v11293_v25 = vmul.f32 0.5, %v11292_v60 }
0x10b0   : > { %v11295_v36 = vand.u32 2147483647, %v11294_v34  ;;  %vm11315_vm12 = vcmp.ge.f32.partialorder %v11294_v34, 0.0 }
0x10b2   : > { %v11296_v11 = vmul.f32 0.3275911, %v11295_v36  ;;  %v11309_v5 = vsub.f32 0.0, %v11295_v36 }
0x10b4   : > { %v11297_v12 = vadd.f32 1.0, %v11296_v11  ;;  %v11310_v6 = vmul.f32 %v11309_v5, %v11295_v36 }
0x10b6   : > { %14496 = vrcp.f32 %v11297_v12  ;;  %v11311_v31 = vmul.f32 1.442695, %v11310_v6 }
0x10b8   : > { %14498 = vpow2.f32 %v11311_v31 }
0x10c0   : > { %v14497_v62 = vpop.eup %14496 }
0x10c1   : > { %v11300_v8 = vmul.f32 1.0614054, %v14497_v62 }
0x10c2   : > { %v14499_v30 = vpop.eup %14498 }
0x10c3   : > { %v11301_v27 = vadd.f32 -1.4531521, %v11300_v8 }
0x10c5   : > { %v11302_v7 = vmul.f32 %v14497_v62, %v11301_v27 }
0x10c7   : > { %v11303_v37 = vadd.f32 1.4214138, %v11302_v7 }
0x10c9   : > { %v11304_v4 = vmul.f32 %v14497_v62, %v11303_v37 }
0x10cb   : > { %v11305_v38 = vadd.f32 -0.28449672, %v11304_v4 }
0x10cd   : > { %v11306_v29 = vmul.f32 %v14497_v62, %v11305_v38 }
0x10cf   : > { %v11307_v45 = vadd.f32 0.2548296, %v11306_v29 }
0x10d1   : > { %v11308_v46 = vmul.f32 %v14497_v62, %v11307_v45 }
0x10d3   : > { %v11313_v52 = vmul.f32 %v14499_v30, %v11308_v46 }
0x10d5   : > { %v11314_v54 = vsub.f32 1.0, %v11313_v52 }
0x10d7   : > { %v11316_v9 = vsub.f32 0.0, %v11314_v54 }
0x10d9   : > { %v11317_v51 = vsel %vm11315_vm12, %v11314_v54, %v11316_v9 }
0x10da   : > { %v11318_v48 = vadd.f32 1.0, %v11317_v51 }
0x10dc   : > { %v11319_v49 = vmul.f32 %v11318_v48, %v11293_v25 }
0x10de   : > { %11320 = vst.msk [vmem:[%s513_s19] sm:$0x1] %vm11260_vm11, %v11319_v49 }
0x10df   : > { %14513 = shalt.err (!%p14510_p3)
}
0x10e0   : > { %s14514_s23 = scalar_lea.hbm %s16209_s28, 16  ;;  %s14518_s20 = scalar_lea.hbm %s16268_s16, 32 }
0x10e1   : > { %p14515_p4 = scmp.ne.s32.totalorder %s16209_s28, %s14514_s23  ;;  %p14519_p9 = scmp.lt.u32.totalorder %s16209_s28, %s16268_s16 }
0x10e2   : > { %p14520_p10 = scmp.lt.u32.totalorder %s14518_s20, %s14514_s23  ;;  %p14522_p12 = scmp.lt.u32.totalorder %s14514_s23, %s16209_s28 }
0x10e3   : > { %p14516_p7 = pnand %p14515_p4, %p14691_p5 }
0x10e4   : > { %p14521_p11 = por %p14520_p10, %p14519_p9 }
0x10e5   : > { %p14517_p8 = pneg %p14516_p7 }
0x10e6   : > { %p14523_p13 = por %p14522_p12, %p14521_p11 }
0x10e8   : > { %p14524_p0 = pnand %p14523_p13, %p14517_p8 }
0x10ea   : > { %14527 = shalt.err (!%p14524_p0)
}
0x10eb   : > { %14440 = dma.vmem_to_hbm [thread:$0]  (%p14691_p5), %s16211_s30, 16, %s16209_s28, %s11322_s29  }
0x10ec PF: > { %p14446_p1 = scmp.ge.s32.totalorder %s14562_s24, 2  ;;  %s11346_s1 = sand.u32 1, %s14550_s21  }
0x10ed   : > { %s11347_s3 = scalar_lea.sflag [#allocation3], %s11346_s1 }
0x10ee   : > { %p14443_p2 = pnand %p14446_p1, %p14695_p6 }
0x10f0   : > { %14545 = dma.done.wait (!%p14443_p2), %s11347_s3, 16  }
0x10f1   : > { %14547 = vsyncadd (!%p14443_p2), %s11347_s3, 4294967280  ;;  %s16282_s25 = sld [smem:[#allocation5_spill]]  ;;  %s16283_s23 = sld [smem:[#allocation6_spill]] }
0x10f2   : > { %p26_p3 = scmp.ge.s32.totalorder %s14678_s27, 4   ;;  %s16284_s21 = smov %s14554_s22 }
0x10f3   : > { %s16286_s24 = smov %s14678_s27 }
0x10f4   :  { %28 = sbr.rel (!%p26_p3) target bundleno = 8 (0x8), region = 134 }
0x10f7   : > { %s16285_s22 = smov %s16282_s25 }
0x10fb   :  { %11351 = vsyncpa [#allocation3], 1 }
0x10fc   :  { %11353 = vsyncpa [#allocation3 + $0x1], 1 }

</bundles_post_ra>
